<compile_context>
chip_gen: v7x
topology: tpu7x:2x2x1
jax: 0.10.0
libtpu: 0.0.40
codegen_flags: <defaults>
</compile_context>

<pallas_src>
import jax
import jax.numpy as jnp
from jax.experimental import pallas as pl
from jax.experimental.pallas import tpu as pltpu


# ----------------------------------------------------------------------------
# In-kernel helpers (operate on jnp values inside the Pallas kernel body)
# ----------------------------------------------------------------------------
def _pad1(x):
    """Zero-pad the two trailing (spatial) dims of (C, H, W) by 1 pixel."""
    Cc, H, W = x.shape
    zc = jnp.zeros((Cc, H, 1), x.dtype)
    x = jnp.concatenate([zc, x, zc], axis=2)          # (C, H, W+2)
    zr = jnp.zeros((Cc, 1, W + 2), x.dtype)
    return jnp.concatenate([zr, x, zr], axis=1)       # (C, H+2, W+2)


def _conv3x3_mxu(xp, wm, b):
    """3x3 conv (pad already applied) as ONE MXU matmul via im2col.

    xp: (Cin, H+2, W+2) f32  zero-padded activation
    wm: (Cout, 9*Cin)   bf16 weights, row-major over (dy, dx, cin)
    b : (Cout, 1)       f32  bias
    returns (Cout, H*W) f32
    """
    Cin, Hp, Wp = xp.shape
    H, W = Hp - 2, Wp - 2
    cols = [xp[:, dy:dy + H, dx:dx + W].reshape(Cin, H * W)
            for dy in range(3) for dx in range(3)]
    patches = jnp.concatenate(cols, axis=0).astype(jnp.bfloat16)   # (9*Cin, H*W)
    y = jnp.dot(wm, patches, preferred_element_type=jnp.float32)   # (Cout, H*W)
    return y + b


# ----------------------------------------------------------------------------
# Fused RDB kernel: dense1 -> dense2 -> 1x1 LFF, one batch element per step.
# ----------------------------------------------------------------------------
def _rdb_kernel(x_ref, w1_ref, b1_ref, w2_ref, b2_ref, wl_ref, bl_ref, o_ref):
    _, C, H, W = x_ref.shape
    HW = H * W

    x = x_ref[0]                                      # (C, H, W) f32
    x2d = x.reshape(C, HW)                            # (C, HW)

    # DenseLayer 1: C -> concat -> 2C channels (all kept on-chip)
    y1 = jnp.maximum(_conv3x3_mxu(_pad1(x), w1_ref[...], b1_ref[...]), 0.0)
    cat1 = jnp.concatenate([x2d, y1], axis=0)         # (2C, HW) f32

    # DenseLayer 2: 2C -> concat -> 4C channels
    y2 = jnp.maximum(
        _conv3x3_mxu(_pad1(cat1.reshape(2 * C, H, W)), w2_ref[...], b2_ref[...]),
        0.0)
    cat2 = jnp.concatenate([cat1, y2], axis=0)        # (4C, HW) f32

    # Local feature fusion (1x1 conv): (4C,4C) @ (4C,HW), bf16 operands, f32 acc
    y3 = jnp.dot(wl_ref[...], cat2.astype(jnp.bfloat16),
                 preferred_element_type=jnp.float32) + bl_ref[...]

    # Lane-dense store: last dim = HW (multiple of 128 here) -> unmasked vst.
    o_ref[0] = y3.astype(o_ref.dtype)


# ----------------------------------------------------------------------------
# Wrapper: NCHW in / NCHW out, matching the PyTorch module. No transpose or
# pad passes on activations; only tiny one-time weight reshape/casts.
# ----------------------------------------------------------------------------
def rdb_forward(x_nchw, params):
    N, C, H, W = x_nchw.shape
    C2, C4 = 2 * C, 4 * C

    # (3,3,Cin,Cout) HWIO -> (Cout, 9*Cin), bf16, row-major over (dy, dx, cin)
    w1m = jnp.transpose(params["w1"], (3, 0, 1, 2)).reshape(C, 9 * C)
    w1m = w1m.astype(jnp.bfloat16)
    w2m = jnp.transpose(params["w2"], (3, 0, 1, 2)).reshape(C2, 9 * C2)
    w2m = w2m.astype(jnp.bfloat16)
    wlm = jnp.transpose(params["wl"]).astype(jnp.bfloat16)      # (4C_out, 4C_in)
    b1 = params["b1"].reshape(C, 1)
    b2 = params["b2"].reshape(C2, 1)
    bl = params["bl"].reshape(C4, 1)

    out = pl.pallas_call(
        _rdb_kernel,
        out_shape=jax.ShapeDtypeStruct((N, C4, H * W), x_nchw.dtype),
        grid=(N,),
        in_specs=[
            pl.BlockSpec((1, C, H, W), lambda n: (n, 0, 0, 0)),
            pl.BlockSpec((C, 9 * C), lambda n: (0, 0)),
            pl.BlockSpec((C, 1), lambda n: (0, 0)),
            pl.BlockSpec((C2, 9 * C2), lambda n: (0, 0)),
            pl.BlockSpec((C2, 1), lambda n: (0, 0)),
            pl.BlockSpec((C4, C4), lambda n: (0, 0)),
            pl.BlockSpec((C4, 1), lambda n: (0, 0)),
        ],
        out_specs=pl.BlockSpec((1, C4, H * W), lambda n: (n, 0, 0)),
        compiler_params=pltpu.CompilerParams(
            dimension_semantics=("parallel",),
            vmem_limit_bytes=32 * 1024 * 1024),
    )(x_nchw, w1m, b1, w2m, b2, wlm, bl)

    # Free, contiguity-preserving reshape back to NCHW.
    return out.reshape(N, C4, H, W)


# ----------------------------------------------------------------------------
# Pure-JAX f32 reference (correctness check only).
# ----------------------------------------------------------------------------
def rdb_reference(x_nchw, params):
    def conv3x3(x, w, b):
        y = jax.lax.conv_general_dilated(
            x, w, (1, 1), "SAME",
            dimension_numbers=("NCHW", "HWIO", "NCHW"))
        return y + b.reshape(1, -1, 1, 1)

    x1 = jnp.concatenate(
        [x_nchw, jax.nn.relu(conv3x3(x_nchw, params["w1"], params["b1"]))], 1)
    x2 = jnp.concatenate(
        [x1, jax.nn.relu(conv3x3(x1, params["w2"], params["b2"]))], 1)
    y = jnp.einsum("nchw,co->nohw", x2, params["wl"])
    return y + params["bl"].reshape(1, -1, 1, 1)


def init_params(key, C):
    ks = jax.random.split(key, 6)
    return {
        # DenseLayer 1: conv3x3  C -> C   (HWIO weights)
        "w1": 0.1 * jax.random.normal(ks[0], (3, 3, C, C), jnp.float32),
        "b1": 0.1 * jax.random.normal(ks[1], (C,), jnp.float32),
        # DenseLayer 2: conv3x3  2C -> 2C
        "w2": 0.1 * jax.random.normal(ks[2], (3, 3, 2 * C, 2 * C), jnp.float32),
        "b2": 0.1 * jax.random.normal(ks[3], (2 * C,), jnp.float32),
        # LFF: conv1x1  4C -> 4C, stored as (Cin, Cout)
        "wl": 0.1 * jax.random.normal(ks[4], (4 * C, 4 * C), jnp.float32),
        "bl": 0.1 * jax.random.normal(ks[5], (4 * C,), jnp.float32),
    }


if __name__ == "__main__":
    key = jax.random.PRNGKey(0)
    k_x, k_p = jax.random.split(key)

    N, C, H, W = 2, 4, 16, 16
    x = jax.random.normal(k_x, (N, C, H, W), jnp.float32)   # NCHW like PyTorch
    params = init_params(k_p, C)

    out = jax.block_until_ready(jax.jit(rdb_forward)(x, params))
    assert out.shape == (N, 4 * C, H, W), out.shape

    ref = jax.block_until_ready(jax.jit(rdb_reference)(x, params))
    # bf16 MXU operands (f32 accumulation) -> loosened tolerance vs. f32 ref.
    assert jnp.allclose(out, ref, atol=5e-2, rtol=5e-2), (
        float(jnp.max(jnp.abs(out - ref))))

    print("KERNEL_OK")
</pallas_src>

<mosaic_0001>
module attributes {stable_mosaic.version = 11 : i64} {
  func.func @_rdb_kernel(%arg0: i32, %arg1: memref<1x4x16x16xf32, #tpu.memory_space<vmem>>, %arg2: memref<4x36xbf16, #tpu.memory_space<vmem>>, %arg3: memref<4x1xf32, #tpu.memory_space<vmem>>, %arg4: memref<8x72xbf16, #tpu.memory_space<vmem>>, %arg5: memref<8x1xf32, #tpu.memory_space<vmem>>, %arg6: memref<16x16xbf16, #tpu.memory_space<vmem>>, %arg7: memref<16x1xf32, #tpu.memory_space<vmem>>, %arg8: memref<1x16x256xf32, #tpu.memory_space<vmem>>) attributes {dimension_semantics = [#tpu.dimension_semantics<parallel>], iteration_bounds = array<i64: 2>, scalar_prefetch = 0 : i64, scratch_operands = 0 : i64, tpu.core_type = #tpu.core_type<tc>, window_params = [{transform_indices = @transform_0, window_bounds = array<i64: 1, 4, 16, 16>}, {pipeline_mode = #tpu.pipeline_mode<synchronous>, transform_indices = @transform_1, window_bounds = array<i64: 4, 36>}, {pipeline_mode = #tpu.pipeline_mode<synchronous>, transform_indices = @transform_2, window_bounds = array<i64: 4, 1>}, {pipeline_mode = #tpu.pipeline_mode<synchronous>, transform_indices = @transform_3, window_bounds = array<i64: 8, 72>}, {pipeline_mode = #tpu.pipeline_mode<synchronous>, transform_indices = @transform_4, window_bounds = array<i64: 8, 1>}, {pipeline_mode = #tpu.pipeline_mode<synchronous>, transform_indices = @transform_5, window_bounds = array<i64: 16, 16>}, {pipeline_mode = #tpu.pipeline_mode<synchronous>, transform_indices = @transform_6, window_bounds = array<i64: 16, 1>}, {transform_indices = @transform_7, window_bounds = array<i64: 1, 16, 256>}]} {
    %c0 = arith.constant 0 : index
    %c0_0 = arith.constant 0 : index
    %c0_1 = arith.constant 0 : index
    %c0_2 = arith.constant 0 : index
    %0 = vector.load %arg1[%c0, %c0_0, %c0_1, %c0_2] : memref<1x4x16x16xf32, #tpu.memory_space<vmem>>, vector<1x4x16x16xf32>
    %1 = vector.shape_cast %0 : vector<1x4x16x16xf32> to vector<4x16x16xf32>
    %2 = vector.shape_cast %1 : vector<4x16x16xf32> to vector<4x256xf32>
    %cst = arith.constant 0.000000e+00 : f32
    %3 = vector.broadcast %cst : f32 to vector<4x16x1xf32>
    %4 = tpu.concatenate %3, %1, %3 in 2 : vector<4x16x1xf32>, vector<4x16x16xf32>, vector<4x16x1xf32> -> vector<4x16x18xf32>
    %cst_3 = arith.constant 0.000000e+00 : f32
    %5 = vector.broadcast %cst_3 : f32 to vector<4x1x18xf32>
    %6 = tpu.concatenate %5, %4, %5 in 1 : vector<4x1x18xf32>, vector<4x16x18xf32>, vector<4x1x18xf32> -> vector<4x18x18xf32>
    %c0_4 = arith.constant 0 : index
    %c0_5 = arith.constant 0 : index
    %7 = vector.load %arg2[%c0_4, %c0_5] : memref<4x36xbf16, #tpu.memory_space<vmem>>, vector<4x36xbf16>
    %c0_6 = arith.constant 0 : index
    %c0_7 = arith.constant 0 : index
    %8 = vector.load %arg3[%c0_6, %c0_7] : memref<4x1xf32, #tpu.memory_space<vmem>>, vector<4x1xf32>
    %9 = vector.extract_strided_slice %6 {offsets = [0, 0, 0], sizes = [4, 16, 16], strides = [1, 1, 1]} : vector<4x18x18xf32> to vector<4x16x16xf32>
    %10 = vector.shape_cast %9 : vector<4x16x16xf32> to vector<4x256xf32>
    %11 = vector.extract_strided_slice %6 {offsets = [0, 0, 1], sizes = [4, 16, 16], strides = [1, 1, 1]} : vector<4x18x18xf32> to vector<4x16x16xf32>
    %12 = vector.shape_cast %11 : vector<4x16x16xf32> to vector<4x256xf32>
    %13 = vector.extract_strided_slice %6 {offsets = [0, 0, 2], sizes = [4, 16, 16], strides = [1, 1, 1]} : vector<4x18x18xf32> to vector<4x16x16xf32>
    %14 = vector.shape_cast %13 : vector<4x16x16xf32> to vector<4x256xf32>
    %15 = vector.extract_strided_slice %6 {offsets = [0, 1, 0], sizes = [4, 16, 16], strides = [1, 1, 1]} : vector<4x18x18xf32> to vector<4x16x16xf32>
    %16 = vector.shape_cast %15 : vector<4x16x16xf32> to vector<4x256xf32>
    %17 = vector.extract_strided_slice %6 {offsets = [0, 1, 1], sizes = [4, 16, 16], strides = [1, 1, 1]} : vector<4x18x18xf32> to vector<4x16x16xf32>
    %18 = vector.shape_cast %17 : vector<4x16x16xf32> to vector<4x256xf32>
    %19 = vector.extract_strided_slice %6 {offsets = [0, 1, 2], sizes = [4, 16, 16], strides = [1, 1, 1]} : vector<4x18x18xf32> to vector<4x16x16xf32>
    %20 = vector.shape_cast %19 : vector<4x16x16xf32> to vector<4x256xf32>
    %21 = vector.extract_strided_slice %6 {offsets = [0, 2, 0], sizes = [4, 16, 16], strides = [1, 1, 1]} : vector<4x18x18xf32> to vector<4x16x16xf32>
    %22 = vector.shape_cast %21 : vector<4x16x16xf32> to vector<4x256xf32>
    %23 = vector.extract_strided_slice %6 {offsets = [0, 2, 1], sizes = [4, 16, 16], strides = [1, 1, 1]} : vector<4x18x18xf32> to vector<4x16x16xf32>
    %24 = vector.shape_cast %23 : vector<4x16x16xf32> to vector<4x256xf32>
    %25 = vector.extract_strided_slice %6 {offsets = [0, 2, 2], sizes = [4, 16, 16], strides = [1, 1, 1]} : vector<4x18x18xf32> to vector<4x16x16xf32>
    %26 = vector.shape_cast %25 : vector<4x16x16xf32> to vector<4x256xf32>
    %27 = tpu.concatenate %10, %12, %14, %16, %18, %20, %22, %24, %26 in 0 : vector<4x256xf32>, vector<4x256xf32>, vector<4x256xf32>, vector<4x256xf32>, vector<4x256xf32>, vector<4x256xf32>, vector<4x256xf32>, vector<4x256xf32>, vector<4x256xf32> -> vector<36x256xf32>
    %28 = arith.truncf %27 : vector<36x256xf32> to vector<36x256xbf16>
    %cst_8 = arith.constant dense<0.000000e+00> : vector<4x256xf32>
    %29 = tpu.matmul %7, %28, %cst_8 {dimension_numbers = #tpu.dot_dimension_numbers<[1], [0], [0], [1], [0, 0, 1, 1], [], []>} : vector<4x36xbf16>, vector<36x256xbf16>, vector<4x256xf32> -> vector<4x256xf32>
    %30 = vector.broadcast %8 : vector<4x1xf32> to vector<4x256xf32>
    %31 = arith.addf %29, %30 : vector<4x256xf32>
    %cst_9 = arith.constant 0.000000e+00 : f32
    %32 = vector.broadcast %cst_9 : f32 to vector<4x256xf32>
    %33 = arith.maximumf %31, %32 : vector<4x256xf32>
    %34 = tpu.concatenate %2, %33 in 0 : vector<4x256xf32>, vector<4x256xf32> -> vector<8x256xf32>
    %35 = vector.shape_cast %34 : vector<8x256xf32> to vector<8x16x16xf32>
    %cst_10 = arith.constant 0.000000e+00 : f32
    %36 = vector.broadcast %cst_10 : f32 to vector<8x16x1xf32>
    %37 = tpu.concatenate %36, %35, %36 in 2 : vector<8x16x1xf32>, vector<8x16x16xf32>, vector<8x16x1xf32> -> vector<8x16x18xf32>
    %cst_11 = arith.constant 0.000000e+00 : f32
    %38 = vector.broadcast %cst_11 : f32 to vector<8x1x18xf32>
    %39 = tpu.concatenate %38, %37, %38 in 1 : vector<8x1x18xf32>, vector<8x16x18xf32>, vector<8x1x18xf32> -> vector<8x18x18xf32>
    %c0_12 = arith.constant 0 : index
    %c0_13 = arith.constant 0 : index
    %40 = vector.load %arg4[%c0_12, %c0_13] : memref<8x72xbf16, #tpu.memory_space<vmem>>, vector<8x72xbf16>
    %c0_14 = arith.constant 0 : index
    %c0_15 = arith.constant 0 : index
    %41 = vector.load %arg5[%c0_14, %c0_15] : memref<8x1xf32, #tpu.memory_space<vmem>>, vector<8x1xf32>
    %42 = vector.extract_strided_slice %39 {offsets = [0, 0, 0], sizes = [8, 16, 16], strides = [1, 1, 1]} : vector<8x18x18xf32> to vector<8x16x16xf32>
    %43 = vector.shape_cast %42 : vector<8x16x16xf32> to vector<8x256xf32>
    %44 = vector.extract_strided_slice %39 {offsets = [0, 0, 1], sizes = [8, 16, 16], strides = [1, 1, 1]} : vector<8x18x18xf32> to vector<8x16x16xf32>
    %45 = vector.shape_cast %44 : vector<8x16x16xf32> to vector<8x256xf32>
    %46 = vector.extract_strided_slice %39 {offsets = [0, 0, 2], sizes = [8, 16, 16], strides = [1, 1, 1]} : vector<8x18x18xf32> to vector<8x16x16xf32>
    %47 = vector.shape_cast %46 : vector<8x16x16xf32> to vector<8x256xf32>
    %48 = vector.extract_strided_slice %39 {offsets = [0, 1, 0], sizes = [8, 16, 16], strides = [1, 1, 1]} : vector<8x18x18xf32> to vector<8x16x16xf32>
    %49 = vector.shape_cast %48 : vector<8x16x16xf32> to vector<8x256xf32>
    %50 = vector.extract_strided_slice %39 {offsets = [0, 1, 1], sizes = [8, 16, 16], strides = [1, 1, 1]} : vector<8x18x18xf32> to vector<8x16x16xf32>
    %51 = vector.shape_cast %50 : vector<8x16x16xf32> to vector<8x256xf32>
    %52 = vector.extract_strided_slice %39 {offsets = [0, 1, 2], sizes = [8, 16, 16], strides = [1, 1, 1]} : vector<8x18x18xf32> to vector<8x16x16xf32>
    %53 = vector.shape_cast %52 : vector<8x16x16xf32> to vector<8x256xf32>
    %54 = vector.extract_strided_slice %39 {offsets = [0, 2, 0], sizes = [8, 16, 16], strides = [1, 1, 1]} : vector<8x18x18xf32> to vector<8x16x16xf32>
    %55 = vector.shape_cast %54 : vector<8x16x16xf32> to vector<8x256xf32>
    %56 = vector.extract_strided_slice %39 {offsets = [0, 2, 1], sizes = [8, 16, 16], strides = [1, 1, 1]} : vector<8x18x18xf32> to vector<8x16x16xf32>
    %57 = vector.shape_cast %56 : vector<8x16x16xf32> to vector<8x256xf32>
    %58 = vector.extract_strided_slice %39 {offsets = [0, 2, 2], sizes = [8, 16, 16], strides = [1, 1, 1]} : vector<8x18x18xf32> to vector<8x16x16xf32>
    %59 = vector.shape_cast %58 : vector<8x16x16xf32> to vector<8x256xf32>
    %60 = tpu.concatenate %43, %45, %47, %49, %51, %53, %55, %57, %59 in 0 : vector<8x256xf32>, vector<8x256xf32>, vector<8x256xf32>, vector<8x256xf32>, vector<8x256xf32>, vector<8x256xf32>, vector<8x256xf32>, vector<8x256xf32>, vector<8x256xf32> -> vector<72x256xf32>
    %61 = arith.truncf %60 : vector<72x256xf32> to vector<72x256xbf16>
    %cst_16 = arith.constant dense<0.000000e+00> : vector<8x256xf32>
    %62 = tpu.matmul %40, %61, %cst_16 {dimension_numbers = #tpu.dot_dimension_numbers<[1], [0], [0], [1], [0, 0, 1, 1], [], []>} : vector<8x72xbf16>, vector<72x256xbf16>, vector<8x256xf32> -> vector<8x256xf32>
    %63 = vector.broadcast %41 : vector<8x1xf32> to vector<8x256xf32>
    %64 = arith.addf %62, %63 : vector<8x256xf32>
    %cst_17 = arith.constant 0.000000e+00 : f32
    %65 = vector.broadcast %cst_17 : f32 to vector<8x256xf32>
    %66 = arith.maximumf %64, %65 : vector<8x256xf32>
    %67 = tpu.concatenate %34, %66 in 0 : vector<8x256xf32>, vector<8x256xf32> -> vector<16x256xf32>
    %c0_18 = arith.constant 0 : index
    %c0_19 = arith.constant 0 : index
    %68 = vector.load %arg6[%c0_18, %c0_19] : memref<16x16xbf16, #tpu.memory_space<vmem>>, vector<16x16xbf16>
    %69 = arith.truncf %67 : vector<16x256xf32> to vector<16x256xbf16>
    %cst_20 = arith.constant dense<0.000000e+00> : vector<16x256xf32>
    %70 = tpu.matmul %68, %69, %cst_20 {dimension_numbers = #tpu.dot_dimension_numbers<[1], [0], [0], [1], [0, 0, 1, 1], [], []>} : vector<16x16xbf16>, vector<16x256xbf16>, vector<16x256xf32> -> vector<16x256xf32>
    %c0_21 = arith.constant 0 : index
    %c0_22 = arith.constant 0 : index
    %71 = vector.load %arg7[%c0_21, %c0_22] : memref<16x1xf32, #tpu.memory_space<vmem>>, vector<16x1xf32>
    %72 = vector.broadcast %71 : vector<16x1xf32> to vector<16x256xf32>
    %73 = arith.addf %70, %72 : vector<16x256xf32>
    %c0_23 = arith.constant 0 : index
    %c0_24 = arith.constant 0 : index
    %c0_25 = arith.constant 0 : index
    %74 = vector.load %arg8[%c0_23, %c0_24, %c0_25] : memref<1x16x256xf32, #tpu.memory_space<vmem>>, vector<1x16x256xf32>
    %75 = vector.shape_cast %74 : vector<1x16x256xf32> to vector<16x256xf32>
    %76 = vector.shape_cast %73 : vector<16x256xf32> to vector<1x16x256xf32>
    tpu.vector_store %arg8[%c0_23, %c0_24, %c0_25], %76 {strides = array<i32>} : memref<1x16x256xf32, #tpu.memory_space<vmem>>, vector<1x16x256xf32>,
    return
  }
  func.func @transform_0(%arg0: i32) -> (i32, i32, i32, i32) {
    %c0_i32 = arith.constant 0 : i32
    %c0_i32_0 = arith.constant 0 : i32
    %c0_i32_1 = arith.constant 0 : i32
    %c0_i32_2 = arith.constant 0 : i32
    return %arg0, %c0_i32, %c0_i32_0, %c0_i32_1 : i32, i32, i32, i32
  }
  func.func @transform_1(%arg0: i32) -> (i32, i32) {
    %c0_i32 = arith.constant 0 : i32
    %c0_i32_0 = arith.constant 0 : i32
    %c0_i32_1 = arith.constant 0 : i32
    return %c0_i32, %c0_i32_0 : i32, i32
  }
  func.func @transform_2(%arg0: i32) -> (i32, i32) {
    %c0_i32 = arith.constant 0 : i32
    %c0_i32_0 = arith.constant 0 : i32
    %c0_i32_1 = arith.constant 0 : i32
    return %c0_i32, %c0_i32_0 : i32, i32
  }
  func.func @transform_3(%arg0: i32) -> (i32, i32) {
    %c0_i32 = arith.constant 0 : i32
    %c0_i32_0 = arith.constant 0 : i32
    %c0_i32_1 = arith.constant 0 : i32
    return %c0_i32, %c0_i32_0 : i32, i32
  }
  func.func @transform_4(%arg0: i32) -> (i32, i32) {
    %c0_i32 = arith.constant 0 : i32
    %c0_i32_0 = arith.constant 0 : i32
    %c0_i32_1 = arith.constant 0 : i32
    return %c0_i32, %c0_i32_0 : i32, i32
  }
  func.func @transform_5(%arg0: i32) -> (i32, i32) {
    %c0_i32 = arith.constant 0 : i32
    %c0_i32_0 = arith.constant 0 : i32
    %c0_i32_1 = arith.constant 0 : i32
    return %c0_i32, %c0_i32_0 : i32, i32
  }
  func.func @transform_6(%arg0: i32) -> (i32, i32) {
    %c0_i32 = arith.constant 0 : i32
    %c0_i32_0 = arith.constant 0 : i32
    %c0_i32_1 = arith.constant 0 : i32
    return %c0_i32, %c0_i32_0 : i32, i32
  }
  func.func @transform_7(%arg0: i32) -> (i32, i32, i32) {
    %c0_i32 = arith.constant 0 : i32
    %c0_i32_0 = arith.constant 0 : i32
    %c0_i32_1 = arith.constant 0 : i32
    return %arg0, %c0_i32, %c0_i32_0 : i32, i32, i32
  }
}

</mosaic_0001>

<bundles_post_ra>
// kernel: rdb_forward.1
= control target key start
LH: loop header
LB: loop body
LE: loop exit
PB: predicated region body
PF: predicated region fallthrough
CT: control target
= control target key end

     0   :  { %s7682_s24 = smov 0   ;;  %s12049_s0 = inlined_call_operand.vmem [shape: f32[2,4,16,16], index: 0, kind: input, shape index: {}]   ;;  %s12050_s1 = inlined_call_operand.vmem [shape: bf16[4,36], index: 1, kind: input, shape index: {}]   ;;  %s12051_s2 = inlined_call_operand.vmem [shape: f32[4,1], index: 2, kind: input, shape index: {}]   ;;  %s12052_s3 = inlined_call_operand.vmem [shape: bf16[8,72], index: 3, kind: input, shape index: {}]   ;;  %s12053_s4 = inlined_call_operand.vmem [shape: f32[8,1], index: 4, kind: input, shape index: {}]   ;;  %s12054_s5 = inlined_call_operand.vmem [shape: bf16[16,16], index: 5, kind: input, shape index: {}]   ;;  %s12055_s6 = inlined_call_operand.vmem [shape: f32[16,1], index: 6, kind: input, shape index: {}]   ;;  %s12056_s7 = inlined_call_operand.vmem [shape: f32[2,16,256], index: 7, kind: output, shape index: {}]  }
   0x1 LB: > { %s6946_s25 = sadd.s32 4294967295, %s7626_s24   ;;  %p6950_p0 = scmp.ge.s32.totalorder %s7626_s24, 1  ;;  %s7626_s24 = sphi %s7682_s24, %s17_s24  }
   0x2   : > { %p237_p1 = scmp.lt.s32.totalorder %s7626_s24, 3 }
   0x4   : > { %p238_p2 = pnand %p6950_p0, %p237_p1 }
   0x6   : > { %241 = sbr.rel (%p238_p2) target bundleno = 1941 (0x795), region = 48 }
   0xd   : > { %p269_p3 = scmp.lt.s32.totalorder %s6946_s25, 1  ;;  %v293_v0 = vlaneseq  ;;  %v7628_v1 = vmov 1983009808   ;;  %s7629_s30 = smov 1   ;;  %vm533_vm0 = vcmask 7168   ;;  %vm542_vm1 = vcmask 138240  }
   0xe   : > { %v291_v2 = vunpack.c.l.s4 %v7628_v1  ;;  %vm559_vm2 = vcmask 1040384   ;;  %s7630_s8 = smov 127   ;;  %vm1268_vm3 = vcmask 1046528   ;;  %s7631_s9 = smov 126   ;;  %vm1963_vm4 = vcmask 1045504  }
   0xf   : > { %s12656_s25 = smov (!%p269_p3, %s6946_s25), 1  ;;  %v7693_v4 = vshrl.u32 %v293_v0, 7  ;;  %s7633_s10 = smov 32   ;;  %vm480_vm5 = vcmask 130048   ;;  %vm482_vm6 = vcmask 261120   ;;  %vm484_vm7 = vcmask 392192  }
  0x10   : > { %s6963_s26 = sshll.u32 %s12656_s25, 6  ;;  %v292_v3 = vunpack.c.0.s8 %v291_v2  ;;  %s7634_s11 = smov 64   ;;  %vm486_vm8 = vcmask 523264   ;;  %vm488_vm9 = vcmask 654336   ;;  %vm490_vm10 = vcmask 785408  }
  0x11   : > { %s273_s29 = scalar_lea.vmem %s12049_s0, %s6963_s26  ;;  %s7635_s12 = smov 96   ;;  %vm492_vm11 = vcmask 916480   ;;  %vm2682_vm12 = vcmask 1043456   ;;  %vm2706_vm13 = vcmask 1041408   ;;  %vm2702_vm14 = vcmask 293888  }
  0x12   : > { %v282_v5 = vld [vmem:[%s273_s29 + $0x10] sm:$0xff]  ;;  %v280_v6 = vld [vmem:[%s273_s29] sm:$0xff]  ;;  %v281_v7 = vld [vmem:[%s273_s29 + $0x8] sm:$0xff]  ;;  %v7701_v10 = vsub.s32 %v292_v3, %v7693_v4  ;;  %s7637_s13 = smov 16   ;;  %s7638_s14 = smov 48   ;;  %vm6767_vm15 = vcmask 588800  }
  0x13   : > { %513 = vrot.lane.b32.xlu1 %v282_v5, %s7629_s30  ;;  %509 = vrot.lane.b32.xlu0 %v280_v6, %s7629_s30  ;;  %v285_v8 = vld [vmem:[%s273_s29 + $0x28] sm:$0xff]  ;;  %v283_v9 = vld [vmem:[%s273_s29 + $0x18] sm:$0xff]  ;;  %s7639_s15 = smov 80   ;;  %s7640_s16 = smov 112  }
  0x14   : > { %v356_v11 = vcombine.low %v281_v7, %v285_v8  ;;  %v357_v12 = vcombine.high %v281_v7, %v285_v8  ;;  %v284_v13 = vld [vmem:[%s273_s29 + $0x20] sm:$0xff]  ;;  %v287_v14 = vld [vmem:[%s273_s29 + $0x38] sm:$0xff]  ;;  %v286_v19 = vld [vmem:[%s273_s29 + $0x30] sm:$0xff] }
  0x15   : > { %v288_v15 = vcombine.low %v280_v6, %v284_v13  ;;  %v289_v16 = vcombine.high %v280_v6, %v284_v13  ;;  %v372_v17 = vcombine.low %v283_v9, %v287_v14  ;;  %v373_v18 = vcombine.high %v283_v9, %v287_v14 }
  0x16   : > { %v7704_v20 = vrot.slane %v356_v11, %v7701_v10  ;;  %v7707_v21 = vrot.slane %v357_v12, %v7701_v10  ;;  %v304_v22 = vcombine.low %v282_v5, %v286_v19  ;;  %v305_v23 = vcombine.high %v282_v5, %v286_v19 }
  0x17   : > { %515 = vrot.lane.b32.xlu1 %v283_v9, %s7629_s30  ;;  %511 = vrot.lane.b32.xlu0 %v281_v7, %s7629_s30  ;;  %v7712_v24 = vrot.slane %v288_v15, %v7701_v10  ;;  %v7715_v25 = vrot.slane %v289_v16, %v7701_v10  ;;  %v7718_v26 = vrot.slane %v372_v17, %v7701_v10 }
  0x18   : > { %12250 = vst [vmem:[#allocation2_spill] sm:$0xff] %v7704_v20  ;;  %12251 = vst [vmem:[#allocation3_spill] sm:$0xff] %v7707_v21  ;;  %v7721_v27 = vrot.slane %v373_v18, %v7701_v10  ;;  %v7724_v28 = vrot.slane %v304_v22, %v7701_v10  ;;  %v7727_v29 = vrot.slane %v305_v23, %v7701_v10 }
  0x19   : > { %12252 = vst [vmem:[#allocation4_spill] sm:$0xff] %v7712_v24  ;;  %12253 = vst [vmem:[#allocation5_spill] sm:$0xff] %v7715_v25 }
  0x1a   : > { %12254 = vst [vmem:[#allocation6_spill] sm:$0xff] %v7718_v26  ;;  %12255 = vst [vmem:[#allocation7_spill] sm:$0xff] %v7721_v27 }
  0x1b   : > { %12256 = vst [vmem:[#allocation8_spill] sm:$0xff] %v7724_v28  ;;  %12257 = vst [vmem:[#allocation9_spill] sm:$0xff] %v7727_v29  ;;  %519 = vrot.lane.b32.xlu1 %v285_v8, %s7629_s30  ;;  %517 = vrot.lane.b32.xlu0 %v284_v13, %s7629_s30 }
  0x1f   : > { %523 = vrot.lane.b32.xlu1 %v287_v14, %s7629_s30  ;;  %521 = vrot.lane.b32.xlu0 %v286_v19, %s7629_s30 }
  0x85   : > { %v514_v38 = vpop.permute.xlu1 %513  ;;  %v510_v39 = vpop.permute.xlu0 %509 }
  0x86   : > { %v536_v40 = vsel %vm533_vm0, 0.0, %v514_v38  ;;  %v534_v41 = vsel %vm533_vm0, 0.0, %v510_v39 }
  0x87   : > { %v545_v42 = vsel %vm542_vm1, %v536_v40, 0.0  ;;  %v543_v43 = vsel %vm542_vm1, %v534_v41, 0.0 }
  0x88   : > { %v563_v50 = vrot.slane %v545_v42, 7  ;;  %v560_v51 = vrot.slane %v543_v43, 7 }
  0x89   : > { %v516_v44 = vpop.permute.xlu1 %515  ;;  %v512_v45 = vpop.permute.xlu0 %511 }
  0x8a   : > { %v537_v46 = vsel %vm533_vm0, 0.0, %v516_v44  ;;  %v535_v47 = vsel %vm533_vm0, 0.0, %v512_v45  ;;  %v7806_v40 = vsel %vm559_vm2, 0.0, %v560_v51 }
  0x8b   : > { %v546_v48 = vsel %vm542_vm1, %v537_v46, 0.0  ;;  %v544_v49 = vsel %vm542_vm1, %v535_v47, 0.0  ;;  %v7824_v46 = vsel %vm559_vm2, 0.0, %v563_v50 }
  0x8c   : > { %v564_v52 = vrot.slane %v546_v48, 7  ;;  %v561_v53 = vrot.slane %v544_v49, 7 }
  0x8d   : > { %v520_v54 = vpop.permute.xlu1 %519  ;;  %v518_v55 = vpop.permute.xlu0 %517 }
  0x8e   : > { %v7758_v56 = vsel %vm559_vm2, %v563_v50, %v564_v52  ;;  %v7761_v57 = vsel %vm559_vm2, %v560_v51, %v561_v53  ;;  %v7768_v58 = vsel %vm559_vm2, %v561_v53, 0.0  ;;  %v539_v59 = vsel %vm533_vm0, 0.0, %v520_v54 }
  0x8f   : > { %810 = vrot.lane.b32.xlu1 %v7758_v56, %s7630_s8  ;;  %806 = vrot.lane.b32.xlu0 %v7761_v57, %s7630_s8  ;;  %v538_v60 = vsel %vm533_vm0, 0.0, %v518_v55  ;;  %v548_v61 = vsel %vm542_vm1, %v539_v59, 0.0  ;;  %v7777_v6 = vsel %vm559_vm2, %v564_v52, 0.0  ;;  %v1272_v7 = vrot.slane %v7768_v58, 1 }
  0x90   : > { %v547_v62 = vsel %vm542_vm1, %v538_v60, 0.0  ;;  %v567_v1 = vrot.slane %v548_v61, 7  ;;  %v1270_v14 = vrot.slane %v7761_v57, 1  ;;  %v1277_v18 = vrot.slane %v7777_v6, 1 }
  0x91   : > { %v524_v63 = vpop.permute.xlu1 %523  ;;  %v522_v0 = vpop.permute.xlu0 %521  ;;  %v566_v2 = vrot.slane %v547_v62, 7  ;;  %v1275_v22 = vrot.slane %v7758_v56, 1  ;;  %v1269_v50 = vrot.slane %v7806_v40, 1  ;;  %v1274_v59 = vrot.slane %v7824_v46, 1 }
  0x92   : > { %v541_v3 = vsel %vm533_vm0, 0.0, %v524_v63  ;;  %v540_v5 = vsel %vm533_vm0, 0.0, %v522_v0  ;;  %v7783_v11 = vsel %vm559_vm2, %v567_v1, 0.0  ;;  %v7811_v41 = vsel %vm1268_vm3, %v1270_v14, %v1272_v7 }
  0x93   : > { %v550_v8 = vsel %vm542_vm1, %v541_v3, 0.0  ;;  %v549_v9 = vsel %vm542_vm1, %v540_v5, 0.0  ;;  %v7786_v12 = vsel %vm559_vm2, %v566_v2, %v567_v1  ;;  %v1282_v15 = vrot.slane %v7783_v11, 1 }
  0x94   : > { %v570_v13 = vrot.slane %v550_v8, 7  ;;  %v569_v16 = vrot.slane %v549_v9, 7  ;;  %814 = vrot.lane.b32.xlu0 %v7786_v12, %s7630_s8  ;;  %v1280_v17 = vrot.slane %v7786_v12, 1  ;;  %v7799_v23 = vsel %vm559_vm2, 0.0, %v566_v2 }
  0x95   : > { %v7827_v47 = vsel %vm1268_vm3, %v1275_v22, %v1277_v18  ;;  %v1279_v49 = vrot.slane %v7799_v23, 1  ;;  %v7849_v55 = vsel %vm1268_vm3, %v1269_v50, %v1270_v14  ;;  %v7866_v1 = vsel %vm1268_vm3, %v1274_v59, %v1275_v22 }
  0x96   : > { %v7795_v19 = vsel %vm559_vm2, %v570_v13, 0.0  ;;  %v7803_v39 = vsel %vm559_vm2, %v569_v16, %v570_v13  ;;  %v7814_v42 = vsel %vm1268_vm3, %v1280_v17, %v1282_v15  ;;  %v7834_v51 = vsel %vm559_vm2, 0.0, %v569_v16 }
  0x97   : > { %v1287_v38 = vrot.slane %v7795_v19, 1  ;;  %818 = vrot.lane.b32.xlu1 %v7803_v39, %s7630_s8  ;;  %v1285_v43 = vrot.slane %v7803_v39, 1  ;;  %v1365_v44 = vcombine.low %v7811_v41, %v7814_v42  ;;  %v1366_v45 = vcombine.high %v7811_v41, %v7814_v42 }
  0x98   : > { %804 = vrot.lane.b32.xlu0 %v7806_v40, %s7630_s8  ;;  %v7844_v54 = vsel %vm1268_vm3, %v1279_v49, %v1280_v17  ;;  %v1284_v63 = vrot.slane %v7834_v51, 1  ;;  %v662_v15 = vcombine.low %v7761_v57, %v7786_v12  ;;  %v678_v18 = vcombine.low %v7758_v56, %v7803_v39 }
  0x99   : > { %v7830_v48 = vsel %vm1268_vm3, %v1285_v43, %v1287_v38  ;;  %v1297_v61 = vcombine.low %v7849_v55, %v7844_v54  ;;  %v1298_v62 = vcombine.high %v7849_v55, %v7844_v54  ;;  %v7863_v0 = vrot.slane %v1365_v44, %v7701_v10 }
  0x9a   : > { %v1381_v52 = vcombine.low %v7827_v47, %v7830_v48  ;;  %v1382_v53 = vcombine.high %v7827_v47, %v7830_v48  ;;  %v7869_v2 = vsel %vm1268_vm3, %v1284_v63, %v1285_v43  ;;  %v7891_v14 = vrot.slane %v1366_v45, %v7701_v10 }
  0x9b   : > { %808 = vrot.lane.b32.xlu1 %v7824_v46, %s7630_s8  ;;  %v1313_v3 = vcombine.low %v7866_v1, %v7869_v2  ;;  %v1314_v5 = vcombine.high %v7866_v1, %v7869_v2  ;;  %v7883_v9 = vrot.slane %v1297_v61, %v7701_v10  ;;  %v595_v38 = vcombine.high %v7806_v40, %v7799_v23 }
  0x9c   : > { %812 = vrot.lane.b32.xlu0 %v7799_v23, %s7630_s8  ;;  %v7853_v60 = vrot.slane %v1381_v52, %v7701_v10  ;;  %v7878_v7 = vrot.slane %v1382_v53, %v7701_v10  ;;  %v611_v43 = vcombine.high %v7824_v46, %v7834_v51  ;;  %v7911_v44 = vrot.slane %v1298_v62, %v7701_v10 }
  0x9d   : > { %v7886_v13 = vrot.slane %v1313_v3, %v7701_v10  ;;  %v7898_v16 = vrot.slane %v1314_v5, %v7701_v10  ;;  %v7914_v45 = vrot.slane %v662_v15, %v7701_v10  ;;  %v7917_v49 = vrot.slane %v678_v18, %v7701_v10 }
  0x9e   : > { %v1398_v8 = vcombine.high %v7863_v0, %v7853_v60  ;;  %v594_v52 = vcombine.low %v7806_v40, %v7799_v23  ;;  %v7924_v53 = vrot.slane %v595_v38, %v7701_v10  ;;  %v7927_v50 = vrot.slane %v611_v43, %v7701_v10 }
  0x9f   : > { %816 = vrot.lane.b32.xlu1 %v7834_v51, %s7630_s8  ;;  %v1330_v17 = vcombine.high %v7883_v9, %v7886_v13  ;;  %v610_v59 = vcombine.low %v7824_v46, %v7834_v51  ;;  %v663_v18 = vcombine.high %v7761_v57, %v7786_v12  ;;  %v679_v38 = vcombine.high %v7758_v56, %v7803_v39 }
  0xa0   : > { %1036 = vrot.lane.b32.xlu0 %v7761_v57, %s7631_s9  ;;  %v7936_v62 = vrot.slane %v594_v52, %v7701_v10  ;;  %v1967_v30 = vrot.slane %v7768_v58, 2  ;;  %v1965_v34 = vrot.slane %v7761_v57, 2  ;;  %v1970_v35 = vrot.slane %v7758_v56, 2 }
  0xa1   : > { %v7945_v15 = vrot.slane %v610_v59, %v7701_v10  ;;  %v7958_v33 = vrot.slane %v663_v18, %v7701_v10  ;;  %v7961_v59 = vrot.slane %v679_v38, %v7701_v10  ;;  %v1972_v38 = vrot.slane %v7777_v6, 2 }
  0xa2   : > { %v1977_v36 = vrot.slane %v7783_v11, 2  ;;  %v7993_v32 = vsel %vm1963_vm4, %v1965_v34, %v1967_v30  ;;  %v1975_v58 = vrot.slane %v7786_v12, 2  ;;  %v1982_v57 = vrot.slane %v7795_v19, 2 }
  0xa3   : > { %1040 = vrot.lane.b32.xlu1 %v7758_v56, %s7631_s9  ;;  %v8002_v43 = vsel %vm1963_vm4, %v1970_v35, %v1972_v38  ;;  %v1980_v56 = vrot.slane %v7803_v39, 2  ;;  %v1969_v19 = vrot.slane %v7824_v46, 2  ;;  %v1979_v38 = vrot.slane %v7834_v51, 2 }
  0xa4   : > { %1044 = vrot.lane.b32.xlu0 %v7786_v12, %s7631_s9  ;;  %v8006_v6 = vsel %vm1963_vm4, %v1975_v58, %v1977_v36  ;;  %v1964_v36 = vrot.slane %v7806_v40, 2  ;;  %v1974_v12 = vrot.slane %v7799_v23, 2 }
  0xa5   : > { %v8013_v30 = vsel %vm1963_vm4, %v1980_v56, %v1982_v57 }
  0xa6   : > { %v8025_v11 = vsel %vm1963_vm4, %v1964_v36, %v1965_v34  ;;  %v8045_v34 = vsel %vm1963_vm4, %v1979_v38, %v1980_v56 }
  0xa7   : > { %1048 = vrot.lane.b32.xlu1 %v7803_v39, %s7631_s9  ;;  %v8034_v39 = vsel %vm1963_vm4, %v1969_v19, %v1970_v35 }
  0xa8   : > { %1034 = vrot.lane.b32.xlu0 %v7806_v40, %s7631_s9  ;;  %v8038_v40 = vsel %vm1963_vm4, %v1974_v12, %v1975_v58 }
  0xab   : > { %1038 = vrot.lane.b32.xlu1 %v7824_v46, %s7631_s9 }
  0xac   : > { %1042 = vrot.lane.b32.xlu0 %v7799_v23, %s7631_s9 }
  0xaf   : > { %1046 = vrot.lane.b32.xlu1 %v7834_v51, %s7631_s9 }
  0xb0   : > { %1735 = vrot.lane.b32.xlu0 %v7811_v41, %s7631_s9 }
  0xb3   : > { %1739 = vrot.lane.b32.xlu1 %v7827_v47, %s7631_s9 }
  0xb4   : > { %1743 = vrot.lane.b32.xlu0 %v7814_v42, %s7631_s9 }
  0xb7   : > { %1747 = vrot.lane.b32.xlu1 %v7830_v48, %s7631_s9 }
  0xb8   : > { %2200 = vrot.lane.b32.xlu0 %v7993_v32, %s7630_s8 }
  0xbb   : > { %2204 = vrot.lane.b32.xlu1 %v8002_v43, %s7630_s8 }
  0xbc   : > { %2208 = vrot.lane.b32.xlu0 %v8006_v6, %s7630_s8 }
  0xbf   : > { %2212 = vrot.lane.b32.xlu1 %v8013_v30, %s7630_s8 }
  0xc0   : > { %1733 = vrot.lane.b32.xlu0 %v7849_v55, %s7631_s9 }
  0xc3   : > { %1737 = vrot.lane.b32.xlu1 %v7866_v1, %s7631_s9 }
  0xc4   : > { %1741 = vrot.lane.b32.xlu0 %v7844_v54, %s7631_s9 }
  0xc7   : > { %1745 = vrot.lane.b32.xlu1 %v7869_v2, %s7631_s9 }
  0xc8   : > { %2198 = vrot.lane.b32.xlu0 %v8025_v11, %s7630_s8 }
  0xcb   : > { %2202 = vrot.lane.b32.xlu1 %v8034_v39, %s7630_s8 }
  0xcc   : > { %2206 = vrot.lane.b32.xlu0 %v8038_v40, %s7630_s8 }
  0xcf   : > { %2210 = vrot.lane.b32.xlu1 %v8045_v34, %s7630_s8 }
  0xd0   : > { %1505 = vrot.lane.b32.xlu0 %v7811_v41, %s7630_s8 }
  0xd3   : > { %1509 = vrot.lane.b32.xlu1 %v7827_v47, %s7630_s8 }
  0xd4   : > { %1513 = vrot.lane.b32.xlu0 %v7814_v42, %s7630_s8  ;;  %v7632_v42 = vmov 1934713408  }
  0xd5   : > { %v323_v46 = vunpack.c.l.s4 %v7632_v42 }
  0xd7   : > { %1517 = vrot.lane.b32.xlu1 %v7830_v48, %s7630_s8 }
  0xd8   : > { %1503 = vrot.lane.b32.xlu0 %v7849_v55, %s7630_s8  ;;  %v324_v55 = vunpack.c.0.s8 %v323_v46 }
  0xda   : > { %v8090_v36 = vsub.s32 %v324_v55, %v7693_v4 }
  0xdb   : > { %1507 = vrot.lane.b32.xlu1 %v7866_v1, %s7630_s8 }
  0xdc   : > { %1511 = vrot.lane.b32.xlu0 %v7844_v54, %s7630_s8  ;;  %v8099_v38 = vrot.slane %v1398_v8, %v8090_v36 }
  0xdf   : > { %1515 = vrot.lane.b32.xlu1 %v7869_v2, %s7630_s8 }
  0xe0   : > { %2428 = vrot.lane.b32.xlu0 %v8025_v11, %s7631_s9 }
  0xe3   : > { %2430 = vrot.lane.b32.xlu1 %v7993_v32, %s7631_s9 }
  0xe4   : > { %2432 = vrot.lane.b32.xlu0 %v8034_v39, %s7631_s9 }
  0xe7   : > { %2434 = vrot.lane.b32.xlu1 %v8002_v43, %s7631_s9 }
  0xe8   : > { %2436 = vrot.lane.b32.xlu0 %v8038_v40, %s7631_s9 }
  0xeb   : > { %2438 = vrot.lane.b32.xlu1 %v8006_v6, %s7631_s9 }
  0xec   : > { %2440 = vrot.lane.b32.xlu0 %v8045_v34, %s7631_s9 }
  0xef   : > { %2442 = vrot.lane.b32.xlu1 %v8013_v30, %s7631_s9 }
 0x101   : > { %v807_v35 = vpop.permute.xlu0 %806  ;;  %v811_v23 = vpop.permute.xlu1 %810 }
 0x106   : > { %v815_v41 = vpop.permute.xlu0 %814 }
 0x107   : > { %v896_v47 = vcombine.low %v807_v35, %v815_v41  ;;  %v897_v31 = vcombine.high %v807_v35, %v815_v41 }
 0x109   : > { %v819_v48 = vpop.permute.xlu1 %818  ;;  %v8082_v1 = vrot.slane %v896_v47, %v7701_v10  ;;  %v8127_v35 = vrot.slane %v897_v31, %v7701_v10 }
 0x10a   : > { %v912_v51 = vcombine.low %v811_v23, %v819_v48  ;;  %v805_v54 = vpop.permute.xlu0 %804  ;;  %v913_v55 = vcombine.high %v811_v23, %v819_v48 }
 0x10c   : > { %v8085_v2 = vrot.slane %v912_v51, %v7701_v10 }
 0x10d   : > { %v809_v58 = vpop.permute.xlu1 %808 }
 0x10e   : > { %v929_v57 = vcombine.high %v8082_v1, %v8085_v2  ;;  %v813_v56 = vpop.permute.xlu0 %812 }
 0x10f   : > { %v828_v12 = vcombine.low %v805_v54, %v813_v56  ;;  %v829_v27 = vcombine.high %v805_v54, %v813_v56 }
 0x110   : > { %v8093_v19 = vrot.slane %v929_v57, %v8090_v36 }
 0x111   : > { %v817_v42 = vpop.permute.xlu1 %816  ;;  %v8104_v37 = vrot.slane %v828_v12, %v7701_v10  ;;  %v8119_v12 = vrot.slane %v1330_v17, %v8090_v36 }
 0x112   : > { %v844_v46 = vcombine.low %v809_v58, %v817_v42  ;;  %v1037_v47 = vpop.permute.xlu0 %1036  ;;  %v6987_v51 = vpack.i.bf16 %v8099_v38, %v8093_v19 }
 0x114   : > { %v8107_v4 = vrot.slane %v844_v46, %v7701_v10  ;;  %6988 = vrot.lane.b32.xlu0 %v6987_v51, %s7633_s10  ;;  %v8122_v46 = vrot.slane %v913_v55, %v7701_v10  ;;  %v845_v55 = vcombine.high %v809_v58, %v817_v42 }
 0x115   : > { %v1041_v57 = vpop.permute.xlu1 %1040 }
 0x116   : > { %v861_v8 = vcombine.high %v8104_v37, %v8107_v4  ;;  %v1045_v18 = vpop.permute.xlu0 %1044  ;;  %v944_v17 = vcombine.low %v8127_v35, %v8122_v46  ;;  %v859_v29 = vrot.slane %v845_v55, %v7701_v10 }
 0x117   : > { %v1126_v3 = vcombine.low %v1037_v47, %v1045_v18 }
 0x118   : > { %v8113_v63 = vrot.slane %v861_v8, %v8090_v36  ;;  %v8151_v42 = vrot.slane %v944_v17, %v8090_v36 }
 0x119   : > { %v1049_v23 = vpop.permute.xlu1 %1048  ;;  %v8130_v41 = vrot.slane %v1126_v3, %v7701_v10  ;;  %v12258_v3 = vcombine.high %v7914_v45, %v7917_v49 }
 0x11a   : > { %v1142_v48 = vcombine.low %v1041_v57, %v1049_v23  ;;  %v1035_v51 = vpop.permute.xlu0 %1034  ;;  %v6992_v52 = vpack.i.bf16 %v8119_v12, %v8113_v63  ;;  %v1143_v25 = vcombine.high %v1041_v57, %v1049_v23 }
 0x11c   : > { %v8133_v8 = vrot.slane %v1142_v48, %v7701_v10  ;;  %6993 = vrot.lane.b32.xlu0 %v6992_v52, %s7633_s10  ;;  %v8144_v48 = vrot.slane %v12258_v3, %v8090_v36  ;;  %v1127_v3 = vcombine.high %v1037_v47, %v1045_v18 }
 0x11d   : > { %v1039_v5 = vpop.permute.xlu1 %1038 }
 0x11e   : > { %v1159_v22 = vcombine.high %v8130_v41, %v8133_v8  ;;  %v1043_v61 = vpop.permute.xlu0 %1042 }
 0x11f   : > { %v1058_v31 = vcombine.low %v1035_v51, %v1043_v61  ;;  %v1059_v21 = vcombine.high %v1035_v51, %v1043_v61  ;;  %v843_v51 = vrot.slane %v829_v27, %v7701_v10 }
 0x120   : > { %v8147_v52 = vrot.slane %v1159_v22, %v8090_v36  ;;  %v12260_v22 = vcombine.low %v7891_v14, %v7878_v7 }
 0x121   : > { %v1047_v58 = vpop.permute.xlu1 %1046  ;;  %v8165_v17 = vrot.slane %v1058_v31, %v7701_v10  ;;  %v1073_v57 = vrot.slane %v1059_v21, %v7701_v10  ;;  %v876_v27 = vcombine.low %v843_v51, %v859_v29  ;;  %v877_v18 = vcombine.high %v843_v51, %v859_v29 }
 0x122   : > { %v1074_v26 = vcombine.low %v1039_v5, %v1047_v58  ;;  %v1075_v54 = vcombine.high %v1039_v5, %v1047_v58  ;;  %v8153_v56 = vpop.permute.xlu0 %1735  ;;  %v6997_v61 = vpack.i.bf16 %v8147_v52, %v8144_v48  ;;  %v8162_v55 = vrot.slane %v12260_v22, %v8090_v36 }
 0x123   : > { %12259 = vst [vmem:[#allocation10_spill] sm:$0xff] %v8153_v56  ;;  %v1157_v58 = vrot.slane %v1143_v25, %v7701_v10  ;;  %v1141_v29 = vrot.slane %v1127_v3, %v7701_v10  ;;  %v8208_v3 = vrot.slane %v876_v27, %v8090_v36  ;;  %v12268_v27 = vcombine.low %v7911_v44, %v7898_v16 }
 0x124   : > { %v8169_v5 = vrot.slane %v1074_v26, %v7701_v10  ;;  %v1089_v23 = vrot.slane %v1075_v54, %v7701_v10  ;;  %6998 = vrot.lane.b32.xlu1 %v6997_v61, %s7633_s10  ;;  %v7002_v21 = vpack.i.bf16 %v8162_v55, %v8151_v42  ;;  %v12263_v26 = vcombine.low %v7924_v53, %v7927_v50 }
 0x125   : > { %v8173_v47 = vpop.permute.xlu1 %1739  ;;  %v12265_v61 = vcombine.high %v7936_v62, %v7945_v15 }
 0x126   : > { %12261 = vst [vmem:[#allocation11_spill] sm:$0xff] %v8173_v47  ;;  %v1091_v22 = vcombine.high %v8165_v17, %v8169_v5  ;;  %v1106_v31 = vcombine.low %v1073_v57, %v1089_v23  ;;  %v8178_v20 = vpop.permute.xlu0 %1743  ;;  %v8186_v54 = vrot.slane %v12263_v26, %v8090_v36  ;;  %v8205_v26 = vrot.slane %v877_v18, %v8090_v36 }
 0x127   : > { %12262 = vst [vmem:[#allocation12_spill] sm:$0xff] %v8178_v20  ;;  %v8197_v51 = vrot.slane %v12265_v61, %v8090_v36  ;;  %v8228_v18 = vrot.slane %v12268_v27, %v8090_v36  ;;  %v1090_v27 = vcombine.low %v8165_v17, %v8169_v5  ;;  %v12274_v17 = vcombine.high %v7924_v53, %v7927_v50 }
 0x128   : > { %7003 = vrot.lane.b32.xlu1 %v7002_v21, %s7634_s11  ;;  %v8191_v25 = vrot.slane %v1106_v31, %v8090_v36  ;;  %v8200_v28 = vrot.slane %v1091_v22, %v8090_v36  ;;  %v1174_v21 = vcombine.low %v1141_v29, %v1157_v58  ;;  %v1175_v31 = vcombine.high %v1141_v29, %v1157_v58 }
 0x129   : > { %v8202_v24 = vpop.permute.xlu1 %1747  ;;  %v12267_v22 = vcombine.high %v7911_v44, %v7898_v16  ;;  %v928_v58 = vcombine.low %v8082_v1, %v8085_v2  ;;  %v945_v29 = vcombine.high %v8127_v35, %v8122_v46  ;;  %v7012_v16 = vpack.i.bf16 %v8228_v18, %v8208_v3 }
 0x12a   : > { %12264 = vst [vmem:[#allocation13_spill] sm:$0xff] %v8191_v25  ;;  %v8210_v56 = vpop.permute.xlu0 %2200  ;;  %v7027_v20 = vpack.i.bf16 %v8191_v25, %v8186_v54  ;;  %v7007_v61 = vpack.i.bf16 %v8200_v28, %v8197_v51  ;;  %v8245_v44 = vrot.slane %v1175_v31, %v8090_v36  ;;  %v8248_v1 = vrot.slane %v1174_v21, %v8090_v36 }
 0x12b   : > { %12266 = vst [vmem:[#allocation14_spill] sm:$0xff] %v8210_v56  ;;  %v8220_v47 = vrot.slane %v12267_v22, %v8090_v36  ;;  %v860_v22 = vcombine.low %v8104_v37, %v8107_v4  ;;  %v12269_v37 = vcombine.high %v7958_v33, %v7961_v59  ;;  %v12270_v4 = vcombine.low %v7958_v33, %v7961_v59 }
 0x12c   : > { %7028 = vrot.lane.b32.xlu1 %v7027_v20, %s7634_s11  ;;  %7008 = vrot.lane.b32.xlu0 %v7007_v61, %s7633_s10  ;;  %v1107_v61 = vcombine.high %v1073_v57, %v1089_v23  ;;  %v1158_v35 = vcombine.low %v8130_v41, %v8133_v8  ;;  %v8269_v23 = vrot.slane %v945_v29, %v8090_v36  ;;  %v12083_v53 = vmov 0.0  }
 0x12d   : > { %v8236_v56 = vpop.permute.xlu1 %2204  ;;  %v7032_v20 = vpack.i.bf16 %v8220_v47, %v8205_v26  ;;  %v8256_v2 = vrot.slane %v12269_v37, %v8090_v36  ;;  %v8262_v46 = vrot.slane %v12270_v4, %v8090_v36  ;;  %v8272_v21 = vrot.slane %v860_v22, %v8090_v36 }
 0x12e   : > { %v8240_v25 = vpop.permute.xlu0 %2208  ;;  %v8275_v31 = vrot.slane %v928_v58, %v8090_v36  ;;  %v8286_v8 = vrot.slane %v1107_v61, %v8090_v36  ;;  %v12273_v29 = vcombine.high %v7891_v14, %v7878_v7  ;;  %v8300_v5 = vrot.slane %v12274_v17, %v8090_v36 }
 0x12f   : > { %12271 = vst [vmem:[#allocation15_spill] sm:$0xff] %v8272_v21  ;;  %v7037_v59 = vpack.i.bf16 %v8245_v44, %v8256_v2  ;;  %v7017_v41 = vpack.i.bf16 %v8248_v1, %v8262_v46  ;;  %v12275_v22 = vcombine.low %v7883_v9, %v7886_v13  ;;  %v12277_v7 = vcombine.low %v7863_v0, %v7853_v60 }
 0x130   : > { %7033 = vrot.lane.b32.xlu1 %v7032_v20, %s7635_s12  ;;  %7013 = vrot.lane.b32.xlu0 %v7012_v16, %s7634_s11  ;;  %12272 = vst [vmem:[#allocation16_spill] sm:$0xff] %v8275_v31  ;;  %v8292_v58 = vrot.slane %v12273_v29, %v8090_v36  ;;  %v960_v50 = vcombine.high %v8275_v31, %v12083_v53 }
 0x131   : > { %v8266_v57 = vpop.permute.xlu1 %2212  ;;  %v8306_v20 = vrot.slane %v12275_v22, %v8090_v36  ;;  %v8312_v14 = vrot.slane %v12277_v7, %v8090_v36  ;;  %v7042_v9 = vpack.i.bf16 %v8286_v8, %v8300_v5  ;;  %v892_v13 = vcombine.high %v8272_v21, %v12083_v53 }
 0x132   : > { %v8279_v33 = vpop.permute.xlu0 %1733  ;;  %v7022_v16 = vpack.i.bf16 %v8292_v58, %v8269_v23  ;;  %v8327_v60 = vrot.slane %v1158_v35, %v8090_v36  ;;  %v8330_v0 = vrot.slane %v1090_v27, %v8090_v36  ;;  %v12281_v4 = vcombine.low %v7914_v45, %v7917_v49 }
 0x133   : > { %12276 = vst [vmem:[#allocation17_spill] sm:$0xff] %v8306_v20  ;;  %12278 = vst [vmem:[#allocation18_spill] sm:$0xff] %v8312_v14  ;;  %v1429_v35 = vcombine.high %v8312_v14, %v12083_v53  ;;  %v12283_v27 = vcombine.low %v7936_v62, %v7945_v15  ;;  %v2061_v62 = vcombine.high %v7993_v32, %v8006_v6 }
 0x134   : > { %7038 = vrot.lane.b32.xlu1 %v7037_v59, %s7635_s12  ;;  %7018 = vrot.lane.b32.xlu0 %v7017_v41, %s7634_s11  ;;  %12279 = vst [vmem:[#allocation19_spill] sm:$0xff] %v8327_v60  ;;  %12280 = vst [vmem:[#allocation20_spill] sm:$0xff] %v8330_v0  ;;  %v8336_v59 = vrot.slane %v12281_v4, %v8090_v36  ;;  %v1361_v41 = vcombine.high %v8306_v20, %v12083_v53 }
 0x135   : > { %v8314_v61 = vpop.permute.xlu1 %1737  ;;  %v8348_v29 = vrot.slane %v12283_v27, %v8090_v36  ;;  %v7047_v22 = vpack.i.bf16 %v1429_v35, %v960_v50  ;;  %v1190_v7 = vcombine.high %v8327_v60, %v12083_v53  ;;  %v2076_v15 = vcombine.low %v8002_v43, %v8013_v30 }
 0x136   : > { %v8320_v37 = vpop.permute.xlu0 %1741  ;;  %12282 = vst [vmem:[#allocation21_spill] sm:$0xff] %v8336_v59  ;;  %v7052_v49 = vpack.i.bf16 %v1361_v41, %v892_v13  ;;  %v2077_v4 = vcombine.high %v8002_v43, %v8013_v30  ;;  %v726_v50 = vcombine.high %v8336_v59, %v12083_v53  ;;  %v2008_v43 = vcombine.low %v8034_v39, %v8045_v34 }
 0x137   : > { %12284 = vst [vmem:[#allocation22_spill] sm:$0xff] %v8348_v29  ;;  %v658_v13 = vcombine.high %v8348_v29, %v12083_v53  ;;  %v2009_v30 = vcombine.high %v8034_v39, %v8045_v34  ;;  %v893_v29 = vcombine.high %v8113_v63, %v12083_v53  ;;  %v8395_v39 = vrot.slane %v2076_v15, %v7701_v10 }
 0x138   : > { %7043 = vrot.lane.b32.xlu1 %v7042_v9, %s7635_s12  ;;  %7023 = vrot.lane.b32.xlu0 %v7022_v16, %s7635_s12  ;;  %v1122_v16 = vcombine.high %v8330_v0, %v12083_v53  ;;  %v2060_v9 = vcombine.low %v7993_v32, %v8006_v6  ;;  %v1992_v32 = vcombine.low %v8025_v11, %v8038_v40 }
 0x139   : > { %v8350_v17 = vpop.permute.xlu1 %1745  ;;  %v1993_v6 = vcombine.high %v8025_v11, %v8038_v40  ;;  %v7057_v27 = vpack.i.bf16 %v1190_v7, %v726_v50  ;;  %v8392_v40 = vrot.slane %v2061_v62, %v7701_v10  ;;  %v8398_v34 = vrot.slane %v2077_v4, %v7701_v10 }
 0x13a   : > { %v8352_v45 = vpop.permute.xlu0 %2198  ;;  %v8389_v11 = vrot.slane %v2060_v9, %v7701_v10  ;;  %v1362_v63 = vcombine.high %v8119_v12, %v12083_v53  ;;  %v8407_v7 = vrot.slane %v1992_v32, %v7701_v10  ;;  %v8413_v9 = vrot.slane %v2008_v43, %v7701_v10 }
 0x13b   : > { %v8416_v62 = vrot.slane %v2009_v30, %v7701_v10  ;;  %v1191_v12 = vcombine.high %v8147_v52, %v12083_v53  ;;  %v727_v32 = vcombine.high %v8144_v48, %v12083_v53  ;;  %v1431_v43 = vcombine.high %v8162_v55, %v12083_v53 }
 0x13c   : > { %7053 = vrot.lane.b32.xlu1 %v7052_v49, %s7637_s13  ;;  %7048 = vrot.lane.b32.xlu0 %v7047_v22, %s7637_s13  ;;  %v7067_v49 = vpack.i.bf16 %v1122_v16, %v658_v13  ;;  %v961_v22 = vcombine.high %v8093_v19, %v12083_v53  ;;  %v1430_v19 = vcombine.high %v8099_v38, %v12083_v53 }
 0x13d   : > { %v8380_v41 = vpop.permute.xlu1 %2202  ;;  %v8410_v16 = vrot.slane %v1993_v6, %v7701_v10  ;;  %v7072_v50 = vpack.i.bf16 %v1362_v63, %v893_v29  ;;  %v1192_v13 = vcombine.high %v8248_v1, %v12083_v53  ;;  %v728_v6 = vcombine.high %v8262_v46, %v12083_v53 }
 0x13e   : > { %v8382_v35 = vpop.permute.xlu0 %2206  ;;  %v7062_v38 = vpack.i.bf16 %v1430_v19, %v961_v22  ;;  %v1432_v30 = vcombine.high %v8292_v58, %v12083_v53  ;;  %v659_v52 = vcombine.high %v8197_v51, %v12083_v53  ;;  %v660_v48 = vcombine.high %v8186_v54, %v12083_v53  ;;  %v12285_v51 = vld [vmem:[#allocation11_spill] sm:$0xff] }
 0x13f   : > { %v8442_v1 = vcombine.high %v8228_v18, %v12083_v53  ;;  %v962_v55 = vcombine.high %v8151_v42, %v12083_v53  ;;  %v8450_v58 = vcombine.high %v8220_v47, %v12083_v53  ;;  %v8454_v29 = vcombine.high %v8300_v5, %v12083_v53 }
 0x140   : > { %7058 = vrot.lane.b32.xlu1 %v7057_v27, %s7637_s13  ;;  %7068 = vrot.lane.b32.xlu0 %v7067_v49, %s7637_s13  ;;  %v2025_v54 = vcombine.high %v8407_v7, %v8413_v9  ;;  %v1841_v18 = vcombine.low %v12285_v51, %v8202_v24  ;;  %v7077_v49 = vpack.i.bf16 %v1191_v12, %v727_v32 }
 0x141   : > { %v8418_v15 = vpop.permute.xlu1 %2210  ;;  %v7097_v22 = vpack.i.bf16 %v1192_v13, %v728_v6  ;;  %v963_v42 = vcombine.high %v8269_v23, %v12083_v53  ;;  %v8466_v47 = vcombine.high %v8208_v3, %v12083_v53  ;;  %v8470_v5 = vcombine.high %v8205_v26, %v12083_v53  ;;  %v12288_v13 = vld [vmem:[#allocation13_spill] sm:$0xff] }
 0x142   : > { %v8420_v4 = vpop.permute.xlu0 %1505  ;;  %v8474_v19 = vcombine.high %v8256_v2, %v12083_v53  ;;  %v2306_v23 = vcombine.low %v8236_v56, %v8266_v57  ;;  %v8486_v26 = vcombine.high %v8245_v44, %v12083_v53  ;;  %v1123_v2 = vcombine.high %v8200_v28, %v12083_v53  ;;  %v12289_v44 = vld [vmem:[#allocation14_spill] sm:$0xff] }
 0x143   : > { %v1124_v32 = vcombine.high %v12288_v13, %v12083_v53  ;;  %v8495_v6 = vrot.slane %v2025_v54, %v8090_v36  ;;  %v2290_v63 = vcombine.low %v12289_v44, %v8240_v25  ;;  %v7082_v59 = vpack.i.bf16 %v1431_v43, %v962_v55 }
 0x144   : > { %7063 = vrot.lane.b32.xlu1 %v7062_v38, %s7638_s14  ;;  %7073 = vrot.lane.b32.xlu0 %v7072_v50, %s7638_s14  ;;  %v12286_v38 = vld [vmem:[#allocation12_spill] sm:$0xff]  ;;  %v12287_v50 = vld [vmem:[#allocation10_spill] sm:$0xff]  ;;  %v7102_v60 = vpack.i.bf16 %v1432_v30, %v963_v42  ;;  %v7092_v54 = vpack.i.bf16 %v8442_v1, %v8466_v47  ;;  %v7112_v13 = vpack.i.bf16 %v8450_v58, %v8470_v5 }
 0x145   : > { %v8444_v46 = vpop.permute.xlu1 %1509  ;;  %v1825_v12 = vcombine.low %v12287_v50, %v12286_v38  ;;  %v8518_v21 = vrot.slane %v2306_v23, %v7701_v10  ;;  %v7117_v43 = vpack.i.bf16 %v8486_v26, %v8474_v19  ;;  %v1842_v30 = vcombine.high %v12285_v51, %v8202_v24 }
 0x146   : > { %v8460_v27 = vpop.permute.xlu0 %1513  ;;  %v7087_v55 = vpack.i.bf16 %v1123_v2, %v659_v52  ;;  %v7107_v58 = vpack.i.bf16 %v1124_v32, %v660_v48  ;;  %v2239_v47 = vcombine.high %v8380_v41, %v8418_v15  ;;  %v1774_v19 = vcombine.high %v8314_v61, %v8350_v17 }
 0x147   : > { %v2222_v52 = vcombine.low %v8352_v45, %v8382_v35  ;;  %v2223_v48 = vcombine.high %v8352_v45, %v8382_v35  ;;  %v2040_v28 = vcombine.low %v8410_v16, %v8416_v62  ;;  %v12292_v51 = vcombine.high %v12287_v50, %v12286_v38 }
 0x148   : > { %7078 = vrot.lane.b32.xlu1 %v7077_v49, %s7638_s14  ;;  %7098 = vrot.lane.b32.xlu0 %v7097_v22, %s7639_s15  ;;  %v8500_v22 = vrot.slane %v1841_v18, %v7701_v10  ;;  %v1125_v18 = vcombine.high %v8286_v8, %v12083_v53  ;;  %v8515_v49 = vrot.slane %v1825_v12, %v7701_v10 }
 0x149   : > { %v8488_v3 = vpop.permute.xlu1 %1517  ;;  %v2238_v8 = vcombine.low %v8380_v41, %v8418_v15  ;;  %v2307_v12 = vcombine.high %v8236_v56, %v8266_v57  ;;  %v8569_v15 = vrot.slane %v2239_v47, %v7701_v10  ;;  %v8583_v32 = vrot.slane %v2223_v48, %v7701_v10 }
 0x14a   : > { %v8504_v0 = vpop.permute.xlu0 %1503  ;;  %v1858_v42 = vcombine.high %v8515_v49, %v8500_v22  ;;  %v1611_v56 = vcombine.low %v8444_v46, %v8488_v3  ;;  %v2291_v48 = vcombine.high %v12289_v44, %v8240_v25  ;;  %v1856_v53 = vrot.slane %v1842_v30, %v7701_v10 }
 0x14b   : > { %v8561_v45 = vrot.slane %v2238_v8, %v7701_v10  ;;  %v1596_v8 = vcombine.high %v8420_v4, %v8460_v27  ;;  %v2321_v44 = vrot.slane %v2307_v12, %v7701_v10  ;;  %v1840_v30 = vrot.slane %v12292_v51, %v7701_v10 }
 0x14c   : > { %7083 = vrot.lane.b32.xlu1 %v7082_v59, %s7639_s15  ;;  %7103 = vrot.lane.b32.xlu0 %v7102_v60, %s7640_s16  ;;  %v8533_v59 = vrot.slane %v2290_v63, %v7701_v10  ;;  %v1773_v60 = vcombine.low %v8314_v61, %v8350_v17  ;;  %v7122_v63 = vpack.i.bf16 %v1125_v18, %v8454_v29 }
 0x14d   : > { %v8528_v1 = vpop.permute.xlu1 %1507  ;;  %v1757_v61 = vcombine.low %v8279_v33, %v8320_v37  ;;  %v1758_v17 = vcombine.high %v8279_v33, %v8320_v37  ;;  %v1612_v29 = vcombine.high %v8444_v46, %v8488_v3  ;;  %v8577_v33 = vrot.slane %v1774_v19, %v7701_v10 }
 0x14e   : > { %v8539_v5 = vpop.permute.xlu0 %1511  ;;  %v2323_v23 = vcombine.high %v8533_v59, %v8518_v21  ;;  %v8566_v35 = vrot.slane %v1773_v60, %v7701_v10  ;;  %v8580_v37 = vrot.slane %v2222_v52, %v7701_v10  ;;  %v1595_v18 = vcombine.low %v8420_v4, %v8460_v27 }
 0x14f   : > { %v1527_v41 = vcombine.low %v8504_v0, %v8539_v5  ;;  %v8603_v60 = vrot.slane %v1611_v56, %v7701_v10  ;;  %v8611_v47 = vrot.slane %v1758_v17, %v7701_v10  ;;  %v8635_v56 = vrot.slane %v1596_v8, %v7701_v10 }
 0x150   : > { %7088 = vrot.lane.b32.xlu1 %v7087_v55, %s7638_s14  ;;  %7108 = vrot.lane.b32.xlu0 %v7107_v58, %s7639_s15  ;;  %v8598_v55 = vrot.slane %v1757_v61, %v7701_v10  ;;  %v2255_v58 = vcombine.high %v8580_v37, %v8561_v45  ;;  %v8608_v27 = vrot.slane %v2323_v23, %v8090_v36 }
 0x151   : > { %v1516_v57 = vpop.permute.xlu1 %1515  ;;  %v8590_v46 = vrot.slane %v1527_v41, %v7701_v10  ;;  %v8627_v41 = vrot.slane %v1595_v18, %v7701_v10  ;;  %v8630_v61 = vrot.slane %v1858_v42, %v8090_v36  ;;  %v1805_v17 = vcombine.low %v8611_v47, %v8577_v33 }
 0x152   : > { %v1543_v26 = vcombine.low %v8528_v1, %v1516_v57  ;;  %v8574_v2 = vpop.permute.xlu0 %2428  ;;  %v1790_v23 = vcombine.high %v8598_v55, %v8566_v35  ;;  %v8650_v18 = vrot.slane %v2255_v58, %v8090_v36  ;;  %v2305_v58 = vrot.slane %v2291_v48, %v7701_v10 }
 0x153   : > { %v8679_v24 = vrot.slane %v1805_v17, %v8090_v36  ;;  %v1873_v50 = vcombine.low %v1840_v30, %v1856_v53  ;;  %v8746_v14 = vrot.slane %v2040_v28, %v8090_v36 }
 0x154   : > { %v8593_v3 = vrot.slane %v1543_v26, %v7701_v10  ;;  %7093 = vrot.lane.b32.xlu1 %v7092_v54, %s7639_s15  ;;  %7113 = vrot.lane.b32.xlu0 %v7112_v13, %s7640_s16  ;;  %v2270_v54 = vcombine.low %v8583_v32, %v8569_v15  ;;  %v8616_v13 = vrot.slane %v1612_v29, %v7701_v10 }
 0x155   : > { %v8605_v4 = vpop.permute.xlu1 %2430  ;;  %v1628_v29 = vcombine.high %v8627_v41, %v8603_v60  ;;  %v7127_v26 = vpack.i.bf16 %v8608_v27, %v8630_v61  ;;  %12291 = vst [vmem:[#allocation12_spill] sm:$0xff] %v8679_v24  ;;  %v2338_v48 = vcombine.low %v2305_v58, %v2321_v44  ;;  %v2339_v20 = vcombine.high %v2305_v58, %v2321_v44 }
 0x156   : > { %v1560_v19 = vcombine.high %v8590_v46, %v8593_v3  ;;  %v8620_v52 = vpop.permute.xlu0 %2432  ;;  %v1874_v44 = vcombine.high %v1840_v30, %v1856_v53  ;;  %v1644_v30 = vcombine.high %v8635_v56, %v8616_v13 }
 0x158   : > { %7123 = vrot.lane.b32.xlu1 %v7122_v63, %s7640_s16  ;;  %7118 = vrot.lane.b32.xlu0 %v7117_v43, %s7640_s16  ;;  %v8640_v25 = vrot.slane %v1560_v19, %v8090_v36  ;;  %v1643_v63 = vcombine.low %v8635_v56, %v8616_v13  ;;  %v1544_v43 = vcombine.high %v8528_v1, %v1516_v57 }
 0x159   : > { %v8645_v42 = vpop.permute.xlu1 %2434  ;;  %v8660_v19 = vrot.slane %v2270_v54, %v8090_v36  ;;  %v2109_v1 = vcombine.high %v8392_v40, %v8398_v34  ;;  %v1528_v57 = vcombine.high %v8504_v0, %v8539_v5  ;;  %v8676_v54 = vrot.slane %v1790_v23, %v8090_v36 }
 0x15a   : > { %v8655_v8 = vpop.permute.xlu0 %2436  ;;  %v7147_v12 = vpack.i.bf16 %v8495_v6, %v8640_v25  ;;  %v8688_v0 = vrot.slane %v1628_v29, %v8090_v36  ;;  %v8691_v5 = vrot.slane %v1544_v43, %v7701_v10  ;;  %v8698_v38 = vrot.slane %v1643_v63, %v8090_v36 }
 0x15b   : > { %12290 = vst [vmem:[#allocation11_spill] sm:$0xff] %v8660_v19  ;;  %v7132_v17 = vpack.i.bf16 %v8650_v18, %v8676_v54  ;;  %v12293_v29 = vcombine.high %v8389_v11, %v8395_v39  ;;  %v12294_v43 = vcombine.low %v8392_v40, %v8398_v34  ;;  %v8713_v51 = vrot.slane %v1528_v57, %v7701_v10 }
 0x15c   : > { %7128 = vrot.lane.b32.xlu0 %v7127_v26, %s7633_s10  ;;  %7148 = vrot.lane.b32.xlu1 %v7147_v12, %s7633_s10  ;;  %v7152_v26 = vpack.i.bf16 %v8660_v19, %v8679_v24  ;;  %v8725_v34 = vrot.slane %v2338_v48, %v8090_v36  ;;  %v8728_v57 = vrot.slane %v2339_v20, %v8090_v36 }
 0x15d   : > { %v8685_v31 = vpop.permute.xlu1 %2438  ;;  %v8704_v12 = vrot.slane %v12293_v29, %v8090_v36  ;;  %v8710_v58 = vrot.slane %v12294_v43, %v8090_v36  ;;  %v1575_v43 = vcombine.low %v8713_v51, %v8691_v5  ;;  %v2271_v56 = vcombine.high %v8583_v32, %v8569_v15 }
 0x15e   : > { %v2441_v23 = vpop.permute.xlu0 %2440  ;;  %v2521_v63 = vcombine.high %v8605_v4, %v8685_v31  ;;  %v8740_v48 = vrot.slane %v1873_v50, %v8090_v36  ;;  %v8743_v20 = vrot.slane %v1874_v44, %v8090_v36  ;;  %v2254_v15 = vcombine.low %v8580_v37, %v8561_v45 }
 0x15f   : > { %12295 = vst [vmem:[#allocation10_spill] sm:$0xff] %v8710_v58  ;;  %v2469_v53 = vcombine.high %v8620_v52, %v2441_v23  ;;  %v7137_v40 = vpack.i.bf16 %v8704_v12, %v8688_v0  ;;  %v7157_v13 = vpack.i.bf16 %v8710_v58, %v8698_v38  ;;  %v8766_v50 = vrot.slane %v1644_v30, %v8090_v36 }
 0x160   : > { %7133 = vrot.lane.b32.xlu0 %v7132_v17, %s7633_s10  ;;  %7153 = vrot.lane.b32.xlu1 %v7152_v26, %s7634_s11  ;;  %v2453_v17 = vcombine.high %v8574_v2, %v8655_v8  ;;  %v8749_v24 = vrot.slane %v2521_v63, %v7701_v10  ;;  %v7142_v28 = vpack.i.bf16 %v8725_v34, %v8740_v48 }
 0x161   : > { %v2443_v29 = vpop.permute.xlu1 %2442  ;;  %v8752_v19 = vrot.slane %v2469_v53, %v7701_v10  ;;  %v7162_v32 = vpack.i.bf16 %v8728_v57, %v8743_v20  ;;  %v1789_v45 = vcombine.low %v8598_v55, %v8566_v35  ;;  %v1806_v37 = vcombine.high %v8611_v47, %v8577_v33 }
 0x162   : > { %v2537_v26 = vcombine.high %v8645_v42, %v2443_v29  ;;  %v8769_v44 = vrot.slane %v2453_v17, %v7701_v10  ;;  %v2536_v63 = vcombine.low %v8645_v42, %v2443_v29  ;;  %v8782_v30 = vrot.slane %v2109_v1, %v8090_v36 }
 0x163   : > { %v8785_v17 = vrot.slane %v2271_v56, %v8090_v36  ;;  %v2520_v42 = vcombine.low %v8605_v4, %v8685_v31  ;;  %v2468_v29 = vcombine.low %v8620_v52, %v2441_v23  ;;  %v1627_v35 = vcombine.low %v8627_v41, %v8603_v60 }
 0x164   : > { %v8755_v58 = vrot.slane %v2537_v26, %v7701_v10  ;;  %7138 = vrot.lane.b32.xlu0 %v7137_v40, %s7633_s10  ;;  %7158 = vrot.lane.b32.xlu1 %v7157_v13, %s7634_s11  ;;  %v8775_v40 = vrot.slane %v1575_v43, %v8090_v36  ;;  %v2500_v43 = vcombine.low %v8769_v44, %v8752_v19 }
 0x165   : > { %v1576_v33 = vcombine.high %v8713_v51, %v8691_v5  ;;  %v7177_v55 = vpack.i.bf16 %v8782_v30, %v8766_v50  ;;  %v8801_v31 = vrot.slane %v2254_v15, %v8090_v36  ;;  %v2452_v4 = vcombine.low %v8574_v2, %v8655_v8 }
 0x166   : > { %v2568_v53 = vcombine.low %v8749_v24, %v8755_v58  ;;  %v8806_v47 = vrot.slane %v2536_v63, %v7701_v10  ;;  %v7167_v52 = vpack.i.bf16 %v8746_v14, %v8775_v40  ;;  %v2092_v41 = vcombine.low %v8389_v11, %v8395_v39 }
 0x167   : > { %v8816_v1 = vrot.slane %v1806_v37, %v8090_v36  ;;  %v2041_v5 = vcombine.high %v8410_v16, %v8416_v62  ;;  %v8821_v2 = vrot.slane %v1789_v45, %v8090_v36  ;;  %v8824_v8 = vrot.slane %v2520_v42, %v7701_v10 }
 0x168   : > { %7143 = vrot.lane.b32.xlu0 %v7142_v28, %s7634_s11  ;;  %7163 = vrot.lane.b32.xlu1 %v7162_v32, %s7635_s12  ;;  %v8811_v60 = vrot.slane %v2568_v53, %v8090_v36  ;;  %v8827_v23 = vrot.slane %v2468_v29, %v7701_v10  ;;  %v8832_v11 = vrot.slane %v2500_v43, %v8090_v36  ;;  %v12296_v51 = vmov 0.0  }
 0x169   : > { %v2322_v39 = vcombine.low %v8533_v59, %v8518_v21  ;;  %v8837_v16 = vrot.slane %v1627_v35, %v8090_v36  ;;  %v7172_v62 = vpack.i.bf16 %v8785_v17, %v8816_v1  ;;  %v2286_v26 = vcombine.high %v8801_v31, %v12296_v51 }
 0x16a   : > { %v8844_v13 = vrot.slane %v2452_v4, %v7701_v10  ;;  %v2553_v56 = vcombine.high %v8824_v8, %v8806_v47  ;;  %v7192_v15 = vpack.i.bf16 %v8811_v60, %v8832_v11  ;;  %v8851_v21 = vrot.slane %v1576_v33, %v8090_v36 }
 0x16b   : > { %v1821_v59 = vcombine.high %v8821_v2, %v12296_v51  ;;  %v8856_v28 = vrot.slane %v2092_v41, %v8090_v36  ;;  %v1857_v32 = vcombine.low %v8515_v49, %v8500_v22  ;;  %v8865_v53 = vrot.slane %v2041_v5, %v8090_v36 }
 0x16c   : > { %7168 = vrot.lane.b32.xlu0 %v7167_v52, %s7634_s11  ;;  %7178 = vrot.lane.b32.xlu1 %v7177_v55, %s7635_s12  ;;  %v2485_v63 = vcombine.high %v8844_v13, %v8827_v23  ;;  %v8868_v45 = vrot.slane %v2322_v39, %v8090_v36  ;;  %v1559_v42 = vcombine.low %v8590_v46, %v8593_v3 }
 0x16d   : > { %v7202_v37 = vpack.i.bf16 %v2286_v26, %v1821_v59  ;;  %v7182_v49 = vpack.i.bf16 %v8865_v53, %v8851_v21  ;;  %v1659_v22 = vcombine.high %v8837_v16, %v12296_v51  ;;  %v8877_v29 = vrot.slane %v2553_v56, %v8090_v36 }
 0x16e   : > { %v2024_v43 = vcombine.low %v8407_v7, %v8413_v9  ;;  %v8882_v35 = vrot.slane %v1857_v32, %v8090_v36  ;;  %v2124_v46 = vcombine.high %v8856_v28, %v12296_v51  ;;  %v8889_v3 = vrot.slane %v2485_v63, %v8090_v36 }
 0x16f   : > { %v2355_v33 = vcombine.high %v8608_v27, %v12296_v51  ;;  %v8894_v55 = vrot.slane %v1559_v42, %v8090_v36  ;;  %v2354_v4 = vcombine.high %v8868_v45, %v12296_v51  ;;  %v1890_v52 = vcombine.high %v8630_v61, %v12296_v51 }
 0x170   : > { %7173 = vrot.lane.b32.xlu0 %v7172_v62, %s7635_s12  ;;  %7193 = vrot.lane.b32.xlu1 %v7192_v15, %s7634_s11  ;;  %v7207_v7 = vpack.i.bf16 %v2124_v46, %v1659_v22  ;;  %v7187_v9 = vpack.i.bf16 %v8877_v29, %v8889_v3  ;;  %v1889_v27 = vcombine.high %v8882_v35, %v12296_v51  ;;  %v12297_v22 = vld [vmem:[#allocation10_spill] sm:$0xff] }
 0x171   : > { %v8907_v41 = vrot.slane %v2024_v43, %v8090_v36  ;;  %v1660_v5 = vcombine.high %v8688_v0, %v12296_v51  ;;  %v7212_v39 = vpack.i.bf16 %v2355_v33, %v1890_v52  ;;  %v1591_v26 = vcombine.high %v8894_v55, %v12296_v51 }
 0x172   : > { %v7197_v62 = vpack.i.bf16 %v2354_v4, %v1889_v27  ;;  %v2125_v61 = vcombine.high %v8704_v12, %v12296_v51  ;;  %v2356_v15 = vcombine.high %v8725_v34, %v12296_v51  ;;  %v2287_v0 = vcombine.high %v8650_v18, %v12296_v51 }
 0x173   : > { %v2056_v56 = vcombine.high %v8907_v41, %v12296_v51  ;;  %v1891_v63 = vcombine.high %v8740_v48, %v12296_v51  ;;  %v1822_v12 = vcombine.high %v8676_v54, %v12296_v51  ;;  %v1592_v42 = vcombine.high %v8640_v25, %v12296_v51 }
 0x174   : > { %7183 = vrot.lane.b32.xlu0 %v7182_v49, %s7635_s12  ;;  %7203 = vrot.lane.b32.xlu1 %v7202_v37, %s7637_s13  ;;  %v7227_v32 = vpack.i.bf16 %v2125_v61, %v1660_v5  ;;  %v2552_v34 = vcombine.low %v8824_v8, %v8806_v47  ;;  %v1661_v18 = vcombine.high %v8698_v38, %v12296_v51  ;;  %v12298_v47 = vld [vmem:[#allocation11_spill] sm:$0xff] }
 0x175   : > { %v7217_v59 = vpack.i.bf16 %v2056_v56, %v1591_v26  ;;  %v7232_v37 = vpack.i.bf16 %v2356_v15, %v1891_v63  ;;  %v7222_v49 = vpack.i.bf16 %v2287_v0, %v1822_v12  ;;  %v2057_v48 = vcombine.high %v8495_v6, %v12296_v51 }
 0x176   : > { %v2484_v54 = vcombine.low %v8844_v13, %v8827_v23  ;;  %v2126_v43 = vcombine.high %v12297_v22, %v12296_v51  ;;  %v2357_v25 = vcombine.high %v8728_v57, %v12296_v51  ;;  %v2288_v38 = vcombine.high %v12298_v47, %v12296_v51  ;;  %v12299_v13 = vld [vmem:[#allocation12_spill] sm:$0xff]  ;;  %v12304_v22 = vld [vmem:[#allocation6_spill] sm:$0xff] }
 0x177   : > { %v8948_v8 = vrot.slane %v2552_v34, %v8090_v36  ;;  %v7237_v46 = vpack.i.bf16 %v2057_v48, %v1592_v42  ;;  %v1823_v33 = vcombine.high %v12299_v13, %v12296_v51  ;;  %v1593_v57 = vcombine.high %v8775_v40, %v12296_v51  ;;  %v12300_v42 = vld [vmem:[#allocation4_spill] sm:$0xff]  ;;  %v593_v48 = vld [vmem:[%s12051_s2] sm:$0xf] }
 0x178   : > { %7208 = vrot.lane.b32.xlu1 %v7207_v7, %s7637_s13  ;;  %7188 = vrot.lane.b32.xlu0 %v7187_v9, %s7633_s10  ;;  %v7247_v6 = vpack.i.bf16 %v2126_v43, %v1661_v18  ;;  %v8951_v23 = vrot.slane %v2484_v54, %v8090_v36  ;;  %v1892_v7 = vcombine.high %v8743_v20, %v12296_v51  ;;  %v12301_v34 = vld [vmem:[#allocation8_spill] sm:$0xff]  ;;  %v12303_v54 = vld [vmem:[#allocation2_spill] sm:$0xff] }
 0x179   : > { %v7242_v4 = vpack.i.bf16 %v2288_v38, %v1823_v33  ;;  %v2584_v52 = vcombine.high %v8948_v8, %v12296_v51  ;;  %v2058_v27 = vcombine.high %v8746_v14, %v12296_v51  ;;  %v2289_v5 = vcombine.high %v8785_v17, %v12296_v51 }
 0x17a   : > { %v7252_v9 = vpack.i.bf16 %v2357_v25, %v1892_v7  ;;  %v2516_v20 = vcombine.high %v8951_v23, %v12296_v51  ;;  %v1662_v40 = vcombine.high %v8766_v50, %v12296_v51  ;;  %v1824_v26 = vcombine.high %v8816_v1, %v12296_v51 }
 0x17b   : > { %v2127_v14 = vcombine.high %v8782_v30, %v12296_v51  ;;  %v2569_v56 = vcombine.high %v8749_v24, %v8755_v58  ;;  %v1594_v17 = vcombine.high %v8851_v21, %v12296_v51  ;;  %v2585_v15 = vcombine.high %v8877_v29, %v12296_v51 }
 0x17c   : > { %7213 = vrot.lane.b32.xlu1 %v7212_v39, %s7638_s14  ;;  %7198 = vrot.lane.b32.xlu0 %v7197_v62, %s7637_s13  ;;  %v7257_v39 = vpack.i.bf16 %v2058_v27, %v1593_v57  ;;  %v7267_v62 = vpack.i.bf16 %v2584_v52, %v2516_v20  ;;  %v7262_v61 = vpack.i.bf16 %v2289_v5, %v1824_v26  ;;  %v12308_v26 = vld [vmem:[#allocation5_spill] sm:$0xff] }
 0x17d   : > { %v7272_v50 = vpack.i.bf16 %v2127_v14, %v1662_v40  ;;  %v2501_v1 = vcombine.high %v8769_v44, %v8752_v19  ;;  %v2059_v30 = vcombine.high %v8865_v53, %v12296_v51  ;;  %v2517_v24 = vcombine.high %v8889_v3, %v12296_v51  ;;  %v12309_v14 = vld [vmem:[#allocation9_spill] sm:$0xff] }
 0x17e   : > { %v2586_v58 = vcombine.high %v8811_v60, %v12296_v51  ;;  %v2583_v19 = vrot.slane %v2569_v56, %v8090_v36  ;;  %v2518_v44 = vcombine.high %v8832_v11, %v12296_v51  ;;  %v12302_v18 = vcombine.low %v12300_v42, %v12301_v34 }
 0x17f   : > { %v7287_v29 = vpack.i.bf16 %v2585_v15, %v2517_v24  ;;  %v2515_v53 = vrot.slane %v2501_v1, %v8090_v36  ;;  %v12305_v43 = vcombine.low %v12303_v54, %v12304_v22  ;;  %v12306_v57 = vcombine.high %v12300_v42, %v12301_v34 }
 0x180   : > { %7218 = vrot.lane.b32.xlu1 %v7217_v59, %s7637_s13  ;;  %7228 = vrot.lane.b32.xlu0 %v7227_v32, %s7638_s14  ;;  %v7277_v59 = vpack.i.bf16 %v2059_v30, %v1594_v17  ;;  %v7292_v32 = vpack.i.bf16 %v2586_v58, %v2518_v44  ;;  %v2587_v12 = vcombine.high %v2583_v19, %v12296_v51  ;;  %v12311_v17 = vld [vmem:[#allocation3_spill] sm:$0xff] }
 0x181   : > { %v7282_v63 = vpack.i.bf16 %v2583_v19, %v2515_v53  ;;  %v2519_v11 = vcombine.high %v2515_v53, %v12296_v51  ;;  %v9030_v25 = vrot.slane %v12305_v43, %v8090_v36  ;;  %v12321_v43 = vld [vmem:[#allocation21_spill] sm:$0xff] }
 0x183   : > { %v420_v13 = vcombine.high %v9030_v25, %v12296_v51 }
 0x184   : > { %7223 = vrot.lane.b32.xlu1 %v7222_v49, %s7638_s14  ;;  %7233 = vrot.lane.b32.xlu0 %v7232_v37, %s7639_s15  ;;  %v12091_v37 = vmov 0   ;;  %v9021_v49 = vrot.slane %v12302_v18, %v8090_v36  ;;  %v12314_v18 = vcombine.high %v12308_v26, %v12309_v14 }
 0x185   : > { %2745 = vmatprep.mubr.bf16.mxu0 %v12091_v37  ;;  %7302 = vset.pattern.permute.xlu1 %v12091_v37 }
 0x186   : > { %v8995_v21 = vpop.permute.xlu0 %6988  ;;  %6809 = vmatprep.mubr.bf16.mxu1 %v12091_v37  ;;  %7618 = vset.pattern.permute.xlu0 %v12091_v37 }
 0x187   : > { %v6991_v58 = vunpack.i.h.bf16 %v8995_v21 }
 0x188   : > { %7248 = vrot.lane.b32.xlu1 %v7247_v6, %s7639_s15  ;;  %7238 = vrot.lane.b32.xlu0 %v7237_v46, %s7638_s14  ;;  %v7297_v6 = vpack.i.bf16 %v2587_v12, %v2519_v11  ;;  %v352_v46 = vcombine.high %v9021_v49, %v12296_v51 }
 0x18c   : > { %7253 = vrot.lane.b32.xlu1 %v7252_v9, %s7640_s16  ;;  %7243 = vrot.lane.b32.xlu0 %v7242_v4, %s7639_s15  ;;  %v335_v9 = vrot.slane %v12306_v57, %v8090_v36  ;;  %v12307_v4 = vcombine.high %v12303_v54, %v12304_v22 }
 0x18e   : > { %v9005_v3 = vpop.permute.xlu0 %6993  ;;  %v403_v52 = vrot.slane %v12307_v4, %v8090_v36  ;;  %v353_v5 = vcombine.high %v335_v9, %v12296_v51 }
 0x18f   : > { %v6996_v44 = vunpack.i.h.bf16 %v9005_v3  ;;  %v6995_v53 = vunpack.i.l.bf16 %v9005_v3 }
 0x190   : > { %7258 = vrot.lane.b32.xlu0 %v7257_v39, %s7639_s15  ;;  %7268 = vrot.lane.b32.xlu1 %v7267_v62, %s7637_s13  ;;  %v421_v40 = vcombine.high %v403_v52, %v12296_v51 }
 0x194   : > { %7263 = vrot.lane.b32.xlu0 %v7262_v61, %s7640_s16  ;;  %7273 = vrot.lane.b32.xlu1 %v7272_v50, %s7640_s16  ;;  %v12310_v61 = vcombine.low %v12308_v26, %v12309_v14  ;;  %v12312_v50 = vld [vmem:[#allocation7_spill] sm:$0xff] }
 0x195   : > { %v12313_v15 = vcombine.low %v12311_v17, %v12312_v50  ;;  %v12315_v54 = vcombine.high %v12311_v17, %v12312_v50 }
 0x196   : > { %v8997_v0 = vpop.permute.xlu1 %6998  ;;  %v344_v56 = vrot.slane %v12310_v61, %v8090_v36 }
 0x197   : > { %v412_v1 = vrot.slane %v12313_v15, %v8090_v36  ;;  %v419_v22 = vrot.slane %v12315_v54, %v8090_v36  ;;  %v12318_v54 = vld [vmem:[#allocation17_spill] sm:$0xff] }
 0x198   : > { %7288 = vrot.lane.b32.xlu0 %v7287_v29, %s7638_s14  ;;  %7278 = vrot.lane.b32.xlu1 %v7277_v59, %s7640_s16  ;;  %v6990_v29 = vunpack.i.l.bf16 %v8995_v21  ;;  %v354_v59 = vcombine.high %v344_v56, %v12296_v51 }
 0x199   : > { %v422_v19 = vcombine.high %v412_v1, %v12296_v51 }
 0x19a   : > { %v9007_v60 = vpop.permute.xlu1 %7003 }
 0x19b   : > { %v7006_v12 = vunpack.i.h.bf16 %v9007_v60  ;;  %v7005_v11 = vunpack.i.l.bf16 %v9007_v60 }
 0x19c   : > { %7293 = vrot.lane.b32.xlu0 %v7292_v32, %s7639_s15  ;;  %7283 = vrot.lane.b32.xlu1 %v7282_v63, %s7635_s12  ;;  %v7001_v32 = vunpack.i.h.bf16 %v8997_v0  ;;  %v7000_v63 = vunpack.i.l.bf16 %v8997_v0  ;;  %v12323_v0 = vld [vmem:[#allocation22_spill] sm:$0xff] }
 0x19e   : > { %v9032_v47 = vpop.permute.xlu1 %7028  ;;  %v9034_v38 = vpop.permute.xlu0 %7008 }
 0x1a0   : > { %7298 = vrot.lane.b32.xlu0 %v7297_v6, %s7640_s16  ;;  %2699 = vperm.xlu1 %7302, %v593_v48   ;;  %v351_v48 = vrot.slane %v12314_v18, %v8090_v36 }
 0x1a2   : > { %v9041_v33 = vpop.permute.xlu1 %7033  ;;  %v9043_v7 = vpop.permute.xlu0 %7013  ;;  %v355_v4 = vcombine.high %v351_v48, %v12296_v51 }
 0x1a4   : > { %425 = vrot.lane.b32.xlu0 %v352_v46, %s7637_s13  ;;  %453 = vrot.lane.b32.xlu1 %v420_v13, %s7637_s13  ;;  %v7011_v46 = vunpack.i.h.bf16 %v9034_v38  ;;  %v7010_v13 = vunpack.i.l.bf16 %v9034_v38  ;;  %v12325_v38 = vunpack.i.h.bf16 %v9032_v47 }
 0x1a6   : > { %v9055_v27 = vpop.permute.xlu1 %7038  ;;  %v9057_v20 = vpop.permute.xlu0 %7018 }
 0x1a8   : > { %429 = vrot.lane.b32.xlu0 %v335_v9, %s7633_s10  ;;  %457 = vrot.lane.b32.xlu1 %v403_v52, %s7633_s10  ;;  %v423_v52 = vcombine.high %v419_v22, %v12296_v51  ;;  %v7020_v51 = vunpack.i.l.bf16 %v9057_v20  ;;  %v12317_v9 = vld [vmem:[#allocation16_spill] sm:$0xff] }
 0x1aa   : > { %v9063_v39 = vpop.permute.xlu1 %7043  ;;  %v9065_v62 = vpop.permute.xlu0 %7023 }
 0x1ac   : > { %433 = vrot.lane.b32.xlu0 %v353_v5, %s7638_s14  ;;  %461 = vrot.lane.b32.xlu1 %v421_v40, %s7638_s14  ;;  %v12319_v5 = vld [vmem:[#allocation15_spill] sm:$0xff] }
 0x1ad   : > { %v12320_v40 = vld [vmem:[#allocation19_spill] sm:$0xff] }
 0x1ae   : > { %v7054_v30 = vpop.permute.xlu1 %7053  ;;  %v7049_v24 = vpop.permute.xlu0 %7048 }
 0x1af   : > { %v7051_v26 = vunpack.i.h.bf16 %v7049_v24  ;;  %v7050_v14 = vunpack.i.l.bf16 %v7049_v24  ;;  %v7056_v61 = vunpack.i.h.bf16 %v7054_v30  ;;  %v7026_v24 = vunpack.i.h.bf16 %v9065_v62 }
 0x1b0   : > { %437 = vrot.lane.b32.xlu0 %v344_v56, %s7634_s11  ;;  %465 = vrot.lane.b32.xlu1 %v412_v1, %s7634_s11  ;;  %v7055_v56 = vunpack.i.l.bf16 %v7054_v30  ;;  %v7025_v30 = vunpack.i.l.bf16 %v9065_v62 }
 0x1b1   : > { %v1489_v37 = vsel %vm480_vm5, %v12318_v54, %v7056_v61 }
 0x1b2   : > { %v7059_v42 = vpop.permute.xlu1 %7058  ;;  %v9089_v34 = vpop.permute.xlu0 %7068  ;;  %v1020_v62 = vsel %vm480_vm5, %v12319_v5, %v7055_v56 }
 0x1b3   : > { %v7061_v17 = vunpack.i.h.bf16 %v7059_v42  ;;  %v7060_v50 = vunpack.i.l.bf16 %v7059_v42  ;;  %v12316_v42 = vld [vmem:[#allocation18_spill] sm:$0xff] }
 0x1b4   : > { %441 = vrot.lane.b32.xlu0 %v354_v59, %s7639_s15  ;;  %469 = vrot.lane.b32.xlu1 %v422_v19, %s7639_s15  ;;  %v7021_v19 = vunpack.i.h.bf16 %v9057_v20  ;;  %v1496_v57 = vsel %vm480_vm5, %v12316_v42, %v7051_v26  ;;  %v1027_v59 = vsel %vm480_vm5, %v12317_v9, %v7050_v14  ;;  %v7071_v9 = vunpack.i.h.bf16 %v9089_v34 }
 0x1b5   : > { %v7070_v14 = vunpack.i.l.bf16 %v9089_v34  ;;  %v1028_v61 = vsel %vm482_vm6, %v1027_v59, %v6990_v29  ;;  %v1497_v5 = vsel %vm482_vm6, %v1496_v57, %v6991_v58  ;;  %v1021_v58 = vsel %vm482_vm6, %v1020_v62, %v6995_v53 }
 0x1b6   : > { %v7064_v15 = vpop.permute.xlu1 %7063  ;;  %v7074_v1 = vpop.permute.xlu0 %7073  ;;  %v1490_v29 = vsel %vm482_vm6, %v1489_v37, %v6996_v44 }
 0x1b7   : > { %v7066_v20 = vunpack.i.h.bf16 %v7064_v15  ;;  %v7065_v18 = vunpack.i.l.bf16 %v7064_v15  ;;  %v7075_v56 = vunpack.i.l.bf16 %v7074_v1 }
 0x1b8   : > { %445 = vrot.lane.b32.xlu0 %v351_v48, %s7635_s12  ;;  %473 = vrot.lane.b32.xlu1 %v419_v22, %s7635_s12  ;;  %v1257_v48 = vsel %vm480_vm5, %v12320_v40, %v7061_v17  ;;  %v793_v22 = vsel %vm480_vm5, %v12321_v43, %v7060_v50  ;;  %v7076_v40 = vunpack.i.h.bf16 %v7074_v1  ;;  %v12322_v50 = vld [vmem:[#allocation20_spill] sm:$0xff] }
 0x1b9   : > { %v1029_v43 = vsel %vm484_vm7, %v1028_v61, %v7065_v18  ;;  %v1498_v34 = vsel %vm484_vm7, %v1497_v5, %v7066_v20  ;;  %v1258_v21 = vsel %vm482_vm6, %v1257_v48, %v7001_v32  ;;  %v786_v32 = vsel %vm480_vm5, %v12323_v0, %v7070_v14 }
 0x1ba   : > { %v7079_v6 = vpop.permute.xlu1 %7078  ;;  %v7099_v26 = vpop.permute.xlu0 %7098  ;;  %v1022_v53 = vsel %vm484_vm7, %v1021_v58, %v7075_v56  ;;  %v1491_v3 = vsel %vm484_vm7, %v1490_v29, %v7076_v40  ;;  %v1030_v37 = vsel %vm486_vm8, %v1029_v43, %v7005_v11  ;;  %v1499_v44 = vsel %vm486_vm8, %v1498_v34, %v7006_v12 }
 0x1bb   : > { %v7081_v15 = vunpack.i.h.bf16 %v7079_v6  ;;  %v7080_v42 = vunpack.i.l.bf16 %v7079_v6  ;;  %v794_v6 = vsel %vm482_vm6, %v793_v22, %v7000_v63  ;;  %v1250_v63 = vsel %vm480_vm5, %v12322_v50, %v7071_v9 }
 0x1bc   : > { %449 = vrot.lane.b32.xlu0 %v355_v4, %s7640_s16  ;;  %477 = vrot.lane.b32.xlu1 %v423_v52, %s7640_s16  ;;  %v7101_v48 = vunpack.i.h.bf16 %v7099_v26  ;;  %v7100_v22 = vunpack.i.l.bf16 %v7099_v26  ;;  %v787_v5 = vsel %vm482_vm6, %v786_v32, %v7010_v13  ;;  %v12324_v43 = vunpack.i.l.bf16 %v9032_v47 }
 0x1bd   : > { %v795_v57 = vsel %vm484_vm7, %v794_v6, %v7080_v42  ;;  %v1259_v4 = vsel %vm484_vm7, %v1258_v21, %v7081_v15  ;;  %v12326_v6 = vunpack.i.l.bf16 %v9043_v7  ;;  %v12327_v58 = vunpack.i.h.bf16 %v9043_v7 }
 0x1be   : > { %v7084_v52 = vpop.permute.xlu1 %7083  ;;  %v7104_v17 = vpop.permute.xlu0 %7103  ;;  %v796_v20 = vsel %vm486_vm8, %v795_v57, %v7020_v51  ;;  %v1260_v62 = vsel %vm486_vm8, %v1259_v4, %v7021_v19  ;;  %v1251_v19 = vsel %vm482_vm6, %v1250_v63, %v7011_v46  ;;  %v12328_v63 = vunpack.i.l.bf16 %v9055_v27 }
 0x1bf   : > { %v7086_v1 = vunpack.i.h.bf16 %v7084_v52  ;;  %v7085_v59 = vunpack.i.l.bf16 %v7084_v52  ;;  %v7106_v42 = vunpack.i.h.bf16 %v7104_v17  ;;  %v7105_v60 = vunpack.i.l.bf16 %v7104_v17 }
 0x1c0   : > { %v797_v51 = vsel %vm488_vm9, %v796_v20, %v7100_v22  ;;  %v1261_v26 = vsel %vm488_vm9, %v1260_v62, %v7101_v48  ;;  %v1023_v21 = vsel %vm486_vm8, %v1022_v53, %v12326_v6  ;;  %v1492_v29 = vsel %vm486_vm8, %v1491_v3, %v12327_v58 }
 0x1c1   : > { %v1031_v18 = vsel %vm488_vm9, %v1030_v37, %v7085_v59  ;;  %v1500_v54 = vsel %vm488_vm9, %v1499_v44, %v7086_v1  ;;  %v798_v47 = vsel %vm490_vm10, %v797_v51, %v12328_v63  ;;  %v12329_v0 = vunpack.i.h.bf16 %v9055_v27 }
 0x1c2   : > { %v7089_v9 = vpop.permute.xlu1 %7088  ;;  %v7109_v14 = vpop.permute.xlu0 %7108  ;;  %v1032_v15 = vsel %vm490_vm10, %v1031_v18, %v7025_v30  ;;  %v1501_v11 = vsel %vm490_vm10, %v1500_v54, %v7026_v24  ;;  %v12330_v62 = vunpack.i.l.bf16 %v9041_v33  ;;  %v12331_v48 = vunpack.i.h.bf16 %v9041_v33 }
 0x1c3   : > { %v7091_v61 = vunpack.i.h.bf16 %v7089_v9  ;;  %v7090_v12 = vunpack.i.l.bf16 %v7089_v9  ;;  %v1033_v40 = vsel %vm492_vm11, %v1032_v15, %v7105_v60  ;;  %v1502_v56 = vsel %vm492_vm11, %v1501_v11, %v7106_v42 }
 0x1c4   : > { %v7111_v4 = vunpack.i.h.bf16 %v7109_v14  ;;  %v7110_v52 = vunpack.i.l.bf16 %v7109_v14  ;;  %v1262_v32 = vsel %vm490_vm10, %v1261_v26, %v12329_v0  ;;  %v2661_v1 = vrot.slane %v1033_v40, 4 }
 0x1c5   : > { %v788_v30 = vsel %vm484_vm7, %v787_v5, %v7090_v12  ;;  %v1252_v24 = vsel %vm484_vm7, %v1251_v19, %v7091_v61  ;;  %v2667_v59 = vrot.slane %v1502_v56, 4  ;;  %v12332_v42 = vunpack.i.l.bf16 %v9063_v39 }
 0x1c6   : > { %v789_v13 = vsel %vm486_vm8, %v788_v30, %v12324_v43  ;;  %v1253_v46 = vsel %vm486_vm8, %v1252_v24, %v12325_v38  ;;  %v7094_v34 = vpop.permute.xlu1 %7093  ;;  %v7114_v57 = vpop.permute.xlu0 %7113  ;;  %v12333_v12 = vunpack.i.h.bf16 %v9063_v39 }
 0x1c7   : > { %v7096_v17 = vunpack.i.h.bf16 %v7094_v34  ;;  %v7095_v50 = vunpack.i.l.bf16 %v7094_v34  ;;  %v790_v53 = vsel %vm488_vm9, %v789_v13, %v7110_v52  ;;  %v1254_v7 = vsel %vm488_vm9, %v1253_v46, %v7111_v4 }
 0x1c8   : > { %v7116_v44 = vunpack.i.h.bf16 %v7114_v57  ;;  %v7115_v18 = vunpack.i.l.bf16 %v7114_v57  ;;  %v791_v60 = vsel %vm490_vm10, %v790_v53, %v12332_v42  ;;  %v1255_v5 = vsel %vm490_vm10, %v1254_v7, %v12333_v12 }
 0x1c9   : > { %v1024_v3 = vsel %vm488_vm9, %v1023_v21, %v7095_v50  ;;  %v1493_v37 = vsel %vm488_vm9, %v1492_v29, %v7096_v17 }
 0x1ca   : > { %v7124_v54 = vpop.permute.xlu1 %7123  ;;  %v7119_v20 = vpop.permute.xlu0 %7118  ;;  %v1025_v27 = vsel %vm490_vm10, %v1024_v3, %v12330_v62  ;;  %v1494_v22 = vsel %vm490_vm10, %v1493_v37, %v12331_v48 }
 0x1cb   : > { %v7126_v9 = vunpack.i.h.bf16 %v7124_v54  ;;  %v7125_v14 = vunpack.i.l.bf16 %v7124_v54  ;;  %v7121_v15 = vunpack.i.h.bf16 %v7119_v20  ;;  %v7120_v11 = vunpack.i.l.bf16 %v7119_v20 }
 0x1cc   : > { %v1026_v61 = vsel %vm492_vm11, %v1025_v27, %v7115_v18  ;;  %v1495_v19 = vsel %vm492_vm11, %v1494_v22, %v7116_v44 }
 0x1cd   : > { %v799_v33 = vsel %vm492_vm11, %v798_v47, %v7120_v11  ;;  %v1263_v51 = vsel %vm492_vm11, %v1262_v32, %v7121_v15  ;;  %v792_v26 = vsel %vm492_vm11, %v791_v60, %v7125_v14  ;;  %v1256_v30 = vsel %vm492_vm11, %v1255_v5, %v7126_v9 }
 0x1ce   : > { %v9229_v24 = vpop.permute.xlu1 %7148  ;;  %v9231_v40 = vpop.permute.xlu0 %7128  ;;  %v2684_v56 = vsel %vm2682_vm12, %v799_v33, %v2661_v1  ;;  %v2686_v39 = vsel %vm2682_vm12, %v1263_v51, %v2667_v59  ;;  %v2660_v43 = vrot.slane %v1026_v61, 4  ;;  %v2666_v13 = vrot.slane %v1495_v19, 4 }
 0x1cf   : > { %v2692_v38 = vpack.c.bf16 %v2686_v39, %v2684_v56  ;;  %v7151_v53 = vunpack.i.h.bf16 %v9229_v24  ;;  %v7150_v7 = vunpack.i.l.bf16 %v9229_v24  ;;  %v7131_v3 = vunpack.i.h.bf16 %v9231_v40 }
 0x1d0   : > { %v2683_v46 = vsel %vm2682_vm12, %v792_v26, %v2660_v43  ;;  %v2685_v34 = vsel %vm2682_vm12, %v1256_v30, %v2666_v13  ;;  %v7130_v37 = vunpack.i.l.bf16 %v9231_v40 }
 0x1d1   : > { %v2691_v6 = vpack.c.bf16 %v2685_v34, %v2683_v46  ;;  %2713 = vmatprep.subr.bf16.mxu0 %v2692_v38 }
 0x1d2   : > { %v9237_v21 = vpop.permute.xlu1 %7153  ;;  %v9239_v58 = vpop.permute.xlu0 %7133 }
 0x1d3   : > { %2714 = vmatpush1.bf16.msra.mxu0 %v2691_v6  ;;  %v7156_v44 = vunpack.i.h.bf16 %v9237_v21  ;;  %v7155_v18 = vunpack.i.l.bf16 %v9237_v21  ;;  %v7136_v54 = vunpack.i.h.bf16 %v9239_v58  ;;  %v7135_v20 = vunpack.i.l.bf16 %v9239_v58 }
 0x1d6   : > { %v9241_v29 = vpop.permute.xlu1 %7158  ;;  %v9243_v57 = vpop.permute.xlu0 %7138 }
 0x1d7   : > { %v7161_v48 = vunpack.i.h.bf16 %v9241_v29  ;;  %v7160_v22 = vunpack.i.l.bf16 %v9241_v29  ;;  %v7141_v15 = vunpack.i.h.bf16 %v9243_v57  ;;  %v7140_v11 = vunpack.i.l.bf16 %v9243_v57 }
 0x1da   : > { %v9245_v4 = vpop.permute.xlu1 %7163  ;;  %v9247_v52 = vpop.permute.xlu0 %7143 }
 0x1db   : > { %v7166_v42 = vunpack.i.h.bf16 %v9245_v4  ;;  %v7165_v60 = vunpack.i.l.bf16 %v9245_v4  ;;  %v7146_v61 = vunpack.i.h.bf16 %v9247_v52  ;;  %v7145_v33 = vunpack.i.l.bf16 %v9247_v52 }
 0x1de   : > { %v9249_v17 = vpop.permute.xlu1 %7178  ;;  %v9251_v50 = vpop.permute.xlu0 %7168 }
 0x1df   : > { %v7181_v51 = vunpack.i.h.bf16 %v9249_v17  ;;  %v7180_v26 = vunpack.i.l.bf16 %v9249_v17  ;;  %v7171_v39 = vunpack.i.h.bf16 %v9251_v50  ;;  %v7170_v43 = vunpack.i.l.bf16 %v9251_v50 }
 0x1e2   : > { %v9253_v63 = vpop.permute.xlu1 %7193  ;;  %v9255_v47 = vpop.permute.xlu0 %7173 }
 0x1e3   : > { %v7175_v6 = vunpack.i.l.bf16 %v9255_v47  ;;  %v12334_v17 = vunpack.i.h.bf16 %v9255_v47 }
 0x1e6   : > { %v7204_v0 = vpop.permute.xlu1 %7203  ;;  %v9257_v32 = vpop.permute.xlu0 %7183 }
 0x1e7   : > { %v7206_v12 = vunpack.i.h.bf16 %v7204_v0  ;;  %v7205_v5 = vunpack.i.l.bf16 %v7204_v0 }
 0x1e9   : > { %v2414_v57 = vsel %vm480_vm5, %v8801_v31, %v7206_v12  ;;  %v1949_v52 = vsel %vm480_vm5, %v8821_v2, %v7205_v5 }
 0x1ea   : > { %v7209_v1 = vpop.permute.xlu1 %7208  ;;  %v9259_v59 = vpop.permute.xlu0 %7188  ;;  %v1950_v0 = vsel %vm482_vm6, %v1949_v52, %v7135_v20 }
 0x1eb   : > { %v7211_v19 = vunpack.i.h.bf16 %v7209_v1  ;;  %v7210_v30 = vunpack.i.l.bf16 %v7209_v1  ;;  %v7191_v2 = vunpack.i.h.bf16 %v9259_v59 }
 0x1ee   : > { %v7214_v62 = vpop.permute.xlu1 %7213  ;;  %v7199_v27 = vpop.permute.xlu0 %7198 }
 0x1ef   : > { %v7201_v9 = vunpack.i.h.bf16 %v7199_v27  ;;  %v7200_v14 = vunpack.i.l.bf16 %v7199_v27  ;;  %v7216_v58 = vunpack.i.h.bf16 %v7214_v62  ;;  %v7215_v31 = vunpack.i.l.bf16 %v7214_v62 }
 0x1f1   : > { %v2421_v13 = vsel %vm480_vm5, %v8868_v45, %v7201_v9  ;;  %v1956_v38 = vsel %vm480_vm5, %v8882_v35, %v7200_v14  ;;  %v2191_v45 = vsel %vm480_vm5, %v8856_v28, %v7211_v19  ;;  %v1726_v35 = vsel %vm480_vm5, %v8837_v16, %v7210_v30 }
 0x1f2   : > { %v7219_v40 = vpop.permute.xlu1 %7218  ;;  %v7229_v56 = vpop.permute.xlu0 %7228  ;;  %v1957_v1 = vsel %vm482_vm6, %v1956_v38, %v7130_v37  ;;  %v2422_v27 = vsel %vm482_vm6, %v2421_v13, %v7131_v3  ;;  %v2415_v28 = vsel %vm482_vm6, %v2414_v57, %v7136_v54  ;;  %v7190_v30 = vunpack.i.l.bf16 %v9259_v59 }
 0x1f3   : > { %v7220_v9 = vunpack.i.l.bf16 %v7219_v40  ;;  %v7231_v12 = vunpack.i.h.bf16 %v7229_v56  ;;  %v7230_v34 = vunpack.i.l.bf16 %v7229_v56  ;;  %v7221_v5 = vunpack.i.h.bf16 %v7219_v40 }
 0x1f4   : > { %v1958_v37 = vsel %vm484_vm7, %v1957_v1, %v7215_v31  ;;  %v2423_v3 = vsel %vm484_vm7, %v2422_v27, %v7216_v58  ;;  %v1727_v56 = vsel %vm482_vm6, %v1726_v35, %v7140_v11  ;;  %v2192_v13 = vsel %vm482_vm6, %v2191_v45, %v7141_v15 }
 0x1f5   : > { %v1719_v62 = vsel %vm480_vm5, %v8894_v55, %v7220_v9  ;;  %v1728_v20 = vsel %vm484_vm7, %v1727_v56, %v7230_v34  ;;  %v2193_v54 = vsel %vm484_vm7, %v2192_v13, %v7231_v12  ;;  %v2184_v58 = vsel %vm480_vm5, %v8907_v41, %v7221_v5 }
 0x1f6   : > { %v7224_v14 = vpop.permute.xlu1 %7223  ;;  %v7234_v46 = vpop.permute.xlu0 %7233  ;;  %v1959_v52 = vsel %vm486_vm8, %v1958_v37, %v7145_v33  ;;  %v2424_v1 = vsel %vm486_vm8, %v2423_v3, %v7146_v61  ;;  %v1729_v34 = vsel %vm486_vm8, %v1728_v20, %v7160_v22  ;;  %v2194_v41 = vsel %vm486_vm8, %v2193_v54, %v7161_v48 }
 0x1f7   : > { %v7236_v19 = vunpack.i.h.bf16 %v7234_v46  ;;  %v7235_v16 = vunpack.i.l.bf16 %v7234_v46  ;;  %v7226_v46 = vunpack.i.h.bf16 %v7224_v14  ;;  %v7225_v57 = vunpack.i.l.bf16 %v7224_v14 }
 0x1f8   : > { %v1720_v61 = vsel %vm482_vm6, %v1719_v62, %v7150_v7  ;;  %v2185_v29 = vsel %vm482_vm6, %v2184_v58, %v7151_v53 }
 0x1f9   : > { %v1960_v11 = vsel %vm488_vm9, %v1959_v52, %v7235_v16  ;;  %v2425_v15 = vsel %vm488_vm9, %v2424_v1, %v7236_v19  ;;  %v1951_v14 = vsel %vm484_vm7, %v1950_v0, %v7225_v57  ;;  %v2416_v31 = vsel %vm484_vm7, %v2415_v28, %v7226_v46 }
 0x1fa   : > { %v7249_v40 = vpop.permute.xlu1 %7248  ;;  %v7239_v38 = vpop.permute.xlu0 %7238  ;;  %v1961_v48 = vsel %vm490_vm10, %v1960_v11, %v7165_v60  ;;  %v2426_v7 = vsel %vm490_vm10, %v2425_v15, %v7166_v42  ;;  %v1952_v53 = vsel %vm486_vm8, %v1951_v14, %v7155_v18  ;;  %v2417_v4 = vsel %vm486_vm8, %v2416_v31, %v7156_v44 }
 0x1fb   : > { %v7250_v55 = vunpack.i.l.bf16 %v7249_v40  ;;  %v7241_v45 = vunpack.i.h.bf16 %v7239_v38  ;;  %v7240_v35 = vunpack.i.l.bf16 %v7239_v38  ;;  %v7251_v27 = vunpack.i.h.bf16 %v7249_v40 }
 0x1fd   : > { %v1730_v19 = vsel %vm488_vm9, %v1729_v34, %v7250_v55  ;;  %v2186_v22 = vsel %vm484_vm7, %v2185_v29, %v7241_v45  ;;  %v1721_v0 = vsel %vm484_vm7, %v1720_v61, %v7240_v35  ;;  %v2195_v37 = vsel %vm488_vm9, %v2194_v41, %v7251_v27 }
 0x1fe   : > { %v7254_v33 = vpop.permute.xlu1 %7253  ;;  %v7244_v9 = vpop.permute.xlu0 %7243  ;;  %v1722_v38 = vsel %vm486_vm8, %v1721_v0, %v7170_v43  ;;  %v2187_v18 = vsel %vm486_vm8, %v2186_v22, %v7171_v39  ;;  %v1731_v21 = vsel %vm490_vm10, %v1730_v19, %v7180_v26  ;;  %v2196_v46 = vsel %vm490_vm10, %v2195_v37, %v7181_v51 }
 0x1ff   : > { %v7256_v12 = vunpack.i.h.bf16 %v7254_v33  ;;  %v7255_v5 = vunpack.i.l.bf16 %v7254_v33  ;;  %v7246_v28 = vunpack.i.h.bf16 %v7244_v9  ;;  %v7245_v16 = vunpack.i.l.bf16 %v7244_v9 }
 0x201   : > { %v1962_v24 = vsel %vm492_vm11, %v1961_v48, %v7255_v5  ;;  %v2427_v3 = vsel %vm492_vm11, %v2426_v7, %v7256_v12  ;;  %v1953_v44 = vsel %vm488_vm9, %v1952_v53, %v7245_v16  ;;  %v2418_v20 = vsel %vm488_vm9, %v2417_v4, %v7246_v28 }
 0x202   : > { %v7269_v60 = vpop.permute.xlu1 %7268  ;;  %v7259_v42 = vpop.permute.xlu0 %7258  ;;  %v2673_v43 = vrot.slane %v1962_v24, 4  ;;  %v2679_v57 = vrot.slane %v2427_v3, 4  ;;  %v2419_v51 = vsel %vm490_vm10, %v2418_v20, %v12334_v17  ;;  %v12336_v7 = vunpack.i.h.bf16 %v9257_v32 }
 0x203   : > { %v7271_v62 = vunpack.i.h.bf16 %v7269_v60  ;;  %v7270_v56 = vunpack.i.l.bf16 %v7269_v60  ;;  %v7260_v13 = vunpack.i.l.bf16 %v7259_v42  ;;  %v7261_v40 = vunpack.i.h.bf16 %v7259_v42 }
 0x204   : > { %v7196_v16 = vunpack.i.h.bf16 %v9253_v63  ;;  %v12337_v42 = vunpack.i.l.bf16 %v9253_v63 }
 0x205   : > { %v2644_v54 = vsel %vm480_vm5, %v8951_v23, %v7270_v56  ;;  %v2651_v50 = vsel %vm480_vm5, %v8948_v8, %v7271_v62  ;;  %v1723_v39 = vsel %vm488_vm9, %v1722_v38, %v7260_v13  ;;  %v2188_v15 = vsel %vm488_vm9, %v2187_v18, %v7261_v40 }
 0x206   : > { %v7274_v58 = vpop.permute.xlu1 %7273  ;;  %v7264_v26 = vpop.permute.xlu0 %7263  ;;  %v1954_v23 = vsel %vm490_vm10, %v1953_v44, %v7175_v6  ;;  %v2645_v8 = vsel %vm482_vm6, %v2644_v54, %v7190_v30  ;;  %v2652_v47 = vsel %vm482_vm6, %v2651_v50, %v7191_v2  ;;  %v12335_v30 = vunpack.i.l.bf16 %v9257_v32 }
 0x207   : > { %v7276_v52 = vunpack.i.h.bf16 %v7274_v58  ;;  %v7275_v1 = vunpack.i.l.bf16 %v7274_v58  ;;  %v7266_v55 = vunpack.i.h.bf16 %v7264_v26  ;;  %v7265_v11 = vunpack.i.l.bf16 %v7264_v26  ;;  %v592_v58 = vld [vmem:[%s12050_s1] sm:$0x3] }
 0x208   : > { %v1724_v9 = vsel %vm490_vm10, %v1723_v39, %v12335_v30  ;;  %v2189_v59 = vsel %vm490_vm10, %v2188_v15, %v12336_v7  ;;  %v12338_v26 = vmov 0  }
 0x209   : > { %v1955_v45 = vsel %vm492_vm11, %v1954_v23, %v7265_v11  ;;  %v2420_v35 = vsel %vm492_vm11, %v2419_v51, %v7266_v55  ;;  %v1732_v27 = vsel %vm492_vm11, %v1731_v21, %v7275_v1  ;;  %v2197_v34 = vsel %vm492_vm11, %v2196_v46, %v7276_v52 }
 0x20a   : > { %v7279_v41 = vpop.permute.xlu1 %7278  ;;  %v7289_v61 = vpop.permute.xlu0 %7288  ;;  %v2688_v6 = vsel %vm2682_vm12, %v1732_v27, %v2673_v43  ;;  %v2690_v33 = vsel %vm2682_vm12, %v2197_v34, %v2679_v57  ;;  %v2672_v19 = vrot.slane %v1955_v45, 4  ;;  %v2678_v29 = vrot.slane %v2420_v35, 4 }
 0x20b   : > { %v7281_v14 = vunpack.i.h.bf16 %v7279_v41  ;;  %v7280_v31 = vunpack.i.l.bf16 %v7279_v41  ;;  %v7291_v12 = vunpack.i.h.bf16 %v7289_v61  ;;  %v7290_v5 = vunpack.i.l.bf16 %v7289_v61 }
 0x20c   : > { %v2694_v48 = vpack.c.bf16 %v2690_v33, %v2688_v6 }
 0x20d   : > { %v2646_v2 = vsel %vm484_vm7, %v2645_v8, %v7290_v5  ;;  %v2653_v22 = vsel %vm484_vm7, %v2652_v47, %v7291_v12  ;;  %v1725_v0 = vsel %vm492_vm11, %v1724_v9, %v7280_v31  ;;  %v2190_v28 = vsel %vm492_vm11, %v2189_v59, %v7281_v14 }
 0x20e   : > { %2715 = vmatprep.subr.bf16.mxu0 %v2694_v48  ;;  %v7284_v37 = vpop.permute.xlu1 %7283  ;;  %v7294_v24 = vpop.permute.xlu0 %7293  ;;  %v2687_v53 = vsel %vm2682_vm12, %v1725_v0, %v2672_v19  ;;  %v2689_v4 = vsel %vm2682_vm12, %v2190_v28, %v2678_v29  ;;  %v2647_v3 = vsel %vm486_vm8, %v2646_v2, %v12337_v42  ;;  %v2654_v13 = vsel %vm486_vm8, %v2653_v22, %v7196_v16 }
 0x20f   : > { %v7296_v32 = vunpack.i.h.bf16 %v7294_v24  ;;  %v7295_v60 = vunpack.i.l.bf16 %v7294_v24  ;;  %v7286_v62 = vunpack.i.h.bf16 %v7284_v37  ;;  %v7285_v56 = vunpack.i.l.bf16 %v7284_v37 }
 0x210   : > { %v2693_v40 = vpack.c.bf16 %v2689_v4, %v2687_v53 }
 0x211   : > { %v2648_v38 = vsel %vm488_vm9, %v2647_v3, %v7295_v60  ;;  %v2655_v18 = vsel %vm488_vm9, %v2654_v13, %v7296_v32 }
 0x212   : > { %2716 = vmatpush1.bf16.msra.mxu0 %v2693_v40  ;;  %v7299_v21 = vpop.permute.xlu0 %7298  ;;  %v2656_v54 = vsel %vm490_vm10, %v2655_v18, %v7286_v62  ;;  %v2649_v46 = vsel %vm490_vm10, %v2648_v38, %v7285_v56 }
 0x213   : > { %v7301_v44 = vunpack.i.h.bf16 %v7299_v21  ;;  %v7300_v20 = vunpack.i.l.bf16 %v7299_v21 }
 0x215   : > { %v2657_v63 = vsel %vm492_vm11, %v2656_v54, %v7301_v44  ;;  %v2650_v43 = vsel %vm492_vm11, %v2649_v46, %v7300_v20 }
 0x216   : > { %v2696_v57 = vpack.c.bf16 %v2657_v63, %v2657_v63  ;;  %v2695_v50 = vpack.c.bf16 %v2650_v43, %v2650_v43  ;;  %v426_v52 = vpop.permute.xlu0 %425 }
 0x217   : > { %v481_v51 = vsel %vm480_vm5, %v9021_v49, %v426_v52 }
 0x218   : > { %6955 = vmatprep.subr.msk.bf16.mxu0 %vm2706_vm13, %v2696_v57  ;;  %v2708_v39 = vsel %vm2706_vm13, %v2695_v50, 0 }
 0x219   : > { %2718 = vmatpush1.bf16.msra.mxu0 %v2708_v39 }
 0x21a   : > { %v430_v55 = vpop.permute.xlu0 %429 }
 0x21b   : > { %v483_v45 = vsel %vm482_vm6, %v481_v51, %v430_v55 }
 0x21c   : > { %6956 = vmatmul.mubr.msk.bf16.vlgmr.msra.gmra.mrb[0].mxu0 %vm2702_vm14, %v592_v58 }
 0x21d   : > { %6876 = vmatprep.mubr.bf16.mxu0 %v12338_v26 }
 0x21e   : > { %v434_v15 = vpop.permute.xlu0 %433 }
 0x21f   : > { %v2700_v1 = vpop.permute.xlu1 %2699  ;;  %v485_v27 = vsel %vm484_vm7, %v483_v45, %v434_v15 }
 0x222   : > { %v438_v17 = vpop.permute.xlu0 %437 }
 0x223   : > { %v454_v11 = vpop.permute.xlu1 %453  ;;  %v487_v41 = vsel %vm486_vm8, %v485_v27, %v438_v17 }
 0x224   : > { %v494_v47 = vsel %vm480_vm5, %v9030_v25, %v454_v11 }
 0x226   : > { %v442_v35 = vpop.permute.xlu0 %441 }
 0x227   : > { %v458_v23 = vpop.permute.xlu1 %457  ;;  %v489_v6 = vsel %vm488_vm9, %v487_v41, %v442_v35 }
 0x228   : > { %v495_v30 = vsel %vm482_vm6, %v494_v47, %v458_v23 }
 0x22a   : > { %v446_v61 = vpop.permute.xlu0 %445 }
 0x22b   : > { %v462_v8 = vpop.permute.xlu1 %461  ;;  %v491_v12 = vsel %vm490_vm10, %v489_v6, %v446_v61 }
 0x22c   : > { %v496_v48 = vsel %vm484_vm7, %v495_v30, %v462_v8 }
 0x22e   : > { %v450_v5 = vpop.permute.xlu0 %449 }
 0x22f   : > { %v466_v34 = vpop.permute.xlu1 %465  ;;  %v493_v59 = vsel %vm492_vm11, %v491_v12, %v450_v5 }
 0x230   : > { %v497_v25 = vsel %vm486_vm8, %v496_v48, %v466_v34 }
 0x233   : > { %v470_v9 = vpop.permute.xlu1 %469 }
 0x234   : > { %v498_v28 = vsel %vm488_vm9, %v497_v25, %v470_v9 }
 0x237   : > { %v474_v0 = vpop.permute.xlu1 %473 }
 0x238   : > { %v499_v37 = vsel %vm490_vm10, %v498_v28, %v474_v0 }
 0x23b   : > { %v478_v24 = vpop.permute.xlu1 %477 }
 0x23c   : > { %v500_v4 = vsel %vm492_vm11, %v499_v37, %v478_v24 }
 0x2ef   : > { %v2747_v33 = vpop.f32.mrb[0].mxu0 }
 0x2f0   : > { %v2748_v49 = vadd.f32 %v2747_v33, %v2700_v1  ;;  %v2749_v14 = vpop.f32.mrb[1].mxu0 }
 0x2f1   : > { %v2751_v31 = vpop.f32.mrb[2].mxu0  ;;  %v2750_v22 = vadd.f32 %v2749_v14, %v2700_v1 }
 0x2f2   : > { %v2754_v19 = vmax.f32 %v2748_v49, 0.0  ;;  %v2752_v29 = vpop.f32.mrb[3].mxu0 }
 0x2f3   : > { %v2755_v16 = vmax.f32 %v2750_v22, 0.0 }
 0x2f4   : > { %v2758_v7 = vrot.slane %v2754_v19, 4 }
 0x2f5   : > { %v2759_v53 = vrot.slane %v2755_v16, 4 }
 0x2f6   : > { %v9429_v2 = vsel %vm2682_vm12, %v493_v59, %v2758_v7 }
 0x2f7   : > { %12339 = vst [vmem:[#allocation13_spill] sm:$0xff] %v9429_v2  ;;  %2768 = vrot.lane.b32.xlu1 %v9429_v2, %s7635_s12  ;;  %2765 = vrot.lane.b32.xlu0 %v9429_v2, %s7640_s16  ;;  %v9447_v32 = vsel %vm2682_vm12, %v500_v4, %v2759_v53 }
 0x2f8   : > { %12340 = vst [vmem:[#allocation14_spill] sm:$0xff] %v9447_v32 }
 0x2fb   : > { %2774 = vrot.lane.b32.xlu1 %v9429_v2, %s7634_s11  ;;  %2771 = vrot.lane.b32.xlu0 %v9429_v2, %s7639_s15 }
 0x2ff   : > { %2780 = vrot.lane.b32.xlu1 %v9429_v2, %s7633_s10  ;;  %2777 = vrot.lane.b32.xlu0 %v9429_v2, %s7638_s14 }
 0x303   : > { %2787 = vrot.lane.b32.xlu1 %v9447_v32, %s7640_s16  ;;  %2783 = vrot.lane.b32.xlu0 %v9429_v2, %s7637_s13 }
 0x307   : > { %2793 = vrot.lane.b32.xlu1 %v9447_v32, %s7639_s15  ;;  %2790 = vrot.lane.b32.xlu0 %v9447_v32, %s7635_s12 }
 0x30b   : > { %2799 = vrot.lane.b32.xlu1 %v9447_v32, %s7638_s14  ;;  %2796 = vrot.lane.b32.xlu0 %v9447_v32, %s7634_s11 }
 0x30f   : > { %2805 = vrot.lane.b32.xlu1 %v9447_v32, %s7637_s13  ;;  %2802 = vrot.lane.b32.xlu0 %v9447_v32, %s7633_s10 }
 0x369   : > { %v2769_v60 = vpop.permute.xlu1 %2768  ;;  %v2766_v42 = vpop.permute.xlu0 %2765 }
 0x36a   : > { %v2808_v38 = vcombine.low %v9429_v2, %v2769_v60  ;;  %v2809_v41 = vcombine.high %v9429_v2, %v2769_v60 }
 0x36c   : > { %v2816_v54 = vrot.slane %v2808_v38, %v7701_v10  ;;  %v2823_v48 = vrot.slane %v2809_v41, %v7701_v10 }
 0x36d   : > { %v2775_v3 = vpop.permute.xlu1 %2774  ;;  %v2772_v62 = vpop.permute.xlu0 %2771 }
 0x36e   : > { %v2824_v56 = vcombine.low %v2766_v42, %v2772_v62  ;;  %v2825_v8 = vcombine.high %v2766_v42, %v2772_v62 }
 0x370   : > { %v2832_v18 = vrot.slane %v2824_v56, %v7701_v10  ;;  %v2839_v14 = vrot.slane %v2825_v8, %v7701_v10 }
 0x371   : > { %v2781_v13 = vpop.permute.xlu1 %2780  ;;  %v2778_v40 = vpop.permute.xlu0 %2777 }
 0x372   : > { %v2840_v21 = vcombine.low %v2775_v3, %v2781_v13  ;;  %v2872_v63 = vcombine.low %v2816_v54, %v2832_v18  ;;  %v2841_v45 = vcombine.high %v2775_v3, %v2781_v13  ;;  %v2873_v35 = vcombine.high %v2816_v54, %v2832_v18 }
 0x373   : > { %v2888_v22 = vcombine.low %v2823_v48, %v2839_v14  ;;  %v2889_v54 = vcombine.high %v2823_v48, %v2839_v14 }
 0x374   : > { %v2848_v43 = vrot.slane %v2840_v21, %v7701_v10  ;;  %v2880_v1 = vrot.slane %v2872_v63, %v8090_v36  ;;  %v2855_v31 = vrot.slane %v2841_v45, %v7701_v10  ;;  %v2887_v29 = vrot.slane %v2873_v35, %v8090_v36 }
 0x375   : > { %v9467_v44 = vpop.permute.xlu1 %2787  ;;  %v2784_v20 = vpop.permute.xlu0 %2783  ;;  %v2896_v42 = vrot.slane %v2888_v22, %v8090_v36 }
 0x376   : > { %v2856_v46 = vcombine.low %v2778_v40, %v2784_v20  ;;  %v2857_v11 = vcombine.high %v2778_v40, %v2784_v20 }
 0x378   : > { %v2864_v57 = vrot.slane %v2856_v46, %v7701_v10  ;;  %v2871_v61 = vrot.slane %v2857_v11, %v7701_v10 }
 0x379   : > { %v2794_v50 = vpop.permute.xlu1 %2793  ;;  %v2791_v39 = vpop.permute.xlu0 %2790 }
 0x37a   : > { %v2904_v58 = vcombine.low %v2848_v43, %v2864_v57  ;;  %v2960_v26 = vcombine.low %v9467_v44, %v2794_v50  ;;  %v2944_v52 = vcombine.low %v9447_v32, %v2791_v39  ;;  %v2905_v17 = vcombine.high %v2848_v43, %v2864_v57 }
 0x37b   : > { %v2920_v7 = vcombine.low %v2855_v31, %v2871_v61  ;;  %v2961_v3 = vcombine.high %v9467_v44, %v2794_v50  ;;  %v2945_v62 = vcombine.high %v9447_v32, %v2791_v39  ;;  %v2921_v13 = vcombine.high %v2855_v31, %v2871_v61 }
 0x37c   : > { %v2912_v55 = vrot.slane %v2904_v58, %v8090_v36  ;;  %v2968_v27 = vrot.slane %v2960_v26, %v7701_v10  ;;  %v2952_v34 = vrot.slane %v2944_v52, %v7701_v10  ;;  %v2919_v49 = vrot.slane %v2905_v17, %v8090_v36 }
 0x37d   : > { %v2800_v15 = vpop.permute.xlu1 %2799  ;;  %v2797_v23 = vpop.permute.xlu0 %2796  ;;  %v2928_v37 = vrot.slane %v2920_v7, %v8090_v36  ;;  %v2975_v46 = vrot.slane %v2961_v3, %v7701_v10  ;;  %v2959_v44 = vrot.slane %v2945_v62, %v7701_v10  ;;  %v2935_v39 = vrot.slane %v2921_v13, %v8090_v36 }
 0x37e   : > { %v2936_v51 = vcombine.low %v2880_v1, %v2912_v55  ;;  %v2937_v9 = vcombine.high %v2880_v1, %v2912_v55  ;;  %v3008_v12 = vcombine.low %v2952_v34, %v2968_v27  ;;  %v2938_v25 = vcombine.low %v2887_v29, %v2919_v49 }
 0x37f   : > { %v2939_v16 = vcombine.high %v2887_v29, %v2919_v49  ;;  %v3009_v56 = vcombine.high %v2952_v34, %v2968_v27  ;;  %v2940_v40 = vcombine.low %v2896_v42, %v2928_v37  ;;  %v2941_v57 = vcombine.high %v2896_v42, %v2928_v37 }
 0x380   : > { %3096 = vrot.lane.b32.xlu0 %v2936_v51, %s7629_s30  ;;  %v3016_v0 = vrot.slane %v3008_v12, %v8090_v36  ;;  %v3024_v58 = vcombine.low %v2959_v44, %v2975_v46  ;;  %v2903_v26 = vrot.slane %v2889_v54, %v8090_v36  ;;  %v3025_v51 = vcombine.high %v2959_v44, %v2975_v46 }
 0x381   : > { %v2806_v47 = vpop.permute.xlu1 %2805  ;;  %v2803_v6 = vpop.permute.xlu0 %2802  ;;  %v3023_v63 = vrot.slane %v3009_v56, %v8090_v36 }
 0x382   : > { %v2992_v33 = vcombine.low %v2800_v15, %v2806_v47  ;;  %v2976_v30 = vcombine.low %v2797_v23, %v2803_v6  ;;  %v2993_v24 = vcombine.high %v2800_v15, %v2806_v47  ;;  %v2977_v53 = vcombine.high %v2797_v23, %v2803_v6 }
 0x383   : > { %v2942_v52 = vcombine.low %v2903_v26, %v2935_v39  ;;  %v3032_v11 = vrot.slane %v3024_v58, %v8090_v36  ;;  %v2943_v23 = vcombine.high %v2903_v26, %v2935_v39  ;;  %v3039_v35 = vrot.slane %v3025_v51, %v8090_v36 }
 0x384   : > { %v3000_v5 = vrot.slane %v2992_v33, %v7701_v10  ;;  %v2984_v19 = vrot.slane %v2976_v30, %v7701_v10  ;;  %3100 = vrot.lane.b32.xlu0 %v2937_v9, %s7629_s30  ;;  %v3007_v38 = vrot.slane %v2993_v24, %v7701_v10  ;;  %v2991_v18 = vrot.slane %v2977_v53, %v7701_v10 }
 0x386   : > { %v3040_v59 = vcombine.low %v2984_v19, %v3000_v5  ;;  %v3041_v4 = vcombine.high %v2984_v19, %v3000_v5  ;;  %v3056_v43 = vcombine.low %v2991_v18, %v3007_v38  ;;  %v3057_v15 = vcombine.high %v2991_v18, %v3007_v38 }
 0x388   : > { %3104 = vrot.lane.b32.xlu0 %v2938_v25, %s7629_s30  ;;  %v3048_v28 = vrot.slane %v3040_v59, %v8090_v36  ;;  %v3055_v20 = vrot.slane %v3041_v4, %v8090_v36  ;;  %v3064_v55 = vrot.slane %v3056_v43, %v8090_v36  ;;  %v3071_v45 = vrot.slane %v3057_v15, %v8090_v36 }
 0x38a   : > { %v3072_v60 = vcombine.low %v3016_v0, %v3048_v28  ;;  %v3073_v21 = vcombine.high %v3016_v0, %v3048_v28  ;;  %v3074_v50 = vcombine.low %v3023_v63, %v3055_v20  ;;  %v3075_v1 = vcombine.high %v3023_v63, %v3055_v20 }
 0x38b   : > { %v3076_v17 = vcombine.low %v3032_v11, %v3064_v55  ;;  %v3077_v8 = vcombine.high %v3032_v11, %v3064_v55  ;;  %v3078_v27 = vcombine.low %v3039_v35, %v3071_v45  ;;  %v3079_v34 = vcombine.high %v3039_v35, %v3071_v45 }
 0x38c   : > { %3108 = vrot.lane.b32.xlu0 %v2939_v16, %s7629_s30  ;;  %3098 = vrot.lane.b32.xlu1 %v3072_v60, %s7629_s30 }
 0x390   : > { %3112 = vrot.lane.b32.xlu0 %v2940_v40, %s7629_s30  ;;  %3102 = vrot.lane.b32.xlu1 %v3073_v21, %s7629_s30 }
 0x394   : > { %3116 = vrot.lane.b32.xlu0 %v2941_v57, %s7629_s30  ;;  %3106 = vrot.lane.b32.xlu1 %v3074_v50, %s7629_s30 }
 0x398   : > { %3120 = vrot.lane.b32.xlu0 %v2942_v52, %s7629_s30  ;;  %3110 = vrot.lane.b32.xlu1 %v3075_v1, %s7629_s30 }
 0x39c   : > { %3124 = vrot.lane.b32.xlu0 %v2943_v23, %s7629_s30  ;;  %3114 = vrot.lane.b32.xlu1 %v3076_v17, %s7629_s30 }
 0x3a0   : > { %3118 = vrot.lane.b32.xlu1 %v3077_v8, %s7629_s30 }
 0x3a4   : > { %3122 = vrot.lane.b32.xlu1 %v3078_v27, %s7629_s30 }
 0x3a8   : > { %3126 = vrot.lane.b32.xlu1 %v3079_v34, %s7629_s30 }
 0x3f2   : > { %v3097_v41 = vpop.permute.xlu0 %3096 }
 0x3f3   : > { %v3144_v61 = vsel %vm533_vm0, 0.0, %v3097_v41 }
 0x3f4   : > { %v3160_v47 = vsel %vm542_vm1, %v3144_v61, 0.0 }
 0x3f5   : > { %v3192_v6 = vrot.slane %v3160_v47, 7 }
 0x3f6   : > { %v3101_v33 = vpop.permute.xlu0 %3100 }
 0x3f7   : > { %v9524_v30 = vsel %vm559_vm2, 0.0, %v3192_v6  ;;  %v3146_v9 = vsel %vm533_vm0, 0.0, %v3101_v33 }
 0x3f8   : > { %v3162_v49 = vsel %vm542_vm1, %v3146_v9, 0.0  ;;  %3608 = vrot.lane.b32.xlu0 %v9524_v30, %s7630_s8 }
 0x3f9   : > { %v3195_v14 = vrot.slane %v3162_v49, 7 }
 0x3fa   : > { %v3105_v31 = vpop.permute.xlu0 %3104 }
 0x3fb   : > { %v9531_v12 = vsel %vm559_vm2, 0.0, %v3195_v14  ;;  %v3148_v5 = vsel %vm533_vm0, 0.0, %v3105_v31 }
 0x3fc   : > { %v3164_v19 = vsel %vm542_vm1, %v3148_v5, 0.0  ;;  %3612 = vrot.lane.b32.xlu1 %v9531_v12, %s7630_s8 }
 0x3fd   : > { %v3198_v29 = vrot.slane %v3164_v19, 7 }
 0x3fe   : > { %v3099_v48 = vpop.permute.xlu1 %3098  ;;  %v3109_v7 = vpop.permute.xlu0 %3108 }
 0x3ff   : > { %v9538_v59 = vsel %vm559_vm2, 0.0, %v3198_v29  ;;  %v3150_v25 = vsel %vm533_vm0, 0.0, %v3109_v7  ;;  %v3145_v16 = vsel %vm533_vm0, 0.0, %v3099_v48 }
 0x400   : > { %v3258_v22 = vcombine.low %v9524_v30, %v9538_v59  ;;  %v3259_v0 = vcombine.high %v9524_v30, %v9538_v59  ;;  %v3166_v28 = vsel %vm542_vm1, %v3150_v25, 0.0  ;;  %3616 = vrot.lane.b32.xlu0 %v9538_v59, %s7630_s8  ;;  %v9553_v60 = vsel %vm542_vm1, %v3145_v16, 0.0 }
 0x401   : > { %v3201_v37 = vrot.slane %v3166_v28, 7  ;;  %v3193_v18 = vrot.slane %v9553_v60, 7  ;;  %v4406_v31 = vrot.slane %v9538_v59, 1 }
 0x402   : > { %v3103_v24 = vpop.permute.xlu1 %3102  ;;  %v3113_v53 = vpop.permute.xlu0 %3112 }
 0x403   : > { %v9550_v4 = vsel %vm559_vm2, 0.0, %v3201_v37  ;;  %v3152_v62 = vsel %vm533_vm0, 0.0, %v3113_v53  ;;  %v3147_v56 = vsel %vm533_vm0, 0.0, %v3103_v24  ;;  %v9586_v26 = vsel %vm559_vm2, %v3192_v6, %v3193_v18 }
 0x404   : > { %3620 = vrot.lane.b32.xlu1 %v9550_v4, %s7630_s8  ;;  %v3168_v13 = vsel %vm542_vm1, %v3152_v62, 0.0  ;;  %v9574_v63 = vsel %vm542_vm1, %v3147_v56, 0.0  ;;  %v4401_v24 = vrot.slane %v9531_v12, 1 }
 0x405   : > { %v3204_v21 = vrot.slane %v3168_v13, 7  ;;  %v3196_v11 = vrot.slane %v9574_v63, 7 }
 0x406   : > { %v3107_v40 = vpop.permute.xlu1 %3106  ;;  %v3117_v38 = vpop.permute.xlu0 %3116 }
 0x407   : > { %v3149_v20 = vsel %vm533_vm0, 0.0, %v3107_v40  ;;  %v3154_v54 = vsel %vm533_vm0, 0.0, %v3117_v38  ;;  %v9577_v43 = vsel %vm559_vm2, 0.0, %v3204_v21  ;;  %v9614_v61 = vsel %vm559_vm2, %v3195_v14, %v3196_v11 }
 0x408   : > { %v9568_v46 = vsel %vm542_vm1, %v3149_v20, 0.0  ;;  %v9571_v44 = vsel %vm542_vm1, %v3154_v54, 0.0  ;;  %3624 = vrot.lane.b32.xlu0 %v9577_v43, %s7630_s8  ;;  %v5580_v60 = vrot.slane %v9614_v61, 2 }
 0x409   : > { %v3199_v57 = vrot.slane %v9568_v46, 7  ;;  %v3207_v50 = vrot.slane %v9571_v44, 7  ;;  %v5575_v46 = vrot.slane %v9586_v26, 2 }
 0x40a   : > { %v3111_v39 = vpop.permute.xlu1 %3110  ;;  %v3121_v58 = vpop.permute.xlu0 %3120 }
 0x40b   : > { %v9591_v52 = vsel %vm559_vm2, %v3198_v29, %v3199_v57  ;;  %v3151_v1 = vsel %vm533_vm0, 0.0, %v3111_v39  ;;  %v3156_v55 = vsel %vm533_vm0, 0.0, %v3121_v58  ;;  %v9601_v17 = vsel %vm559_vm2, 0.0, %v3207_v50 }
 0x40c   : > { %v9604_v51 = vsel %vm542_vm1, %v3151_v1, 0.0  ;;  %v3172_v8 = vsel %vm542_vm1, %v3156_v55, 0.0  ;;  %3628 = vrot.lane.b32.xlu1 %v9601_v17, %s7630_s8  ;;  %v5585_v23 = vrot.slane %v9591_v52, 2 }
 0x40d   : > { %v3202_v45 = vrot.slane %v9604_v51, 7  ;;  %v3210_v35 = vrot.slane %v3172_v8, 7 }
 0x40e   : > { %v3115_v27 = vpop.permute.xlu1 %3114  ;;  %v3125_v34 = vpop.permute.xlu0 %3124 }
 0x40f   : > { %v3158_v41 = vsel %vm533_vm0, 0.0, %v3125_v34  ;;  %v9619_v47 = vsel %vm559_vm2, %v3201_v37, %v3202_v45  ;;  %v9622_v6 = vsel %vm559_vm2, 0.0, %v3210_v35  ;;  %v3153_v33 = vsel %vm533_vm0, 0.0, %v3115_v27 }
 0x410   : > { %3632 = vrot.lane.b32.xlu0 %v9622_v6, %s7630_s8  ;;  %v3174_v5 = vsel %vm542_vm1, %v3158_v41, 0.0  ;;  %v3169_v29 = vsel %vm542_vm1, %v3153_v33, 0.0 }
 0x411   : > { %v3213_v48 = vrot.slane %v3174_v5, 7  ;;  %v3205_v16 = vrot.slane %v3169_v29, 7 }
 0x412   : > { %v3119_v19 = vpop.permute.xlu1 %3118 }
 0x413   : > { %v3155_v7 = vsel %vm533_vm0, 0.0, %v3119_v19  ;;  %v9639_v25 = vsel %vm559_vm2, 0.0, %v3213_v48  ;;  %v9655_v38 = vsel %vm559_vm2, %v3204_v21, %v3205_v16  ;;  %v9658_v20 = vsel %vm559_vm2, %v3205_v16, 0.0 }
 0x414   : > { %v3171_v28 = vsel %vm542_vm1, %v3155_v7, 0.0  ;;  %3998 = vrot.lane.b32.xlu0 %v9524_v30, %s7631_s9  ;;  %3636 = vrot.lane.b32.xlu1 %v9639_v25, %s7630_s8  ;;  %v4419_v27 = vrot.slane %v9658_v20, 1  ;;  %v12092_v41 = vrot.slane %v9655_v38, 1  ;;  %v9691_v19 = vsel %vm559_vm2, %v3193_v18, 0.0 }
 0x415   : > { %v3208_v56 = vrot.slane %v3171_v28, 7  ;;  %v5597_v55 = vrot.slane %v9658_v20, 2  ;;  %v5590_v21 = vrot.slane %v9619_v47, 2  ;;  %v4399_v42 = vrot.slane %v9691_v19, 1 }
 0x416   : > { %v3123_v53 = vpop.permute.xlu1 %3122 }
 0x417   : > { %v3157_v62 = vsel %vm533_vm0, 0.0, %v3123_v53  ;;  %v9670_v1 = vsel %vm559_vm2, %v3208_v56, 0.0 }
 0x418   : > { %v3173_v13 = vsel %vm542_vm1, %v3157_v62, 0.0  ;;  %4006 = vrot.lane.b32.xlu0 %v9538_v59, %s7631_s9  ;;  %4002 = vrot.lane.b32.xlu1 %v9531_v12, %s7631_s9 }
 0x419   : > { %v3211_v40 = vrot.slane %v3173_v13, 7 }
 0x41a   : > { %v3127_v54 = vpop.permute.xlu1 %3126 }
 0x41b   : > { %v9663_v44 = vsel %vm559_vm2, %v3210_v35, %v3211_v40  ;;  %v9666_v39 = vsel %vm559_vm2, %v3211_v40, 0.0  ;;  %v3159_v58 = vsel %vm533_vm0, 0.0, %v3127_v54  ;;  %v9679_v35 = vsel %vm559_vm2, %v3207_v50, %v3208_v56 }
 0x41c   : > { %v4429_v8 = vrot.slane %v9666_v39, 1  ;;  %v3175_v34 = vsel %vm542_vm1, %v3159_v58, 0.0  ;;  %4014 = vrot.lane.b32.xlu0 %v9577_v43, %s7631_s9  ;;  %4010 = vrot.lane.b32.xlu1 %v9550_v4, %s7631_s9  ;;  %v12094_v5 = vrot.slane %v9663_v44, 1  ;;  %v4424_v50 = vrot.slane %v9670_v1, 1 }
 0x41d   : > { %v3214_v33 = vrot.slane %v3175_v34, 7  ;;  %v12093_v16 = vrot.slane %v9679_v35, 1  ;;  %v9728_v40 = vsel %vm559_vm2, %v3196_v11, 0.0  ;;  %v9733_v54 = vsel %vm559_vm2, %v3199_v57, 0.0 }
 0x41e   : > { %v9703_v28 = vsel %vm1268_vm3, %v12094_v5, %v4429_v8  ;;  %v9738_v58 = vsel %vm559_vm2, %v3202_v45, 0.0  ;;  %v5577_v8 = vrot.slane %v9691_v19, 2  ;;  %v5582_v51 = vrot.slane %v9728_v40, 2 }
 0x41f   : > { %v9695_v29 = vsel %vm559_vm2, %v3213_v48, %v3214_v33  ;;  %v9698_v7 = vsel %vm559_vm2, %v3214_v33, 0.0  ;;  %v9716_v48 = vsel %vm1268_vm3, %v12092_v41, %v4419_v27  ;;  %v9744_v27 = vsel %vm1268_vm3, %v12093_v16, %v4424_v50 }
 0x420   : > { %v4434_v53 = vrot.slane %v9698_v7, 1  ;;  %4022 = vrot.lane.b32.xlu0 %v9622_v6, %s7631_s9  ;;  %4018 = vrot.lane.b32.xlu1 %v9601_v17, %s7631_s9  ;;  %v4620_v62 = vcombine.low %v9716_v48, %v9703_v28  ;;  %v4621_v56 = vcombine.high %v9716_v48, %v9703_v28  ;;  %v12095_v13 = vrot.slane %v9695_v29, 1 }
 0x421   : > { %v5587_v45 = vrot.slane %v9733_v54, 2  ;;  %v5592_v34 = vrot.slane %v9738_v58, 2  ;;  %v9777_v49 = vsel %vm1963_vm4, %v5575_v46, %v5577_v8  ;;  %v5600_v9 = vrot.slane %v9679_v35, 2 }
 0x422   : > { %v9749_v63 = vsel %vm1268_vm3, %v12095_v13, %v4434_v53  ;;  %v9764_v33 = vrot.slane %v4620_v62, %v7701_v10  ;;  %v9767_v50 = vrot.slane %v4621_v56, %v7701_v10  ;;  %v5595_v62 = vrot.slane %v9655_v38, 2 }
 0x423   : > { %12341 = vst [vmem:[#allocation10_spill] sm:$0xff] %v9749_v63  ;;  %v4636_v57 = vcombine.low %v9744_v27, %v9749_v63  ;;  %v4637_v11 = vcombine.high %v9744_v27, %v9749_v63  ;;  %v9794_v8 = vsel %vm1963_vm4, %v5585_v23, %v5587_v45  ;;  %v5602_v56 = vrot.slane %v9670_v1, 2 }
 0x424   : > { %3610 = vrot.lane.b32.xlu0 %v9586_v26, %s7630_s8  ;;  %4026 = vrot.lane.b32.xlu1 %v9639_v25, %s7631_s9  ;;  %12342 = vst [vmem:[#allocation11_spill] sm:$0xff] %v9764_v33  ;;  %12343 = vst [vmem:[#allocation12_spill] sm:$0xff] %v9767_v50  ;;  %v9806_v20 = vsel %vm1963_vm4, %v5595_v62, %v5597_v55  ;;  %v9809_v45 = vsel %vm1963_vm4, %v5590_v21, %v5592_v34  ;;  %v5612_v15 = vrot.slane %v9698_v7, 2 }
 0x425   : > { %v9770_v53 = vrot.slane %v4636_v57, %v7701_v10  ;;  %v9773_v18 = vrot.slane %v4637_v11, %v7701_v10  ;;  %v9797_v11 = vsel %vm1963_vm4, %v5580_v60, %v5582_v51  ;;  %v5607_v57 = vrot.slane %v9666_v39, 2 }
 0x426   : > { %v5605_v51 = vrot.slane %v9663_v44, 2  ;;  %v5574_v39 = vrot.slane %v9524_v30, 2  ;;  %v5584_v1 = vrot.slane %v9538_v59, 2  ;;  %v5579_v41 = vrot.slane %v9531_v12, 2 }
 0x427   : > { %12344 = vst [vmem:[#allocation4_spill] sm:$0xff] %v9770_v53  ;;  %12345 = vst [vmem:[#allocation8_spill] sm:$0xff] %v9773_v18  ;;  %v9823_v34 = vsel %vm1963_vm4, %v5600_v9, %v5602_v56  ;;  %v5610_v7 = vrot.slane %v9695_v29, 2  ;;  %v4397_v16 = vrot.slane %v9586_v26, 1  ;;  %v4407_v19 = vrot.slane %v9591_v52, 1 }
 0x428   : > { %3618 = vrot.lane.b32.xlu0 %v9591_v52, %s7630_s8  ;;  %3614 = vrot.lane.b32.xlu1 %v9614_v61, %s7630_s8  ;;  %v9820_v55 = vsel %vm1963_vm4, %v5605_v51, %v5607_v57  ;;  %v9826_v37 = vsel %vm1963_vm4, %v5574_v39, %v5575_v46  ;;  %v9837_v57 = vsel %vm1963_vm4, %v5584_v1, %v5585_v23  ;;  %v5594_v46 = vrot.slane %v9577_v43, 2 }
 0x429   : > { %v9834_v14 = vsel %vm1963_vm4, %v5610_v7, %v5612_v15  ;;  %12346 = vst [vmem:[#allocation2_spill] sm:$0xff] %v9837_v57  ;;  %v9840_v56 = vsel %vm1963_vm4, %v5579_v41, %v5580_v60  ;;  %v5589_v39 = vrot.slane %v9550_v4, 2  ;;  %v4396_v15 = vrot.slane %v9524_v30, 1 }
 0x42a   : > { %12347 = vst [vmem:[#allocation6_spill] sm:$0xff] %v9840_v56  ;;  %v9851_v23 = vsel %vm1963_vm4, %v5594_v46, %v5595_v62  ;;  %v4404_v60 = vrot.slane %v9728_v40, 1  ;;  %v4402_v1 = vrot.slane %v9614_v61, 1  ;;  %v4414_v5 = vrot.slane %v9738_v58, 1 }
 0x42b   : > { %12348 = vst [vmem:[#allocation5_spill] sm:$0xff] %v9851_v23  ;;  %v9854_v41 = vsel %vm1963_vm4, %v5589_v39, %v5590_v21  ;;  %v4412_v13 = vrot.slane %v9619_v47, 1  ;;  %v5604_v62 = vrot.slane %v9622_v6, 2  ;;  %v5599_v21 = vrot.slane %v9601_v17, 2 }
 0x42c   : > { %3626 = vrot.lane.b32.xlu0 %v9655_v38, %s7630_s8  ;;  %3622 = vrot.lane.b32.xlu1 %v9619_v47, %s7630_s8  ;;  %12349 = vst [vmem:[#allocation9_spill] sm:$0xff] %v9854_v41  ;;  %v9867_v46 = vsel %vm1268_vm3, %v4397_v16, %v4399_v42  ;;  %v4411_v40 = vrot.slane %v9550_v4, 1  ;;  %v3273_v39 = vrot.slane %v3259_v0, %v7701_v10  ;;  %v4416_v42 = vrot.slane %v9577_v43, 1 }
 0x42d   : > { %v3266_v58 = vrot.slane %v3258_v22, %v7701_v10  ;;  %v9881_v3 = vsel %vm1268_vm3, %v4396_v15, %v4397_v16  ;;  %v9885_v2 = vsel %vm1963_vm4, %v5604_v62, %v5605_v51  ;;  %v9888_v32 = vsel %vm1963_vm4, %v5599_v21, %v5600_v9 }
 0x42e   : > { %12350 = vst [vmem:[#allocation3_spill] sm:$0xff] %v9885_v2  ;;  %12351 = vst [vmem:[#allocation7_spill] sm:$0xff] %v9888_v32  ;;  %v4409_v0 = vrot.slane %v9733_v54, 1  ;;  %v4431_v30 = vrot.slane %v9639_v25, 1  ;;  %v5609_v59 = vrot.slane %v9639_v25, 2  ;;  %v12352_v22 = vcombine.high %v9531_v12, %v9550_v4 }
 0x42f   : > { %v9900_v51 = vsel %vm1268_vm3, %v4402_v1, %v4404_v60  ;;  %v9903_v9 = vsel %vm1268_vm3, %v4412_v13, %v4414_v5  ;;  %v9906_v54 = vsel %vm1268_vm3, %v4406_v31, %v4407_v19  ;;  %v4426_v15 = vrot.slane %v9622_v6, 1 }
 0x430   : > { %3634 = vrot.lane.b32.xlu0 %v9663_v44, %s7630_s8  ;;  %3630 = vrot.lane.b32.xlu1 %v9679_v35, %s7630_s8  ;;  %v3289_v16 = vrot.slane %v12352_v22, %v7701_v10  ;;  %v9910_v62 = vsel %vm1268_vm3, %v4411_v40, %v4412_v13  ;;  %v4421_v21 = vrot.slane %v9601_v17, 1  ;;  %v12353_v18 = vrot.slane %v9695_v29, 1 }
 0x431   : > { %v9919_v60 = vsel %vm1963_vm4, %v5609_v59, %v5610_v7  ;;  %v12356_v31 = vrot.slane %v9663_v44, 1  ;;  %v12357_v13 = vcombine.high %v9577_v43, %v9622_v6  ;;  %v12359_v59 = vrot.slane %v9679_v35, 1 }
 0x432   : > { %v9916_v22 = vsel %vm1268_vm3, %v4431_v30, %v12353_v18  ;;  %12355 = vst [vmem:[#allocation16_spill] sm:$0xff] %v9919_v60  ;;  %v12358_v18 = vcombine.high %v9601_v17, %v9639_v25  ;;  %v3338_v7 = vcombine.low %v3273_v39, %v3289_v16  ;;  %v9956_v63 = vsel %vm1268_vm3, %v4407_v19, %v4409_v0 }
 0x433   : > { %12354 = vst [vmem:[#allocation18_spill] sm:$0xff] %v9916_v22  ;;  %v9926_v5 = vsel %vm1268_vm3, %v4426_v15, %v12356_v31  ;;  %v3305_v40 = vrot.slane %v12357_v13, %v7701_v10  ;;  %v9941_v50 = vsel %vm1268_vm3, %v4421_v21, %v12359_v59  ;;  %v12361_v15 = vcombine.low %v9531_v12, %v9550_v4 }
 0x434   : > { %4000 = vrot.lane.b32.xlu0 %v9586_v26, %s7631_s9  ;;  %3638 = vrot.lane.b32.xlu1 %v9695_v29, %s7630_s8  ;;  %v3321_v30 = vrot.slane %v12358_v18, %v7701_v10  ;;  %12360 = vst [vmem:[#allocation17_spill] sm:$0xff] %v9941_v50  ;;  %v12362_v13 = vcombine.low %v9577_v43, %v9622_v6  ;;  %v12364_v59 = vrot.slane %v9655_v38, 1 }
 0x435   : > { %v3282_v31 = vrot.slane %v12361_v15, %v7701_v10  ;;  %v12363_v18 = vcombine.low %v9601_v17, %v9639_v25  ;;  %v9959_v21 = vsel %vm1268_vm3, %v4401_v24, %v4402_v1  ;;  %v4500_v12 = vcombine.low %v9941_v50, %v9916_v22 }
 0x436   : > { %v3298_v53 = vrot.slane %v12362_v13, %v7701_v10  ;;  %v3370_v4 = vcombine.low %v3305_v40, %v3321_v30  ;;  %v9966_v43 = vsel %vm1268_vm3, %v4416_v42, %v12364_v59  ;;  %v4604_v17 = vcombine.low %v9900_v51, %v9903_v9 }
 0x437   : > { %v3314_v33 = vrot.slane %v12363_v18, %v7701_v10  ;;  %v3322_v6 = vcombine.low %v3266_v58, %v3282_v31  ;;  %v3323_v13 = vcombine.high %v3266_v58, %v3282_v31  ;;  %v4452_v25 = vcombine.low %v9881_v3, %v9906_v54 }
 0x438   : > { %4008 = vrot.lane.b32.xlu0 %v9591_v52, %s7631_s9  ;;  %4004 = vrot.lane.b32.xlu1 %v9614_v61, %s7631_s9  ;;  %v4468_v24 = vcombine.low %v9959_v21, %v9910_v62  ;;  %v4484_v19 = vcombine.low %v9966_v43, %v9926_v5  ;;  %v9981_v1 = vrot.slane %v3338_v7, %v8090_v36 }
 0x439   : > { %v3354_v15 = vcombine.low %v3298_v53, %v3314_v33  ;;  %v9984_v58 = vrot.slane %v3370_v4, %v8090_v36  ;;  %v9987_v42 = vrot.slane %v3322_v6, %v8090_v36  ;;  %v9993_v31 = vrot.slane %v4500_v12, %v7701_v10 }
 0x43a   : > { %12365 = vst [vmem:[#allocation15_spill] sm:$0xff] %v9981_v1  ;;  %v3355_v18 = vcombine.high %v3298_v53, %v3314_v33  ;;  %v3339_v59 = vcombine.high %v3273_v39, %v3289_v16  ;;  %v3371_v22 = vcombine.high %v3305_v40, %v3321_v30  ;;  %v5782_v50 = vcombine.low %v9797_v11, %v9809_v45 }
 0x43b   : > { %12366 = vst [vmem:[#allocation19_spill] sm:$0xff] %v9984_v58  ;;  %12367 = vst [vmem:[#allocation21_spill] sm:$0xff] %v9987_v42  ;;  %v9990_v0 = vrot.slane %v3354_v15, %v8090_v36  ;;  %v10002_v6 = vrot.slane %v3323_v13, %v8090_v36  ;;  %v4588_v16 = vcombine.low %v9867_v46, %v9956_v63  ;;  %v12425_v42 = vld [vmem:[#allocation2_spill] sm:$0xff] }
 0x43c   : > { %4016 = vrot.lane.b32.xlu0 %v9655_v38, %s7631_s9  ;;  %4012 = vrot.lane.b32.xlu1 %v9619_v47, %s7631_s9  ;;  %12369 = vst [vmem:[#allocation22_spill] sm:$0xff] %v9993_v31  ;;  %v10007_v12 = vrot.slane %v3355_v18, %v8090_v36  ;;  %v10010_v33 = vrot.slane %v3339_v59, %v8090_v36 }
 0x43d   : > { %12368 = vst [vmem:[#allocation20_spill] sm:$0xff] %v9990_v0  ;;  %12370 = vst [vmem:[#allocation23_spill] sm:$0xff] %v10002_v6  ;;  %v10013_v53 = vrot.slane %v3371_v22, %v8090_v36  ;;  %v10022_v40 = vrot.slane %v4604_v17, %v7701_v10  ;;  %v10025_v30 = vrot.slane %v4484_v19, %v7701_v10 }
 0x43e   : > { %12371 = vst [vmem:[#allocation24_spill] sm:$0xff] %v10007_v12  ;;  %12372 = vst [vmem:[#allocation25_spill] sm:$0xff] %v10010_v33  ;;  %v5798_v15 = vcombine.low %v9806_v20, %v9820_v55  ;;  %v10038_v17 = vrot.slane %v4452_v25, %v7701_v10  ;;  %v10041_v19 = vrot.slane %v4468_v24, %v7701_v10 }
 0x43f   : > { %12373 = vst [vmem:[#allocation26_spill] sm:$0xff] %v10013_v53  ;;  %12374 = vst [vmem:[#allocation27_spill] sm:$0xff] %v10025_v30  ;;  %v4548_v39 = vcombine.low %v10025_v30, %v9993_v31  ;;  %v5766_v22 = vcombine.low %v9777_v49, %v9794_v8  ;;  %v10050_v18 = vrot.slane %v5782_v50, %v7701_v10 }
 0x440   : > { %4024 = vrot.lane.b32.xlu0 %v9663_v44, %s7631_s9  ;;  %4020 = vrot.lane.b32.xlu1 %v9679_v35, %s7631_s9  ;;  %v5814_v59 = vcombine.low %v9823_v34, %v9834_v14  ;;  %v12376_v25 = vcombine.low %v9586_v26, %v9591_v52  ;;  %v12377_v13 = vcombine.low %v9614_v61, %v9619_v47 }
 0x441   : > { %12375 = vst [vmem:[#allocation28_spill] sm:$0xff] %v10050_v18  ;;  %v10065_v7 = vrot.slane %v5798_v15, %v7701_v10  ;;  %v5630_v50 = vcombine.low %v9826_v37, %v9837_v57  ;;  %v12379_v12 = vcombine.low %v9655_v38, %v9663_v44  ;;  %v12381_v15 = vcombine.high %v9586_v26, %v9591_v52 }
 0x442   : > { %v3402_v24 = vrot.slane %v12376_v25, %v7701_v10  ;;  %v3418_v4 = vrot.slane %v12377_v13, %v7701_v10  ;;  %v12380_v25 = vcombine.low %v9679_v35, %v9695_v29  ;;  %v5678_v13 = vcombine.low %v9888_v32, %v9919_v60 }
 0x443   : > { %12378 = vst [vmem:[#allocation29_spill] sm:$0xff] %v10065_v7  ;;  %v3434_v6 = vrot.slane %v12379_v12, %v7701_v10  ;;  %v3409_v58 = vrot.slane %v12381_v15, %v7701_v10  ;;  %v12382_v1 = vcombine.high %v9614_v61, %v9619_v47  ;;  %v12383_v31 = vcombine.high %v9655_v38, %v9663_v44 }
 0x444   : > { %4796 = vrot.lane.b32.xlu0 %v9867_v46, %s7630_s8  ;;  %4028 = vrot.lane.b32.xlu1 %v9695_v29, %s7631_s9  ;;  %v3450_v53 = vrot.slane %v12380_v25, %v7701_v10  ;;  %v3458_v33 = vcombine.low %v3402_v24, %v3418_v4  ;;  %v12384_v60 = vcombine.high %v9679_v35, %v9695_v29 }
 0x445   : > { %v3425_v30 = vrot.slane %v12382_v1, %v7701_v10  ;;  %v3441_v25 = vrot.slane %v12383_v31, %v7701_v10  ;;  %v3459_v57 = vcombine.high %v3402_v24, %v3418_v4  ;;  %v10098_v26 = vrot.slane %v5814_v59, %v7701_v10 }
 0x446   : > { %v3490_v12 = vcombine.low %v3434_v6, %v3450_v53  ;;  %v3457_v32 = vrot.slane %v12384_v60, %v7701_v10  ;;  %v5646_v52 = vcombine.low %v9840_v56, %v9854_v41  ;;  %v3491_v47 = vcombine.high %v3434_v6, %v3450_v53 }
 0x447   : > { %12385 = vst [vmem:[#allocation30_spill] sm:$0xff] %v10098_v26  ;;  %v3475_v61 = vcombine.high %v3409_v58, %v3425_v30  ;;  %v5662_v38 = vcombine.low %v9851_v23, %v9885_v2  ;;  %v10107_v44 = vrot.slane %v3458_v33, %v8090_v36  ;;  %v10113_v60 = vrot.slane %v3459_v57, %v8090_v36  ;;  %v12403_v57 = vld [vmem:[#allocation4_spill] sm:$0xff] }
 0x448   : > { %4804 = vrot.lane.b32.xlu0 %v9956_v63, %s7630_s8  ;;  %4800 = vrot.lane.b32.xlu1 %v9900_v51, %s7630_s8  ;;  %v10110_v35 = vrot.slane %v3490_v12, %v8090_v36  ;;  %v3507_v29 = vcombine.high %v3441_v25, %v3457_v32  ;;  %v10116_v1 = vrot.slane %v3491_v47, %v8090_v36 }
 0x449   : > { %12386 = vst [vmem:[#allocation31_spill] sm:$0xff] %v10107_v44  ;;  %12388 = vst [vmem:[#allocation33_spill] sm:$0xff] %v10113_v60  ;;  %v3474_v31 = vcombine.low %v3409_v58, %v3425_v30  ;;  %v3506_v4 = vcombine.low %v3441_v25, %v3457_v32  ;;  %v10119_v6 = vrot.slane %v5678_v13, %v7701_v10  ;;  %v12402_v32 = vld [vmem:[#allocation11_spill] sm:$0xff] }
 0x44a   : > { %12387 = vst [vmem:[#allocation32_spill] sm:$0xff] %v10110_v35  ;;  %12389 = vst [vmem:[#allocation34_spill] sm:$0xff] %v10116_v1  ;;  %v10124_v33 = vrot.slane %v3475_v61, %v8090_v36  ;;  %v10127_v59 = vrot.slane %v3507_v29, %v8090_v36  ;;  %v10144_v24 = vrot.slane %v5646_v52, %v7701_v10 }
 0x44b   : > { %12390 = vst [vmem:[#allocation35_spill] sm:$0xff] %v10119_v6  ;;  %v10136_v58 = vrot.slane %v3474_v31, %v8090_v36  ;;  %v10139_v30 = vrot.slane %v3506_v4, %v8090_v36  ;;  %v10147_v13 = vrot.slane %v5662_v38, %v7701_v10  ;;  %v10154_v25 = vrot.slane %v4588_v16, %v7701_v10 }
 0x44c   : > { %4812 = vrot.lane.b32.xlu0 %v9716_v48, %s7630_s8  ;;  %4808 = vrot.lane.b32.xlu1 %v9903_v9, %s7630_s8  ;;  %12391 = vst [vmem:[#allocation36_spill] sm:$0xff] %v10124_v33  ;;  %12392 = vst [vmem:[#allocation37_spill] sm:$0xff] %v10127_v59  ;;  %v4516_v61 = vcombine.low %v10038_v17, %v10041_v19  ;;  %v10163_v38 = vrot.slane %v5766_v22, %v7701_v10  ;;  %v12400_v22 = vld [vmem:[#allocation10_spill] sm:$0xff] }
 0x44d   : > { %12393 = vst [vmem:[#allocation38_spill] sm:$0xff] %v10136_v58  ;;  %12394 = vst [vmem:[#allocation39_spill] sm:$0xff] %v10139_v30  ;;  %v5862_v29 = vcombine.low %v10065_v7, %v10098_v26  ;;  %v10168_v31 = vrot.slane %v5630_v50, %v7701_v10  ;;  %v5726_v16 = vcombine.low %v10147_v13, %v10119_v6 }
 0x44e   : > { %12395 = vst [vmem:[#allocation40_spill] sm:$0xff] %v10144_v24  ;;  %12396 = vst [vmem:[#allocation41_spill] sm:$0xff] %v10147_v13  ;;  %v10175_v4 = vrot.slane %v4548_v39, %v8090_v36  ;;  %v4652_v52 = vcombine.low %v10154_v25, %v10022_v40  ;;  %v5830_v47 = vcombine.low %v10163_v38, %v10050_v18 }
 0x44f   : > { %12397 = vst [vmem:[#allocation42_spill] sm:$0xff] %v10163_v38  ;;  %12398 = vst [vmem:[#allocation43_spill] sm:$0xff] %v10168_v31  ;;  %v5694_v50 = vcombine.low %v10168_v31, %v10144_v24  ;;  %v10186_v12 = vrot.slane %v4516_v61, %v8090_v36  ;;  %v12404_v39 = vcombine.low %v12402_v32, %v12403_v57 }
 0x450   : > { %4820 = vrot.lane.b32.xlu0 %v9703_v28, %s7630_s8  ;;  %4816 = vrot.lane.b32.xlu1 %v9744_v27, %s7630_s8  ;;  %12399 = vst [vmem:[#allocation44_spill] sm:$0xff] %v10175_v4  ;;  %v10195_v53 = vrot.slane %v5862_v29, %v8090_v36  ;;  %v10198_v13 = vrot.slane %v5726_v16, %v8090_v36 }
 0x451   : > { %12401 = vst [vmem:[#allocation10_spill] sm:$0xff] %v10186_v12  ;;  %v10192_v15 = vrot.slane %v12404_v39, %v8090_v36  ;;  %v10209_v39 = vrot.slane %v4652_v52, %v8090_v36  ;;  %v10212_v29 = vrot.slane %v5830_v47, %v8090_v36  ;;  %v10215_v16 = vrot.slane %v5694_v50, %v8090_v36 }
 0x452   : > { %12406 = vst [vmem:[#allocation46_spill] sm:$0xff] %v10195_v53  ;;  %12407 = vst [vmem:[#allocation47_spill] sm:$0xff] %v10198_v13 }
 0x453   : > { %12405 = vst [vmem:[#allocation45_spill] sm:$0xff] %v10192_v15  ;;  %12408 = vst [vmem:[#allocation48_spill] sm:$0xff] %v10209_v39 }
 0x454   : > { %5186 = vrot.lane.b32.xlu0 %v9867_v46, %s7631_s9  ;;  %4824 = vrot.lane.b32.xlu1 %v12400_v22, %s7630_s8  ;;  %12409 = vst [vmem:[#allocation49_spill] sm:$0xff] %v10212_v29  ;;  %12410 = vst [vmem:[#allocation50_spill] sm:$0xff] %v10215_v16 }
 0x457   : > { %v12463_v18 = vld [vmem:[#allocation44_spill] sm:$0xff] }
 0x458   : > { %5194 = vrot.lane.b32.xlu0 %v9956_v63, %s7631_s9  ;;  %5190 = vrot.lane.b32.xlu1 %v9900_v51, %s7631_s9  ;;  %v12464_v38 = vld [vmem:[#allocation10_spill] sm:$0xff] }
 0x45c   : > { %5202 = vrot.lane.b32.xlu0 %v9716_v48, %s7631_s9  ;;  %5198 = vrot.lane.b32.xlu1 %v9903_v9, %s7631_s9  ;;  %v12412_v48 = vld [vmem:[#allocation18_spill] sm:$0xff] }
 0x460   : > { %5210 = vrot.lane.b32.xlu0 %v9703_v28, %s7631_s9  ;;  %5206 = vrot.lane.b32.xlu1 %v9744_v27, %s7631_s9  ;;  %v12411_v28 = vld [vmem:[#allocation17_spill] sm:$0xff] }
 0x464   : > { %4794 = vrot.lane.b32.xlu0 %v9881_v3, %s7630_s8  ;;  %5214 = vrot.lane.b32.xlu1 %v12400_v22, %s7631_s9 }
 0x468   : > { %4802 = vrot.lane.b32.xlu0 %v9906_v54, %s7630_s8  ;;  %4798 = vrot.lane.b32.xlu1 %v9959_v21, %s7630_s8 }
 0x46a   : > { %v10253_v27 = vpop.permute.xlu0 %3608 }
 0x46c   : > { %4810 = vrot.lane.b32.xlu0 %v9966_v43, %s7630_s8  ;;  %4806 = vrot.lane.b32.xlu1 %v9910_v62, %s7630_s8 }
 0x46e   : > { %v10261_v52 = vpop.permute.xlu1 %3612 }
 0x470   : > { %4818 = vrot.lane.b32.xlu0 %v9926_v5, %s7630_s8  ;;  %4814 = vrot.lane.b32.xlu1 %v12411_v28, %s7630_s8 }
 0x472   : > { %v10259_v47 = vpop.permute.xlu0 %3616 }
 0x473   : > { %v3656_v30 = vcombine.low %v10253_v27, %v10259_v47 }
 0x474   : > { %5184 = vrot.lane.b32.xlu0 %v9881_v3, %s7631_s9  ;;  %4822 = vrot.lane.b32.xlu1 %v12412_v48, %s7630_s8 }
 0x475   : > { %v10319_v35 = vrot.slane %v3656_v30, %v7701_v10 }
 0x476   : > { %v10269_v50 = vpop.permute.xlu1 %3620 }
 0x477   : > { %v3672_v13 = vcombine.low %v10261_v52, %v10269_v50  ;;  %12417 = vst [vmem:[#allocation53_spill] sm:$0xff] %v10319_v35 }
 0x478   : > { %5192 = vrot.lane.b32.xlu0 %v9906_v54, %s7631_s9  ;;  %5188 = vrot.lane.b32.xlu1 %v9959_v21, %s7631_s9 }
 0x479   : > { %v10309_v60 = vrot.slane %v3672_v13, %v7701_v10 }
 0x47a   : > { %v10267_v22 = vpop.permute.xlu0 %3624 }
 0x47b   : > { %v3720_v13 = vcombine.low %v10319_v35, %v10309_v60 }
 0x47c   : > { %5200 = vrot.lane.b32.xlu0 %v9966_v43, %s7631_s9  ;;  %5196 = vrot.lane.b32.xlu1 %v9910_v62, %s7631_s9 }
 0x47d   : > { %v10341_v15 = vrot.slane %v3720_v13, %v8090_v36 }
 0x47e   : > { %v10277_v61 = vpop.permute.xlu1 %3628 }
 0x47f   : > { %12422 = vst [vmem:[#allocation58_spill] sm:$0xff] %v10341_v15 }
 0x480   : > { %5208 = vrot.lane.b32.xlu0 %v9926_v5, %s7631_s9  ;;  %5204 = vrot.lane.b32.xlu1 %v12411_v28, %s7631_s9 }
 0x482   : > { %v10275_v24 = vpop.permute.xlu0 %3632 }
 0x483   : > { %v3688_v29 = vcombine.low %v10267_v22, %v10275_v24 }
 0x484   : > { %5974 = vrot.lane.b32.xlu0 %v9777_v49, %s7630_s8  ;;  %5212 = vrot.lane.b32.xlu1 %v12412_v48, %s7631_s9 }
 0x485   : > { %v10312_v59 = vrot.slane %v3688_v29, %v7701_v10 }
 0x486   : > { %v10283_v31 = vpop.permute.xlu0 %3998  ;;  %v10285_v6 = vpop.permute.xlu1 %3636 }
 0x487   : > { %12413 = vst [vmem:[#allocation17_spill] sm:$0xff] %v10283_v31  ;;  %v3704_v16 = vcombine.low %v10277_v61, %v10285_v6 }
 0x488   : > { %5982 = vrot.lane.b32.xlu0 %v9794_v8, %s7630_s8  ;;  %5978 = vrot.lane.b32.xlu1 %v9797_v11, %s7630_s8 }
 0x489   : > { %v10302_v58 = vrot.slane %v3704_v16, %v7701_v10 }
 0x48a   : > { %v10297_v53 = vpop.permute.xlu0 %4006  ;;  %v10304_v1 = vpop.permute.xlu1 %4002 }
 0x48b   : > { %12414 = vst [vmem:[#allocation18_spill] sm:$0xff] %v10297_v53  ;;  %12415 = vst [vmem:[#allocation51_spill] sm:$0xff] %v10304_v1  ;;  %v3752_v16 = vcombine.low %v10312_v59, %v10302_v58  ;;  %v4046_v0 = vcombine.low %v10283_v31, %v10297_v53 }
 0x48c   : > { %5990 = vrot.lane.b32.xlu0 %v9806_v20, %s7630_s8  ;;  %5986 = vrot.lane.b32.xlu1 %v9809_v45, %s7630_s8 }
 0x48d   : > { %v10334_v39 = vrot.slane %v3752_v16, %v8090_v36  ;;  %v10383_v31 = vrot.slane %v4046_v0, %v7701_v10 }
 0x48e   : > { %v10316_v33 = vpop.permute.xlu0 %4014  ;;  %v10323_v44 = vpop.permute.xlu1 %4010 }
 0x48f   : > { %12416 = vst [vmem:[#allocation52_spill] sm:$0xff] %v10316_v33  ;;  %12418 = vst [vmem:[#allocation54_spill] sm:$0xff] %v10323_v44  ;;  %v4062_v13 = vcombine.low %v10304_v1, %v10323_v44 }
 0x490   : > { %5998 = vrot.lane.b32.xlu0 %v9820_v55, %s7630_s8  ;;  %5994 = vrot.lane.b32.xlu1 %v9823_v34, %s7630_s8  ;;  %12420 = vst [vmem:[#allocation56_spill] sm:$0xff] %v10334_v39  ;;  %12431 = vst [vmem:[#allocation65_spill] sm:$0xff] %v10383_v31 }
 0x491   : > { %v10373_v1 = vrot.slane %v4062_v13, %v7701_v10  ;;  %v12432_v13 = vld [vmem:[#allocation7_spill] sm:$0xff] }
 0x492   : > { %v10331_v29 = vpop.permute.xlu0 %4022  ;;  %v10336_v30 = vpop.permute.xlu1 %4018 }
 0x493   : > { %12419 = vst [vmem:[#allocation55_spill] sm:$0xff] %v10331_v29  ;;  %12421 = vst [vmem:[#allocation57_spill] sm:$0xff] %v10336_v30  ;;  %v4078_v12 = vcombine.low %v10316_v33, %v10331_v29 }
 0x494   : > { %5972 = vrot.lane.b32.xlu0 %v9826_v37, %s7630_s8  ;;  %6002 = vrot.lane.b32.xlu1 %v9834_v14, %s7630_s8  ;;  %12428 = vst [vmem:[#allocation62_spill] sm:$0xff] %v10373_v1 }
 0x495   : > { %v10376_v44 = vrot.slane %v4078_v12, %v7701_v10  ;;  %v4110_v12 = vcombine.low %v10383_v31, %v10373_v1 }
 0x496   : > { %v10345_v57 = vpop.permute.xlu0 %3610  ;;  %v10347_v32 = vpop.permute.xlu1 %4026 }
 0x497   : > { %12423 = vst [vmem:[#allocation59_spill] sm:$0xff] %v10345_v57  ;;  %12424 = vst [vmem:[#allocation60_spill] sm:$0xff] %v10347_v32  ;;  %v4094_v16 = vcombine.low %v10336_v30, %v10347_v32  ;;  %v4605_v32 = vcombine.high %v9900_v51, %v9903_v9  ;;  %v3705_v9 = vcombine.high %v10277_v61, %v10285_v6 }
 0x498   : > { %5980 = vrot.lane.b32.xlu0 %v12425_v42, %s7630_s8  ;;  %5976 = vrot.lane.b32.xlu1 %v9840_v56, %s7630_s8  ;;  %12429 = vst [vmem:[#allocation63_spill] sm:$0xff] %v10376_v44  ;;  %v3689_v6 = vcombine.high %v10267_v22, %v10275_v24  ;;  %v5783_v22 = vcombine.high %v9797_v11, %v9809_v45 }
 0x499   : > { %v10366_v15 = vrot.slane %v4094_v16, %v7701_v10 }
 0x49a   : > { %v10361_v4 = vpop.permute.xlu0 %3618  ;;  %v10368_v39 = vpop.permute.xlu1 %3614  ;;  %v12466_v7 = vld [vmem:[#allocation57_spill] sm:$0xff] }
 0x49b   : > { %12426 = vst [vmem:[#allocation2_spill] sm:$0xff] %v10366_v15  ;;  %12427 = vst [vmem:[#allocation61_spill] sm:$0xff] %v10368_v39  ;;  %v4142_v16 = vcombine.low %v10376_v44, %v10366_v15  ;;  %v10405_v44 = vrot.slane %v4110_v12, %v8090_v36  ;;  %v12437_v15 = vld [vmem:[#allocation16_spill] sm:$0xff] }
 0x49c   : > { %5988 = vrot.lane.b32.xlu0 %v9851_v23, %s7630_s8  ;;  %5984 = vrot.lane.b32.xlu1 %v9854_v41, %s7630_s8 }
 0x49d   : > { %v10398_v30 = vrot.slane %v4142_v16, %v8090_v36  ;;  %12436 = vst [vmem:[#allocation69_spill] sm:$0xff] %v10405_v44 }
 0x49e   : > { %v10380_v33 = vpop.permute.xlu0 %3626  ;;  %v10387_v53 = vpop.permute.xlu1 %3622  ;;  %v12465_v26 = vld [vmem:[#allocation60_spill] sm:$0xff] }
 0x49f   : > { %12430 = vst [vmem:[#allocation64_spill] sm:$0xff] %v10380_v33  ;;  %12434 = vst [vmem:[#allocation67_spill] sm:$0xff] %v10398_v30  ;;  %v3808_v12 = vcombine.low %v10368_v39, %v10387_v53 }
 0x4a0   : > { %5996 = vrot.lane.b32.xlu0 %v9885_v2, %s7630_s8  ;;  %5992 = vrot.lane.b32.xlu1 %v12432_v13, %s7630_s8 }
 0x4a1   : > { %v10443_v39 = vrot.slane %v3808_v12, %v7701_v10  ;;  %v10513_v12 = vrot.slane %v3689_v6, %v7701_v10 }
 0x4a2   : > { %v10395_v29 = vpop.permute.xlu0 %3634  ;;  %v10400_v0 = vpop.permute.xlu1 %3630 }
 0x4a3   : > { %12433 = vst [vmem:[#allocation66_spill] sm:$0xff] %v10395_v29  ;;  %12435 = vst [vmem:[#allocation68_spill] sm:$0xff] %v10400_v0  ;;  %v3824_v35 = vcombine.low %v10380_v33, %v10395_v29  ;;  %v4589_v33 = vcombine.high %v9867_v46, %v9956_v63  ;;  %v4469_v29 = vcombine.high %v9959_v21, %v9910_v62 }
 0x4a4   : > { %6362 = vrot.lane.b32.xlu0 %v9826_v37, %s7631_s9  ;;  %6000 = vrot.lane.b32.xlu1 %v12437_v15, %s7630_s8  ;;  %v4453_v63 = vcombine.high %v9881_v3, %v9906_v54  ;;  %v4501_v54 = vcombine.high %v12411_v28, %v12412_v48 }
 0x4a5   : > { %v10446_v51 = vrot.slane %v3824_v35, %v7701_v10  ;;  %v3673_v35 = vcombine.high %v10261_v52, %v10269_v50  ;;  %v10476_v3 = vrot.slane %v4469_v29, %v7701_v10  ;;  %v3657_v52 = vcombine.high %v10253_v27, %v10259_v47 }
 0x4a6   : > { %v10409_v31 = vpop.permute.xlu0 %4000  ;;  %v10411_v1 = vpop.permute.xlu1 %3638  ;;  %v10498_v48 = vrot.slane %v4453_v63, %v7701_v10  ;;  %v4485_v29 = vcombine.high %v9966_v43, %v9926_v5  ;;  %v4517_v5 = vcombine.high %v10038_v17, %v10041_v19  ;;  %v10524_v63 = vrot.slane %v4501_v54, %v7701_v10  ;;  %v12449_v54 = vld [vmem:[#allocation22_spill] sm:$0xff] }
 0x4a7   : > { %12438 = vst [vmem:[#allocation70_spill] sm:$0xff] %v10409_v31  ;;  %12439 = vst [vmem:[#allocation71_spill] sm:$0xff] %v10411_v1  ;;  %v3840_v16 = vcombine.low %v10400_v0, %v10411_v1  ;;  %v3792_v0 = vcombine.low %v10345_v57, %v10361_v4  ;;  %v10455_v57 = vrot.slane %v4605_v32, %v7701_v10 }
 0x4a8   : > { %6366 = vrot.lane.b32.xlu0 %v9840_v56, %s7631_s9  ;;  %6364 = vrot.lane.b32.xlu1 %v9777_v49, %s7631_s9  ;;  %v10473_v32 = vrot.slane %v4589_v33, %v7701_v10  ;;  %v10489_v33 = vrot.slane %v3705_v9, %v7701_v10  ;;  %v5767_v9 = vcombine.high %v9777_v49, %v9794_v8 }
 0x4a9   : > { %v10432_v1 = vrot.slane %v3840_v16, %v7701_v10  ;;  %v10460_v46 = vrot.slane %v3792_v0, %v7701_v10  ;;  %v10537_v19 = vrot.slane %v5783_v22, %v7701_v10  ;;  %v10542_v6 = vrot.slane %v4485_v29, %v7701_v10 }
 0x4aa   : > { %v10425_v15 = vpop.permute.xlu0 %4008  ;;  %v10434_v44 = vpop.permute.xlu1 %4004  ;;  %v3768_v17 = vcombine.low %v10513_v12, %v10489_v33  ;;  %v10554_v22 = vrot.slane %v5767_v9, %v7701_v10  ;;  %v5799_v29 = vcombine.high %v9806_v20, %v9820_v55 }
 0x4ab   : > { %12440 = vst [vmem:[#allocation72_spill] sm:$0xff] %v10425_v15  ;;  %12441 = vst [vmem:[#allocation73_spill] sm:$0xff] %v10434_v44  ;;  %v3888_v62 = vcombine.low %v10446_v51, %v10432_v1  ;;  %v3856_v61 = vcombine.low %v10460_v46, %v10443_v39 }
 0x4ac   : > { %6370 = vrot.lane.b32.xlu0 %v12425_v42, %s7631_s9  ;;  %6368 = vrot.lane.b32.xlu1 %v9797_v11, %s7631_s9  ;;  %v10510_v11 = vrot.slane %v3673_v35, %v7701_v10  ;;  %12447 = vst [vmem:[#allocation79_spill] sm:$0xff] %v10537_v19  ;;  %12451 = vst [vmem:[#allocation22_spill] sm:$0xff] %v10554_v22 }
 0x4ad   : > { %v10503_v0 = vrot.slane %v3888_v62, %v8090_v36  ;;  %v10527_v62 = vrot.slane %v3856_v61, %v8090_v36  ;;  %v12450_v61 = vld [vmem:[#allocation27_spill] sm:$0xff] }
 0x4ae   : > { %v10452_v16 = vpop.permute.xlu0 %4016  ;;  %v10464_v21 = vpop.permute.xlu1 %4012  ;;  %v4549_v28 = vcombine.high %v12450_v61, %v12449_v54  ;;  %v4564_v54 = vcombine.low %v10542_v6, %v10524_v63  ;;  %v5631_v61 = vcombine.high %v9826_v37, %v12425_v42  ;;  %v10599_v37 = vrot.slane %v5799_v29, %v7701_v10 }
 0x4af   : > { %12442 = vst [vmem:[#allocation74_spill] sm:$0xff] %v10452_v16  ;;  %12443 = vst [vmem:[#allocation75_spill] sm:$0xff] %v10464_v21 }
 0x4b0   : > { %6374 = vrot.lane.b32.xlu0 %v9854_v41, %s7631_s9  ;;  %6372 = vrot.lane.b32.xlu1 %v9794_v8, %s7631_s9  ;;  %12445 = vst [vmem:[#allocation77_spill] sm:$0xff] %v10503_v0  ;;  %12446 = vst [vmem:[#allocation78_spill] sm:$0xff] %v10527_v62  ;;  %v3671_v8 = vrot.slane %v3657_v52, %v7701_v10  ;;  %v4198_v52 = vcombine.low %v10434_v44, %v10464_v21  ;;  %v12475_v41 = vld [vmem:[#allocation52_spill] sm:$0xff] }
 0x4b1   : > { %12455 = vst [vmem:[#allocation83_spill] sm:$0xff] %v10599_v37  ;;  %v10611_v19 = vrot.slane %v5631_v61, %v7701_v10  ;;  %v12470_v37 = vld [vmem:[#allocation15_spill] sm:$0xff] }
 0x4b2   : > { %v10493_v50 = vpop.permute.xlu0 %4024  ;;  %v10505_v27 = vpop.permute.xlu1 %4020  ;;  %v3736_v24 = vcombine.low %v3671_v8, %v10510_v11  ;;  %v3737_v62 = vcombine.high %v3671_v8, %v10510_v11 }
 0x4b3   : > { %12444 = vst [vmem:[#allocation76_spill] sm:$0xff] %v10493_v50  ;;  %v4214_v9 = vcombine.low %v10452_v16, %v10493_v50  ;;  %12456 = vst [vmem:[#allocation84_spill] sm:$0xff] %v10611_v19  ;;  %v4095_v19 = vcombine.high %v12466_v7, %v12465_v26 }
 0x4b4   : > { %6378 = vrot.lane.b32.xlu0 %v9851_v23, %s7631_s9  ;;  %6376 = vrot.lane.b32.xlu1 %v9809_v45, %s7631_s9  ;;  %v5815_v45 = vcombine.high %v9823_v34, %v9834_v14  ;;  %v10596_v23 = vrot.slane %v3736_v24, %v8090_v36  ;;  %v10614_v24 = vrot.slane %v4198_v52, %v7701_v10 }
 0x4b5   : > { %v10617_v29 = vrot.slane %v4214_v9, %v7701_v10  ;;  %v3753_v52 = vcombine.high %v10312_v59, %v10302_v58  ;;  %v12461_v9 = vld [vmem:[#allocation53_spill] sm:$0xff]  ;;  %v4581_v59 = vcombine.high %v12464_v38, %v12463_v18  ;;  %v10665_v58 = vrot.slane %v3737_v62, %v8090_v36  ;;  %v12467_v18 = vld [vmem:[#allocation2_spill] sm:$0xff] }
 0x4b6   : > { %v10539_v35 = vpop.permute.xlu0 %4796  ;;  %v10548_v47 = vpop.permute.xlu1 %4028  ;;  %v10586_v0 = vrot.slane %v5815_v45, %v7701_v10  ;;  %v10606_v45 = vrot.slane %v4549_v28, %v8090_v36  ;;  %12457 = vst [vmem:[#allocation85_spill] sm:$0xff] %v10614_v24  ;;  %v3721_v28 = vcombine.high %v12461_v9, %v10309_v60  ;;  %v10662_v9 = vrot.slane %v4564_v54, %v8090_v36  ;;  %v12474_v54 = vld [vmem:[#allocation55_spill] sm:$0xff] }
 0x4b7   : > { %12448 = vst [vmem:[#allocation80_spill] sm:$0xff] %v10539_v35  ;;  %v4230_v49 = vcombine.low %v10505_v27, %v10548_v47  ;;  %v4079_v56 = vcombine.high %v12475_v41, %v12474_v54  ;;  %v12484_v41 = vld [vmem:[#allocation18_spill] sm:$0xff]  ;;  %v4109_v21 = vrot.slane %v4095_v19, %v7701_v10 }
 0x4b8   : > { %6382 = vrot.lane.b32.xlu0 %v12432_v13, %s7631_s9  ;;  %6380 = vrot.lane.b32.xlu1 %v9806_v20, %s7631_s9  ;;  %v10575_v13 = vrot.slane %v3768_v17, %v8090_v36  ;;  %12453 = vst [vmem:[#allocation81_spill] sm:$0xff] %v10586_v0  ;;  %v4182_v20 = vcombine.low %v10409_v31, %v10425_v15  ;;  %v12471_v0 = vld [vmem:[#allocation19_spill] sm:$0xff] }
 0x4b9   : > { %v10591_v17 = vrot.slane %v4230_v49, %v7701_v10  ;;  %v3769_v49 = vcombine.high %v10513_v12, %v10489_v33  ;;  %v10629_v12 = vrot.slane %v4517_v5, %v8090_v36  ;;  %v12462_v5 = vld [vmem:[#allocation16_spill] sm:$0xff]  ;;  %v12472_v7 = vcombine.high %v12470_v37, %v12471_v0 }
 0x4ba   : > { %v10581_v42 = vpop.permute.xlu0 %4804  ;;  %v10593_v43 = vpop.permute.xlu1 %4800  ;;  %v3789_v33 = vcombine.high %v10596_v23, %v10575_v13 }
 0x4bb   : > { %12452 = vst [vmem:[#allocation27_spill] sm:$0xff] %v10581_v42  ;;  %12454 = vst [vmem:[#allocation82_spill] sm:$0xff] %v10593_v43  ;;  %v4278_v11 = vcombine.low %v10617_v29, %v10591_v17  ;;  %v10653_v61 = vrot.slane %v3769_v49, %v8090_v36 }
 0x4bc   : > { %6386 = vrot.lane.b32.xlu0 %v9885_v2, %s7631_s9  ;;  %6384 = vrot.lane.b32.xlu1 %v9823_v34, %s7631_s9  ;;  %v10636_v34 = vrot.slane %v4182_v20, %v7701_v10  ;;  %v12468_v20 = vld [vmem:[#allocation63_spill] sm:$0xff]  ;;  %v7323_v26 = vpack.i.bf16 %v3789_v33, %v12472_v7  ;;  %v12480_v33 = vld [vmem:[#allocation54_spill] sm:$0xff] }
 0x4bd   : > { %v4143_v38 = vcombine.high %v12468_v20, %v12467_v18  ;;  %v10682_v62 = vrot.slane %v4278_v11, %v8090_v36  ;;  %v12478_v18 = vld [vmem:[#allocation56_spill] sm:$0xff]  ;;  %v12479_v20 = vld [vmem:[#allocation58_spill] sm:$0xff]  ;;  %v12481_v7 = vld [vmem:[#allocation51_spill] sm:$0xff] }
 0x4be   : > { %v10624_v22 = vpop.permute.xlu0 %4812  ;;  %12459 = vst [vmem:[#allocation87_spill] sm:$0xff] %v10636_v34  ;;  %v10640_v8 = vpop.permute.xlu1 %4808  ;;  %v4246_v60 = vcombine.low %v10636_v34, %v10614_v24  ;;  %v3785_v50 = vcombine.high %v12479_v20, %v12478_v18  ;;  %v3735_v34 = vrot.slane %v3721_v28, %v8090_v36  ;;  %v4063_v24 = vcombine.high %v12481_v7, %v12480_v33  ;;  %v12485_v11 = vld [vmem:[#allocation17_spill] sm:$0xff] }
 0x4bf   : > { %12458 = vst [vmem:[#allocation86_spill] sm:$0xff] %v10624_v22  ;;  %12460 = vst [vmem:[#allocation88_spill] sm:$0xff] %v10640_v8  ;;  %v4994_v44 = vcombine.low %v10593_v43, %v10640_v8  ;;  %v4047_v54 = vcombine.high %v12485_v11, %v12484_v41  ;;  %v3790_v28 = vcombine.low %v10665_v58, %v10653_v61  ;;  %v12489_v41 = vld [vmem:[#allocation20_spill] sm:$0xff]  ;;  %v12493_v43 = vld [vmem:[#allocation26_spill] sm:$0xff] }
 0x4c0   : > { %6390 = vrot.lane.b32.xlu0 %v12462_v5, %s7631_s9  ;;  %6388 = vrot.lane.b32.xlu1 %v9820_v55, %s7631_s9  ;;  %v12473_v5 = vld [vmem:[#allocation69_spill] sm:$0xff]  ;;  %v10677_v55 = vrot.slane %v3753_v52, %v8090_v36  ;;  %12476 = vst [vmem:[#allocation60_spill] sm:$0xff] %v10682_v62  ;;  %v10700_v18 = vrot.slane %v4246_v60, %v8090_v36 }
 0x4c1   : > { %v4175_v2 = vcombine.high %v12473_v5, %v10398_v30  ;;  %v12482_v30 = vld [vmem:[#allocation62_spill] sm:$0xff]  ;;  %v12483_v5 = vld [vmem:[#allocation65_spill] sm:$0xff]  ;;  %v4093_v60 = vrot.slane %v4079_v56, %v7701_v10 }
 0x4c2   : > { %v10669_v49 = vpop.permute.xlu0 %4820  ;;  %v10684_v16 = vpop.permute.xlu1 %4816  ;;  %v4111_v52 = vcombine.high %v12483_v5, %v12482_v30  ;;  %12486 = vst [vmem:[#allocation2_spill] sm:$0xff] %v10700_v18  ;;  %v10707_v30 = vrot.slane %v4143_v38, %v8090_v36  ;;  %v4978_v5 = vcombine.low %v10539_v35, %v10581_v42  ;;  %v3786_v38 = vcombine.low %v3735_v34, %v10677_v55 }
 0x4c3   : > { %12469 = vst [vmem:[#allocation53_spill] sm:$0xff] %v10669_v49  ;;  %12477 = vst [vmem:[#allocation57_spill] sm:$0xff] %v10684_v16  ;;  %v7328_v19 = vpack.i.bf16 %v4581_v59, %v4175_v2  ;;  %v4077_v35 = vrot.slane %v4063_v24, %v7701_v10  ;;  %v10729_v2 = vrot.slane %v4994_v44, %v7701_v10 }
 0x4c4   : > { %7324 = vrot.lane.b32.xlu0 %v7323_v26, %s7639_s15  ;;  %6392 = vrot.lane.b32.xlu1 %v9834_v14, %s7631_s9  ;;  %v5010_v26 = vcombine.low %v10624_v22, %v10669_v49  ;;  %v12488_v14 = vld [vmem:[#allocation21_spill] sm:$0xff]  ;;  %v10726_v22 = vrot.slane %v4111_v52, %v8090_v36  ;;  %v4158_v59 = vcombine.low %v4093_v60, %v4109_v21  ;;  %v12497_v49 = vld [vmem:[#allocation23_spill] sm:$0xff] }
 0x4c5   : > { %v12490_v11 = vcombine.high %v12488_v14, %v12489_v41  ;;  %12491 = vst [vmem:[#allocation15_spill] sm:$0xff] %v10729_v2  ;;  %v12495_v52 = vcombine.low %v10498_v48, %v10476_v3  ;;  %v10746_v14 = vrot.slane %v4978_v5, %v7701_v10  ;;  %v3787_v5 = vcombine.high %v3735_v34, %v10677_v55  ;;  %v12504_v34 = vld [vmem:[#allocation68_spill] sm:$0xff] }
 0x4c6   : > { %v10713_v33 = vpop.permute.xlu0 %5186  ;;  %v10716_v7 = vpop.permute.xlu1 %4824  ;;  %v4159_v55 = vcombine.high %v4093_v60, %v4109_v21 }
 0x4c7   : > { %12487 = vst [vmem:[#allocation63_spill] sm:$0xff] %v10716_v7  ;;  %v7303_v20 = vpack.i.bf16 %v3785_v50, %v12490_v11  ;;  %v5026_v56 = vcombine.low %v10684_v16, %v10716_v7  ;;  %v4061_v50 = vrot.slane %v4047_v54, %v7701_v10  ;;  %v12492_v11 = vld [vmem:[#allocation25_spill] sm:$0xff]  ;;  %v10743_v44 = vrot.slane %v12495_v52, %v8090_v36  ;;  %v12498_v16 = vld [vmem:[#allocation24_spill] sm:$0xff] }
 0x4c8   : > { %7329 = vrot.lane.b32.xlu0 %v7328_v19, %s7637_s13  ;;  %v12494_v41 = vcombine.low %v12492_v11, %v12493_v43  ;;  %12496 = vst [vmem:[#allocation19_spill] sm:$0xff] %v10746_v14  ;;  %v10749_v19 = vrot.slane %v5010_v26, %v7701_v10  ;;  %v12499_v52 = vcombine.low %v12497_v49, %v12498_v16 }
 0x4c9   : > { %7304 = vrot.lane.b32.xlu1 %v7303_v20, %s7637_s13  ;;  %v10752_v54 = vrot.slane %v5026_v56, %v7701_v10  ;;  %v4585_v26 = vcombine.high %v10743_v44, %v10662_v9  ;;  %v12500_v56 = vcombine.high %v10542_v6, %v10524_v63  ;;  %v4126_v8 = vcombine.low %v4061_v50, %v4077_v35 }
 0x4ca   : > { %v7333_v24 = vpack.i.bf16 %v3790_v28, %v12494_v41  ;;  %v10754_v20 = vpop.permute.xlu0 %5194  ;;  %v4176_v28 = vcombine.low %v10726_v22, %v10707_v30  ;;  %v10758_v41 = vpop.permute.xlu1 %5190  ;;  %v7308_v7 = vpack.i.bf16 %v3786_v38, %v12499_v52  ;;  %v5042_v31 = vcombine.low %v10746_v14, %v10729_v2  ;;  %v12503_v14 = vld [vmem:[#allocation71_spill] sm:$0xff] }
 0x4cb   : > { %v10770_v42 = vrot.slane %v12500_v56, %v8090_v36  ;;  %v5074_v15 = vcombine.low %v10749_v19, %v10752_v54  ;;  %v10780_v38 = vrot.slane %v4158_v59, %v8090_v36  ;;  %v3791_v63 = vcombine.high %v10665_v58, %v10653_v61 }
 0x4cc   : > { %7334 = vrot.lane.b32.xlu0 %v7333_v24, %s7635_s12  ;;  %v12501_v6 = vcombine.high %v10498_v48, %v10476_v3  ;;  %v12502_v24 = vld [vmem:[#allocation61_spill] sm:$0xff]  ;;  %v3841_v21 = vcombine.high %v12504_v34, %v12503_v14  ;;  %v12505_v61 = vcombine.low %v10629_v12, %v10606_v45  ;;  %v12506_v3 = vcombine.high %v12497_v49, %v12498_v16  ;;  %v12507_v34 = vld [vmem:[#allocation59_spill] sm:$0xff] }
 0x4cd   : > { %7309 = vrot.lane.b32.xlu1 %v7308_v7, %s7633_s10  ;;  %v3809_v56 = vcombine.high %v12502_v24, %v10387_v53  ;;  %v10796_v60 = vrot.slane %v5074_v15, %v8090_v36  ;;  %v4127_v7 = vcombine.high %v4061_v50, %v4077_v35  ;;  %v3788_v53 = vcombine.low %v10596_v23, %v10575_v13  ;;  %v12508_v24 = vld [vmem:[#allocation66_spill] sm:$0xff]  ;;  %v12512_v49 = vld [vmem:[#allocation11_spill] sm:$0xff] }
 0x4ce   : > { %v10789_v52 = vrot.slane %v12501_v6, %v8090_v36  ;;  %v10798_v59 = vpop.permute.xlu0 %5202  ;;  %v7338_v58 = vpack.i.bf16 %v12505_v61, %v4176_v28  ;;  %v10803_v2 = vpop.permute.xlu1 %5198  ;;  %v7313_v48 = vpack.i.bf16 %v3787_v5, %v12506_v3  ;;  %v4134_v14 = vrot.slane %v4126_v8, %v8090_v36  ;;  %v12509_v28 = vld [vmem:[#allocation64_spill] sm:$0xff] }
 0x4cf   : > { %v3793_v6 = vcombine.high %v12507_v34, %v10361_v4  ;;  %v3825_v35 = vcombine.high %v12509_v28, %v12508_v24  ;;  %v10818_v50 = vrot.slane %v5042_v31, %v8090_v36  ;;  %v4173_v16 = vrot.slane %v4159_v55, %v8090_v36  ;;  %v12513_v31 = vld [vmem:[#allocation4_spill] sm:$0xff] }
 0x4d0   : > { %v4586_v15 = vcombine.low %v10789_v52, %v10770_v42  ;;  %7339 = vrot.lane.b32.xlu0 %v7338_v58, %s7633_s10  ;;  %v12510_v23 = vcombine.high %v12492_v11, %v12493_v43  ;;  %v12511_v4 = vcombine.high %v10154_v25, %v10022_v40  ;;  %v12514_v5 = vcombine.high %v12512_v49, %v12513_v31  ;;  %v12517_v34 = vld [vmem:[#allocation8_spill] sm:$0xff] }
 0x4d1   : > { %7314 = vrot.lane.b32.xlu1 %v7313_v48, %s7638_s14  ;;  %v10839_v55 = vrot.slane %v3809_v56, %v7701_v10  ;;  %v10842_v58 = vrot.slane %v3841_v21, %v7701_v10  ;;  %v4179_v11 = vcombine.high %v4134_v14, %v10780_v38  ;;  %v4141_v25 = vrot.slane %v4127_v7, %v8090_v36  ;;  %v12516_v21 = vld [vmem:[#allocation12_spill] sm:$0xff] }
 0x4d2   : > { %v7343_v13 = vpack.i.bf16 %v3791_v63, %v12510_v23  ;;  %v10830_v8 = vrot.slane %v12511_v4, %v8090_v36  ;;  %v10836_v61 = vrot.slane %v12514_v5, %v8090_v36  ;;  %v10844_v43 = vpop.permute.xlu0 %5210  ;;  %v10850_v63 = vpop.permute.xlu1 %5206  ;;  %v12515_v3 = vcombine.low %v12470_v37, %v12471_v0  ;;  %v12519_v37 = vld [vmem:[#allocation45_spill] sm:$0xff]  ;;  %v12543_v49 = vld [vmem:[#allocation36_spill] sm:$0xff] }
 0x4d3   : > { %v4177_v56 = vcombine.high %v10726_v22, %v10707_v30  ;;  %v12518_v24 = vcombine.high %v12516_v21, %v12517_v34  ;;  %v10864_v23 = vrot.slane %v3793_v6, %v7701_v10  ;;  %v3839_v7 = vrot.slane %v3825_v35, %v7701_v10 }
 0x4d4   : > { %v7318_v48 = vpack.i.bf16 %v3788_v53, %v12515_v3  ;;  %7344 = vrot.lane.b32.xlu0 %v7343_v13, %s7640_s16  ;;  %v4587_v0 = vcombine.high %v10789_v52, %v10770_v42  ;;  %v12520_v53 = vld [vmem:[#allocation48_spill] sm:$0xff]  ;;  %v4178_v22 = vcombine.low %v4134_v14, %v10780_v38  ;;  %v4180_v30 = vcombine.low %v4141_v25, %v4173_v16 }
 0x4d5   : > { %v10861_v28 = vrot.slane %v12518_v24, %v8090_v36  ;;  %v4717_v4 = vcombine.high %v12520_v53, %v12519_v37  ;;  %v12521_v6 = vcombine.high %v10473_v32, %v10455_v57  ;;  %v3873_v42 = vcombine.high %v10864_v23, %v10839_v55 }
 0x4d6   : > { %7319 = vrot.lane.b32.xlu1 %v7318_v48, %s7634_s11  ;;  %v3905_v52 = vcombine.high %v3839_v7, %v10842_v58  ;;  %v10885_v13 = vpop.permute.xlu0 %4794  ;;  %v7358_v31 = vpack.i.bf16 %v4585_v26, %v4179_v11  ;;  %v10889_v14 = vpop.permute.xlu1 %5214  ;;  %v12522_v5 = vcombine.high %v10629_v12, %v10606_v45  ;;  %v12523_v24 = vcombine.low %v10473_v32, %v10455_v57 }
 0x4d7   : > { %v10880_v35 = vrot.slane %v12521_v6, %v8090_v36  ;;  %v12524_v26 = vcombine.low %v12516_v21, %v12517_v34  ;;  %v3857_v40 = vcombine.high %v10460_v46, %v10443_v39  ;;  %v3872_v45 = vcombine.low %v10864_v23, %v10839_v55 }
 0x4d8   : > { %v7348_v3 = vpack.i.bf16 %v12522_v5, %v4177_v56  ;;  %v10900_v6 = vrot.slane %v12523_v24, %v8090_v36  ;;  %v5416_v12 = vcombine.low %v10850_v63, %v10889_v14  ;;  %7359 = vrot.lane.b32.xlu0 %v7358_v31, %s7639_s15  ;;  %v4181_v57 = vcombine.high %v4141_v25, %v4173_v16  ;;  %v12531_v5 = vld [vmem:[#allocation87_spill] sm:$0xff]  ;;  %v12532_v24 = vld [vmem:[#allocation76_spill] sm:$0xff] }
 0x4d9   : > { %v10906_v11 = vrot.slane %v12524_v26, %v8090_v36  ;;  %v5384_v32 = vcombine.low %v10758_v41, %v10803_v2  ;;  %v5400_v56 = vcombine.low %v10798_v59, %v10844_v43  ;;  %v12525_v39 = vcombine.low %v10743_v44, %v10662_v9  ;;  %v12533_v26 = vld [vmem:[#allocation74_spill] sm:$0xff] }
 0x4da   : > { %7349 = vrot.lane.b32.xlu1 %v7348_v3, %s7638_s14  ;;  %v7363_v21 = vpack.i.bf16 %v4586_v15, %v4180_v30  ;;  %v10924_v55 = vrot.slane %v3873_v42, %v8090_v36  ;;  %v3889_v34 = vcombine.high %v10446_v51, %v10432_v1  ;;  %v10929_v16 = vrot.slane %v3905_v52, %v8090_v36  ;;  %v10933_v23 = vpop.permute.xlu0 %4802  ;;  %v10942_v15 = vpop.permute.xlu1 %4798  ;;  %v12528_v30 = vld [vmem:[#allocation75_spill] sm:$0xff]  ;;  %v12529_v42 = vld [vmem:[#allocation73_spill] sm:$0xff] }
 0x4db   : > { %v7353_v46 = vpack.i.bf16 %v12525_v39, %v4178_v22  ;;  %v4231_v25 = vcombine.high %v10505_v27, %v10548_v47  ;;  %v4279_v31 = vcombine.high %v10617_v29, %v10591_v17  ;;  %v5368_v9 = vcombine.low %v10713_v33, %v10754_v20  ;;  %v12526_v22 = vld [vmem:[#allocation72_spill] sm:$0xff]  ;;  %v12527_v27 = vld [vmem:[#allocation70_spill] sm:$0xff]  ;;  %v12530_v29 = vld [vmem:[#allocation85_spill] sm:$0xff] }
 0x4dc   : > { %v10940_v44 = vrot.slane %v5416_v12, %v7701_v10  ;;  %v4311_v1 = vcombine.high %v10700_v18, %v10682_v62  ;;  %v3904_v51 = vcombine.low %v3839_v7, %v10842_v58  ;;  %v4183_v47 = vcombine.high %v12527_v27, %v12526_v22  ;;  %7364 = vrot.lane.b32.xlu0 %v7363_v21, %s7635_s12  ;;  %v12544_v62 = vld [vmem:[#allocation37_spill] sm:$0xff] }
 0x4dd   : > { %v4199_v52 = vcombine.high %v12529_v42, %v12528_v30  ;;  %v7368_v17 = vpack.i.bf16 %v4587_v0, %v4181_v57  ;;  %v4247_v3 = vcombine.high %v12531_v5, %v12530_v29  ;;  %v4215_v12 = vcombine.high %v12533_v26, %v12532_v24  ;;  %v12535_v0 = vld [vmem:[#allocation77_spill] sm:$0xff]  ;;  %v12536_v57 = vld [vmem:[#allocation78_spill] sm:$0xff]  ;;  %v12538_v26 = vld [vmem:[#allocation31_spill] sm:$0xff] }
 0x4de   : > { %v10957_v39 = vrot.slane %v5384_v32, %v7701_v10  ;;  %v10960_v58 = vrot.slane %v5400_v56, %v7701_v10  ;;  %7354 = vrot.lane.b32.xlu1 %v7353_v46, %s7634_s11  ;;  %v3903_v7 = vrot.slane %v3889_v34, %v8090_v36  ;;  %v4245_v22 = vrot.slane %v4231_v25, %v7701_v10  ;;  %v10965_v21 = vpop.permute.xlu0 %4810  ;;  %v10979_v34 = vpop.permute.xlu1 %4806 }
 0x4df   : > { %12534 = vst [vmem:[#allocation55_spill] sm:$0xff] %v10965_v21  ;;  %v3921_v27 = vcombine.high %v12536_v57, %v12535_v0  ;;  %v3926_v30 = vcombine.low %v10924_v55, %v10929_v16  ;;  %v10972_v32 = vrot.slane %v4279_v31, %v8090_v36  ;;  %v10975_v56 = vrot.slane %v5368_v9, %v7701_v10  ;;  %v12539_v9 = vld [vmem:[#allocation32_spill] sm:$0xff] }
 0x4e0   : > { %v5464_v46 = vcombine.low %v10960_v58, %v10940_v44  ;;  %v7398_v25 = vpack.i.bf16 %v4717_v4, %v4311_v1  ;;  %v3871_v42 = vrot.slane %v3857_v40, %v8090_v36  ;;  %v10983_v29 = vrot.slane %v3904_v51, %v8090_v36  ;;  %7369 = vrot.lane.b32.xlu0 %v7368_v17, %s7640_s16  ;;  %v12554_v57 = vld [vmem:[#allocation80_spill] sm:$0xff] }
 0x4e1   : > { %v4213_v5 = vrot.slane %v4199_v52, %v7701_v10  ;;  %v10992_v24 = vrot.slane %v4247_v3, %v8090_v36  ;;  %v4229_v4 = vrot.slane %v4215_v12, %v7701_v10  ;;  %v5432_v40 = vcombine.low %v10975_v56, %v10957_v39 }
 0x4e2   : > { %7399 = vrot.lane.b32.xlu1 %v7398_v25, %s7637_s13  ;;  %v3880_v1 = vrot.slane %v3872_v45, %v8090_v36  ;;  %v4197_v51 = vrot.slane %v4183_v47, %v7701_v10  ;;  %v11000_v17 = vpop.permute.xlu0 %4818  ;;  %v12540_v31 = vcombine.high %v12538_v26, %v12539_v9  ;;  %v3922_v48 = vcombine.low %v3871_v42, %v3903_v7  ;;  %v11008_v12 = vpop.permute.xlu1 %4814 }
 0x4e3   : > { %12537 = vst [vmem:[#allocation52_spill] sm:$0xff] %v11000_v17  ;;  %v4295_v3 = vcombine.high %v4229_v4, %v4245_v22  ;;  %v11006_v38 = vrot.slane %v5464_v46, %v8090_v36  ;;  %12542 = vst [vmem:[#allocation51_spill] sm:$0xff] %v11008_v12  ;;  %v12545_v25 = vcombine.low %v12543_v49, %v12544_v62 }
 0x4e4   : > { %v7373_v52 = vpack.i.bf16 %v3921_v27, %v12540_v31  ;;  %v4312_v45 = vcombine.low %v10992_v24, %v10972_v32  ;;  %v4858_v47 = vcombine.low %v10942_v15, %v10979_v34  ;;  %v3923_v27 = vcombine.high %v3871_v42, %v3903_v7  ;;  %v12547_v42 = vld [vmem:[#allocation34_spill] sm:$0xff] }
 0x4e5   : > { %12541 = vst [vmem:[#allocation54_spill] sm:$0xff] %v11006_v38  ;;  %v7403_v18 = vpack.i.bf16 %v3926_v30, %v12545_v25  ;;  %v3927_v31 = vcombine.high %v10924_v55, %v10929_v16  ;;  %v4263_v37 = vcombine.high %v4197_v51, %v4213_v5  ;;  %v4294_v53 = vcombine.low %v4229_v4, %v4245_v22  ;;  %v12546_v16 = vld [vmem:[#allocation33_spill] sm:$0xff] }
 0x4e6   : > { %7374 = vrot.lane.b32.xlu0 %v7373_v52, %s7637_s13  ;;  %v11023_v9 = vrot.slane %v5432_v40, %v8090_v36  ;;  %v3924_v30 = vcombine.low %v3880_v1, %v10983_v29  ;;  %v4262_v25 = vcombine.low %v4197_v51, %v4213_v5  ;;  %v4842_v52 = vcombine.low %v10885_v13, %v10933_v23  ;;  %v11031_v55 = vpop.permute.xlu0 %5184  ;;  %v12549_v40 = vld [vmem:[#allocation88_spill] sm:$0xff]  ;;  %v11041_v0 = vpop.permute.xlu1 %4822 }
 0x4e7   : > { %7404 = vrot.lane.b32.xlu1 %v7403_v18, %s7635_s12  ;;  %v4874_v7 = vcombine.low %v10965_v21, %v11000_v17  ;;  %v12548_v46 = vcombine.low %v12546_v16, %v12547_v42  ;;  %v11037_v4 = vrot.slane %v4295_v3, %v8090_v36  ;;  %v12550_v18 = vld [vmem:[#allocation82_spill] sm:$0xff]  ;;  %v12551_v5 = vcombine.low %v10830_v8, %v10836_v61 }
 0x4e8   : > { %v4995_v26 = vcombine.high %v12550_v18, %v12549_v40  ;;  %v11049_v21 = vrot.slane %v4858_v47, %v7701_v10  ;;  %v12552_v3 = vcombine.high %v12546_v16, %v12547_v42  ;;  %v3925_v40 = vcombine.high %v3880_v1, %v10983_v29  ;;  %v12559_v42 = vld [vmem:[#allocation63_spill] sm:$0xff] }
 0x4e9   : > { %v7378_v22 = vpack.i.bf16 %v3922_v48, %v12548_v46  ;;  %v7408_v51 = vpack.i.bf16 %v12551_v5, %v4312_v45  ;;  %v4890_v48 = vcombine.low %v11008_v12, %v11041_v0  ;;  %v4277_v18 = vrot.slane %v4263_v37, %v8090_v36  ;;  %v12553_v5 = vld [vmem:[#allocation27_spill] sm:$0xff] }
 0x4ea   : > { %v7383_v46 = vpack.i.bf16 %v3923_v27, %v12552_v3  ;;  %v4302_v45 = vrot.slane %v4294_v53, %v8090_v36  ;;  %v4979_v17 = vcombine.high %v12554_v57, %v12553_v5  ;;  %v12555_v47 = vcombine.high %v12543_v49, %v12544_v62  ;;  %v11075_v37 = vpop.permute.xlu0 %5192  ;;  %v11083_v62 = vpop.permute.xlu1 %5188  ;;  %v12556_v49 = vld [vmem:[#allocation38_spill] sm:$0xff] }
 0x4eb   : > { %7379 = vrot.lane.b32.xlu0 %v7378_v22, %s7633_s10  ;;  %7409 = vrot.lane.b32.xlu1 %v7408_v51, %s7633_s10  ;;  %v11067_v22 = vrot.slane %v4842_v52, %v7701_v10  ;;  %v11070_v27 = vrot.slane %v4874_v7, %v7701_v10  ;;  %v11073_v29 = vrot.slane %v4890_v48, %v7701_v10  ;;  %v12560_v51 = vld [vmem:[#allocation57_spill] sm:$0xff]  ;;  %v12563_v5 = vld [vmem:[#allocation86_spill] sm:$0xff] }
 0x4ec   : > { %v7413_v12 = vpack.i.bf16 %v3927_v31, %v12555_v47  ;;  %v4313_v53 = vcombine.high %v10992_v24, %v10972_v32  ;;  %v4270_v57 = vrot.slane %v4262_v25, %v8090_v36  ;;  %v11081_v1 = vrot.slane %v4995_v26, %v7701_v10  ;;  %v12557_v31 = vld [vmem:[#allocation39_spill] sm:$0xff] }
 0x4ed   : > { %v12558_v52 = vcombine.low %v12556_v49, %v12557_v31  ;;  %v4316_v16 = vcombine.low %v4277_v18, %v11037_v4  ;;  %v5027_v48 = vcombine.high %v12560_v51, %v12559_v42  ;;  %v4906_v3 = vcombine.low %v11067_v22, %v11049_v21 }
 0x4ee   : > { %v4938_v32 = vcombine.low %v11070_v27, %v11073_v29  ;;  %v12561_v24 = vcombine.high %v12556_v49, %v12557_v31  ;;  %v11100_v25 = vrot.slane %v4979_v17, %v7701_v10  ;;  %v4314_v42 = vcombine.low %v4270_v57, %v4302_v45  ;;  %v11112_v49 = vpop.permute.xlu0 %5200 }
 0x4ef   : > { %v7388_v7 = vpack.i.bf16 %v3924_v30, %v12558_v52  ;;  %7384 = vrot.lane.b32.xlu0 %v7383_v46, %s7638_s14  ;;  %v12562_v30 = vld [vmem:[#allocation53_spill] sm:$0xff]  ;;  %v5075_v52 = vcombine.high %v10749_v19, %v10752_v54  ;;  %7414 = vrot.lane.b32.xlu1 %v7413_v12, %s7640_s16  ;;  %v5385_v51 = vcombine.high %v10758_v41, %v10803_v2  ;;  %v11124_v41 = vpop.permute.xlu1 %5196 }
 0x4f0   : > { %v7393_v26 = vpack.i.bf16 %v3925_v40, %v12561_v24  ;;  %v5011_v47 = vcombine.high %v12563_v5, %v12562_v30  ;;  %v11110_v46 = vrot.slane %v4938_v32, %v8090_v36  ;;  %v12565_v17 = vcombine.high %v10830_v8, %v10836_v61  ;;  %v12566_v24 = vld [vmem:[#allocation15_spill] sm:$0xff] }
 0x4f1   : > { %v4317_v31 = vcombine.high %v4277_v18, %v11037_v4  ;;  %v12567_v30 = vld [vmem:[#allocation19_spill] sm:$0xff]  ;;  %v5058_v54 = vcombine.low %v11100_v25, %v11081_v1  ;;  %v5417_v2 = vcombine.high %v10850_v63, %v10889_v14  ;;  %v12568_v12 = vcombine.low %v10880_v35, %v10861_v28 }
 0x4f2   : > { %12564 = vst [vmem:[#allocation62_spill] sm:$0xff] %v11110_v46  ;;  %v7418_v40 = vpack.i.bf16 %v12565_v17, %v4313_v53  ;;  %v5043_v19 = vcombine.high %v12567_v30, %v12566_v24  ;;  %v11130_v8 = vrot.slane %v5027_v48, %v7701_v10  ;;  %v5369_v61 = vcombine.high %v10713_v33, %v10754_v20 }
 0x4f3   : > { %v7433_v32 = vpack.i.bf16 %v12568_v12, %v4316_v16  ;;  %v11135_v4 = vrot.slane %v4906_v3, %v8090_v36  ;;  %7389 = vrot.lane.b32.xlu0 %v7388_v7, %s7634_s11  ;;  %v4315_v18 = vcombine.high %v4270_v57, %v4302_v45  ;;  %v11139_v63 = vrot.slane %v5011_v47, %v7701_v10  ;;  %v5209_v45 = vpop.permute.xlu0 %5208 }
 0x4f4   : > { %v11142_v14 = vrot.slane %v5075_v52, %v8090_v36  ;;  %v5401_v53 = vcombine.high %v10798_v59, %v10844_v43  ;;  %v5465_v16 = vcombine.high %v10960_v58, %v10940_v44  ;;  %7419 = vrot.lane.b32.xlu1 %v7418_v40, %s7638_s14  ;;  %v11150_v33 = vrot.slane %v5385_v51, %v7701_v10  ;;  %v5205_v58 = vpop.permute.xlu1 %5204 }
 0x4f5   : > { %12569 = vst [vmem:[#allocation65_spill] sm:$0xff] %v11135_v4  ;;  %v5248_v20 = vcombine.low %v11083_v62, %v11124_v41  ;;  %v12570_v57 = vcombine.low %v10900_v6, %v10906_v11  ;;  %v11160_v59 = vrot.slane %v5043_v19, %v8090_v36  ;;  %v5433_v43 = vcombine.high %v10975_v56, %v10957_v39 }
 0x4f6   : > { %v11165_v44 = vrot.slane %v5417_v2, %v7701_v10  ;;  %v12571_v3 = vcombine.high %v10880_v35, %v10861_v28  ;;  %v5090_v47 = vcombine.low %v11139_v63, %v11130_v8  ;;  %v11173_v52 = vrot.slane %v5369_v61, %v7701_v10 }
 0x4f7   : > { %v7423_v7 = vpack.i.bf16 %v12570_v57, %v4314_v42  ;;  %v5232_v42 = vcombine.low %v11031_v55, %v11075_v37  ;;  %7394 = vrot.lane.b32.xlu0 %v7393_v26, %s7639_s15  ;;  %v12572_v39 = vcombine.high %v10900_v6, %v10906_v11  ;;  %v11182_v51 = vrot.slane %v5401_v53, %v7701_v10  ;;  %v11196_v40 = vpop.permute.xlu0 %5974 }
 0x4f8   : > { %v7438_v5 = vpack.i.bf16 %v12571_v3, %v4317_v31  ;;  %v11185_v28 = vrot.slane %v5465_v16, %v8090_v36  ;;  %7434 = vrot.lane.b32.xlu1 %v7433_v32, %s7635_s12  ;;  %v5107_v35 = vcombine.high %v10818_v50, %v10796_v60  ;;  %v5108_v17 = vcombine.low %v11160_v59, %v11142_v14  ;;  %v5213_v2 = vpop.permute.xlu1 %5212  ;;  %v12573_v16 = vld [vmem:[#allocation51_spill] sm:$0xff] }
 0x4f9   : > { %v7428_v56 = vpack.i.bf16 %v12572_v39, %v4315_v18  ;;  %v5448_v26 = vcombine.low %v11173_v52, %v11150_v33  ;;  %v5256_v6 = vrot.slane %v5248_v20, %v7701_v10  ;;  %v5264_v11 = vcombine.low %v11112_v49, %v5209_v45  ;;  %v12575_v3 = vld [vmem:[#allocation55_spill] sm:$0xff] }
 0x4fa   : > { %v5109_v31 = vcombine.high %v11160_v59, %v11142_v14  ;;  %v11201_v24 = vrot.slane %v5433_v43, %v8090_v36  ;;  %v5480_v30 = vcombine.low %v11182_v51, %v11165_v44  ;;  %v4843_v19 = vcombine.high %v10885_v13, %v10933_v23 }
 0x4fb   : > { %v5497_v12 = vcombine.high %v11023_v9, %v11006_v38  ;;  %v4859_v32 = vcombine.high %v10942_v15, %v10979_v34  ;;  %v5240_v61 = vrot.slane %v5232_v42, %v7701_v10  ;;  %v5280_v18 = vcombine.low %v5205_v58, %v5213_v2  ;;  %7424 = vrot.lane.b32.xlu0 %v7423_v7, %s7634_s11  ;;  %v12574_v7 = vld [vmem:[#allocation52_spill] sm:$0xff] }
 0x4fc   : > { %v5281_v53 = vcombine.high %v5205_v58, %v5213_v2  ;;  %v4891_v20 = vcombine.high %v12573_v16, %v11041_v0  ;;  %v5249_v57 = vcombine.high %v11083_v62, %v11124_v41  ;;  %v5265_v13 = vcombine.high %v11112_v49, %v5209_v45  ;;  %7439 = vrot.lane.b32.xlu1 %v7438_v5, %s7640_s16  ;;  %v11223_v58 = vpop.permute.xlu0 %5982  ;;  %v11234_v45 = vpop.permute.xlu1 %5978 }
 0x4fd   : > { %v5498_v23 = vcombine.low %v11201_v24, %v11185_v28  ;;  %v5296_v15 = vcombine.low %v5240_v61, %v5256_v6  ;;  %v5272_v34 = vrot.slane %v5264_v11, %v7701_v10  ;;  %v5288_v43 = vrot.slane %v5280_v18, %v7701_v10 }
 0x4fe   : > { %v5499_v0 = vcombine.high %v11201_v24, %v11185_v28  ;;  %v4875_v62 = vcombine.high %v12575_v3, %v12574_v7  ;;  %v5233_v49 = vcombine.high %v11031_v55, %v11075_v37  ;;  %v11232_v41 = vrot.slane %v5281_v53, %v7701_v10 }
 0x4ff   : > { %v7443_v5 = vpack.i.bf16 %v5497_v12, %v5107_v35  ;;  %v4939_v42 = vcombine.high %v11070_v27, %v11073_v29  ;;  %v5297_v39 = vcombine.high %v5240_v61, %v5256_v6  ;;  %v5328_v11 = vcombine.low %v5272_v34, %v5288_v43  ;;  %7429 = vrot.lane.b32.xlu0 %v7428_v56, %s7639_s15 }
 0x500   : > { %v5329_v2 = vcombine.high %v5272_v34, %v5288_v43  ;;  %v11240_v28 = vrot.slane %v4859_v32, %v7701_v10  ;;  %v11243_v24 = vrot.slane %v4891_v20, %v7701_v10  ;;  %v11246_v55 = vrot.slane %v5249_v57, %v7701_v10  ;;  %v11261_v6 = vpop.permute.xlu0 %5990 }
 0x501   : > { %v11249_v37 = vrot.slane %v5265_v13, %v7701_v10  ;;  %7444 = vrot.lane.b32.xlu1 %v7443_v5, %s7637_s13  ;;  %v4907_v27 = vcombine.high %v11067_v22, %v11049_v21  ;;  %v11255_v29 = vrot.slane %v5296_v15, %v8090_v36  ;;  %v11258_v56 = vrot.slane %v5328_v11, %v8090_v36  ;;  %v11271_v21 = vpop.permute.xlu1 %5986 }
 0x502   : > { %v5343_v35 = vrot.slane %v5329_v2, %v8090_v36  ;;  %v11264_v12 = vrot.slane %v4875_v62, %v7701_v10  ;;  %v11267_v32 = vrot.slane %v5233_v49, %v7701_v10  ;;  %v7453_v22 = vpack.i.bf16 %v5498_v23, %v5108_v17 }
 0x503   : > { %12576 = vst [vmem:[#allocation18_spill] sm:$0xff] %v11255_v29  ;;  %12577 = vst [vmem:[#allocation17_spill] sm:$0xff] %v11258_v56  ;;  %v5344_v61 = vcombine.low %v11249_v37, %v11232_v41  ;;  %v4953_v18 = vrot.slane %v4939_v42, %v8090_v36  ;;  %v5311_v53 = vrot.slane %v5297_v39, %v8090_v36 }
 0x504   : > { %v4971_v16 = vcombine.high %v11135_v4, %v11110_v46  ;;  %v5361_v20 = vcombine.high %v11255_v29, %v11258_v56  ;;  %v11280_v57 = vrot.slane %v5480_v30, %v8090_v36  ;;  %v11283_v13 = vrot.slane %v4843_v19, %v7701_v10  ;;  %v11293_v43 = vpop.permute.xlu0 %5998  ;;  %v12589_v29 = vld [vmem:[#allocation84_spill] sm:$0xff] }
 0x505   : > { %v4954_v15 = vcombine.low %v11264_v12, %v11243_v24  ;;  %v5312_v17 = vcombine.low %v11267_v32, %v11246_v55  ;;  %7454 = vrot.lane.b32.xlu1 %v7453_v22, %s7633_s10  ;;  %v4921_v23 = vrot.slane %v4907_v27, %v8090_v36  ;;  %v6172_v34 = vcombine.low %v11234_v45, %v11271_v21  ;;  %v11300_v62 = vpop.permute.xlu1 %5994 }
 0x506   : > { %v7448_v30 = vpack.i.bf16 %v5361_v20, %v4971_v16  ;;  %v5362_v7 = vcombine.low %v5311_v53, %v5343_v35  ;;  %v4922_v19 = vcombine.low %v11283_v13, %v11240_v28  ;;  %v11298_v3 = vrot.slane %v5344_v61, %v8090_v36  ;;  %v12578_v20 = vld [vmem:[#allocation6_spill] sm:$0xff] }
 0x507   : > { %v7463_v49 = vpack.i.bf16 %v5499_v0, %v5109_v31  ;;  %v5363_v5 = vcombine.high %v5311_v53, %v5343_v35  ;;  %v5098_v42 = vrot.slane %v5090_v47, %v8090_v36  ;;  %v5456_v39 = vrot.slane %v5448_v26, %v8090_v36 }
 0x508   : > { %v6156_v11 = vcombine.low %v11196_v40, %v11223_v58  ;;  %7449 = vrot.lane.b32.xlu0 %v7448_v30, %s7637_s13  ;;  %v4972_v2 = vcombine.low %v4921_v23, %v4953_v18  ;;  %v5066_v14 = vrot.slane %v5058_v54, %v8090_v36  ;;  %v11321_v59 = vrot.slane %v4954_v15, %v8090_v36  ;;  %v11332_v27 = vpop.permute.xlu0 %5972  ;;  %v12579_v15 = vld [vmem:[#allocation9_spill] sm:$0xff] }
 0x509   : > { %v11324_v47 = vrot.slane %v5312_v17, %v8090_v36  ;;  %7464 = vrot.lane.b32.xlu1 %v7463_v49, %s7638_s14  ;;  %v4973_v26 = vcombine.high %v4921_v23, %v4953_v18  ;;  %v11328_v31 = vrot.slane %v6172_v34, %v7701_v10  ;;  %v6188_v0 = vcombine.low %v11261_v6, %v11293_v43  ;;  %v11336_v22 = vpop.permute.xlu1 %6002  ;;  %v12582_v49 = vld [vmem:[#allocation5_spill] sm:$0xff] }
 0x50a   : > { %v7458_v35 = vpack.i.bf16 %v5362_v7, %v4972_v2  ;;  %v5500_v54 = vcombine.low %v5456_v39, %v11280_v57  ;;  %v4930_v61 = vrot.slane %v4922_v19, %v8090_v36  ;;  %v12580_v17 = vcombine.high %v12578_v20, %v12579_v15  ;;  %v12581_v19 = vld [vmem:[#allocation3_spill] sm:$0xff]  ;;  %v12583_v2 = vld [vmem:[#allocation16_spill] sm:$0xff] }
 0x50b   : > { %v7468_v53 = vpack.i.bf16 %v5363_v5, %v4973_v26  ;;  %v5364_v16 = vcombine.low %v11324_v47, %v11298_v3  ;;  %v11349_v34 = vrot.slane %v6156_v11, %v7701_v10  ;;  %v6204_v30 = vcombine.low %v11300_v62, %v11336_v22  ;;  %v12584_v26 = vld [vmem:[#allocation7_spill] sm:$0xff] }
 0x50c   : > { %v11346_v23 = vrot.slane %v12580_v17, %v7701_v10  ;;  %7459 = vrot.lane.b32.xlu0 %v7458_v35, %s7633_s10  ;;  %v5110_v7 = vcombine.low %v5066_v14, %v5098_v42  ;;  %v5663_v5 = vcombine.high %v12582_v49, %v12581_v19  ;;  %v5679_v48 = vcombine.high %v12584_v26, %v12583_v2  ;;  %v11365_v18 = vpop.permute.xlu0 %5980  ;;  %v12585_v19 = vld [vmem:[#allocation81_spill] sm:$0xff]  ;;  %v12586_v49 = vld [vmem:[#allocation83_spill] sm:$0xff]  ;;  %v12587_v2 = vld [vmem:[#allocation40_spill] sm:$0xff] }
 0x50d   : > { %7469 = vrot.lane.b32.xlu1 %v7468_v53, %s7638_s14  ;;  %v4974_v20 = vcombine.low %v4930_v61, %v11321_v59  ;;  %v5501_v15 = vcombine.high %v5456_v39, %v11280_v57  ;;  %v6220_v11 = vcombine.low %v11349_v34, %v11328_v31  ;;  %v6196_v17 = vrot.slane %v6188_v0, %v7701_v10  ;;  %v12588_v26 = vld [vmem:[#allocation43_spill] sm:$0xff]  ;;  %v11373_v57 = vpop.permute.xlu1 %5976 }
 0x50e   : > { %v6212_v35 = vrot.slane %v6204_v30, %v7701_v10  ;;  %v7473_v46 = vpack.i.bf16 %v5500_v54, %v5110_v7  ;;  %v5695_v53 = vcombine.high %v12588_v26, %v12587_v2  ;;  %v5481_v56 = vcombine.high %v11182_v51, %v11165_v44 }
 0x50f   : > { %v7478_v39 = vpack.i.bf16 %v5364_v16, %v4974_v20  ;;  %v5111_v54 = vcombine.high %v5066_v14, %v5098_v42  ;;  %v11381_v7 = vrot.slane %v5663_v5, %v7701_v10  ;;  %v11384_v2 = vrot.slane %v5679_v48, %v7701_v10  ;;  %v12592_v5 = vld [vmem:[#allocation29_spill] sm:$0xff]  ;;  %v12593_v20 = vld [vmem:[#allocation30_spill] sm:$0xff] }
 0x510   : > { %v6252_v38 = vcombine.low %v6196_v17, %v6212_v35  ;;  %7474 = vrot.lane.b32.xlu0 %v7473_v46, %s7634_s11  ;;  %v5091_v44 = vcombine.high %v11139_v63, %v11130_v8  ;;  %v5449_v51 = vcombine.high %v11173_v52, %v11150_v33  ;;  %v11392_v16 = vrot.slane %v6220_v11, %v8090_v36  ;;  %v11397_v42 = vpop.permute.xlu0 %5988 }
 0x511   : > { %7479 = vrot.lane.b32.xlu1 %v7478_v39, %s7634_s11  ;;  %v7483_v14 = vpack.i.bf16 %v5501_v15, %v5111_v54  ;;  %v5365_v48 = vcombine.high %v11324_v47, %v11298_v3  ;;  %v5059_v8 = vcombine.high %v11100_v25, %v11081_v1  ;;  %v5495_v63 = vrot.slane %v5481_v56, %v8090_v36  ;;  %v11404_v52 = vpop.permute.xlu1 %5984  ;;  %v12595_v47 = vld [vmem:[#allocation46_spill] sm:$0xff]  ;;  %v12596_v1 = vld [vmem:[#allocation49_spill] sm:$0xff]  ;;  %v12600_v15 = vld [vmem:[#allocation28_spill] sm:$0xff] }
 0x512   : > { %12590 = vst [vmem:[#allocation25_spill] sm:$0xff] %v11392_v16  ;;  %v11395_v46 = vrot.slane %v6252_v38, %v8090_v36  ;;  %v6253_v33 = vcombine.high %v6196_v17, %v6212_v35  ;;  %v12594_v11 = vcombine.high %v12592_v5, %v12593_v20  ;;  %v4975_v3 = vcombine.high %v4930_v61, %v11321_v59  ;;  %v12597_v17 = vld [vmem:[#allocation35_spill] sm:$0xff]  ;;  %v12598_v35 = vld [vmem:[#allocation41_spill] sm:$0xff] }
 0x513   : > { %v5895_v25 = vcombine.high %v12596_v1, %v12595_v47  ;;  %v5727_v26 = vcombine.high %v12598_v35, %v12597_v17  ;;  %v5105_v39 = vrot.slane %v5091_v44, %v8090_v36  ;;  %v5463_v54 = vrot.slane %v5449_v51, %v8090_v36 }
 0x514   : > { %12591 = vst [vmem:[#allocation26_spill] sm:$0xff] %v11395_v46  ;;  %v11410_v38 = vrot.slane %v12594_v11, %v8090_v36  ;;  %7484 = vrot.lane.b32.xlu0 %v7483_v14, %s7639_s15  ;;  %v6285_v56 = vcombine.high %v11392_v16, %v11395_v46  ;;  %v6221_v5 = vcombine.high %v11349_v34, %v11328_v31  ;;  %v5997_v59 = vpop.permute.xlu0 %5996  ;;  %v12599_v11 = vld [vmem:[#allocation42_spill] sm:$0xff] }
 0x515   : > { %v6036_v14 = vcombine.low %v11373_v57, %v11404_v52  ;;  %v7493_v61 = vpack.i.bf16 %v5365_v48, %v4975_v3  ;;  %v12601_v30 = vcombine.high %v12599_v11, %v12600_v15  ;;  %v5742_v44 = vcombine.low %v11381_v7, %v11384_v2  ;;  %v5993_v31 = vpop.permute.xlu1 %5992  ;;  %v12603_v11 = vld [vmem:[#allocation50_spill] sm:$0xff] }
 0x516   : > { %v7488_v20 = vpack.i.bf16 %v6285_v56, %v5895_v25  ;;  %v5073_v51 = vrot.slane %v5059_v8, %v8090_v36  ;;  %v11438_v17 = vrot.slane %v6253_v33, %v8090_v36  ;;  %v5502_v34 = vcombine.low %v5463_v54, %v5495_v63 }
 0x517   : > { %v11432_v4 = vrot.slane %v12601_v30, %v8090_v36  ;;  %v6020_v48 = vcombine.low %v11332_v27, %v11365_v18  ;;  %v5503_v30 = vcombine.high %v5463_v54, %v5495_v63  ;;  %v11446_v3 = vrot.slane %v5695_v53, %v8090_v36  ;;  %v12602_v54 = vld [vmem:[#allocation47_spill] sm:$0xff] }
 0x518   : > { %7494 = vrot.lane.b32.xlu0 %v7493_v61, %s7639_s15  ;;  %v11449_v25 = vrot.slane %v6221_v5, %v8090_v36  ;;  %7489 = vrot.lane.b32.xlu1 %v7488_v20, %s7637_s13  ;;  %v5112_v8 = vcombine.low %v5073_v51, %v5105_v39  ;;  %v11455_v56 = vrot.slane %v5727_v26, %v8090_v36  ;;  %v11459_v63 = vpop.permute.xlu0 %6362 }
 0x519   : > { %v5896_v15 = vcombine.low %v11432_v4, %v11410_v38  ;;  %v6044_v35 = vrot.slane %v6036_v14, %v7701_v10  ;;  %v6052_v61 = vcombine.low %v11397_v42, %v5997_v59  ;;  %v5113_v53 = vcombine.high %v5073_v51, %v5105_v39  ;;  %v6001_v0 = vpop.permute.xlu1 %6000 }
 0x51a   : > { %v5759_v5 = vcombine.high %v12603_v11, %v12602_v54  ;;  %v4923_v20 = vcombine.high %v11283_v13, %v11240_v28  ;;  %v7498_v46 = vpack.i.bf16 %v5502_v34, %v5112_v8  ;;  %v6286_v33 = vcombine.low %v11449_v25, %v11438_v17 }
 0x51b   : > { %v11468_v26 = vrot.slane %v5742_v44, %v8090_v36  ;;  %v6028_v14 = vrot.slane %v6020_v48, %v7701_v10  ;;  %v6068_v16 = vcombine.low %v5993_v31, %v6001_v0  ;;  %v6069_v47 = vcombine.high %v5993_v31, %v6001_v0 }
 0x51c   : > { %v7518_v1 = vpack.i.bf16 %v5503_v30, %v5113_v53  ;;  %v4955_v39 = vcombine.high %v11264_v12, %v11243_v24  ;;  %v5345_v51 = vcombine.high %v11249_v37, %v11232_v41  ;;  %v6037_v28 = vcombine.high %v11373_v57, %v11404_v52  ;;  %7499 = vrot.lane.b32.xlu1 %v7498_v46, %s7635_s12  ;;  %v11483_v48 = vpop.permute.xlu0 %6366 }
 0x51d   : > { %v6053_v13 = vcombine.high %v11397_v42, %v5997_v59  ;;  %v6205_v44 = vcombine.high %v11300_v62, %v11336_v22  ;;  %v6084_v34 = vcombine.low %v6028_v14, %v6044_v35  ;;  %v6060_v0 = vrot.slane %v6052_v61, %v7701_v10  ;;  %v11492_v12 = vpop.permute.xlu1 %6364 }
 0x51e   : > { %v6076_v31 = vrot.slane %v6068_v16, %v7701_v10  ;;  %v5313_v41 = vcombine.high %v11267_v32, %v11246_v55  ;;  %v6021_v24 = vcombine.high %v11332_v27, %v11365_v18  ;;  %v11490_v37 = vrot.slane %v6069_v47, %v7701_v10 }
 0x51f   : > { %v7508_v57 = vpack.i.bf16 %v6286_v33, %v5896_v15  ;;  %v6157_v62 = vcombine.high %v11196_v40, %v11223_v58  ;;  %v6173_v22 = vcombine.high %v11234_v45, %v11271_v21  ;;  %v6189_v55 = vcombine.high %v11261_v6, %v11293_v43 }
 0x520   : > { %v6116_v16 = vcombine.low %v6060_v0, %v6076_v31  ;;  %v6117_v46 = vcombine.high %v6060_v0, %v6076_v31  ;;  %v11501_v32 = vrot.slane %v6037_v28, %v7701_v10  ;;  %v6085_v27 = vcombine.high %v6028_v14, %v6044_v35  ;;  %v11517_v6 = vpop.permute.xlu0 %6370 }
 0x521   : > { %v11504_v18 = vrot.slane %v6053_v13, %v7701_v10  ;;  %7509 = vrot.lane.b32.xlu1 %v7508_v57, %s7633_s10  ;;  %v11508_v42 = vrot.slane %v5345_v51, %v8090_v36  ;;  %v6219_v40 = vrot.slane %v6205_v44, %v7701_v10  ;;  %v11512_v58 = vrot.slane %v6084_v34, %v8090_v36  ;;  %v11525_v47 = vpop.permute.xlu1 %6368 }
 0x522   : > { %v11515_v45 = vrot.slane %v6116_v16, %v8090_v36  ;;  %v11520_v21 = vrot.slane %v6021_v24, %v7701_v10  ;;  %v6131_v43 = vrot.slane %v6117_v46, %v8090_v36  ;;  %v6287_v59 = vcombine.high %v11449_v25, %v11438_v17 }
 0x523   : > { %v6132_v52 = vcombine.low %v11504_v18, %v11490_v37  ;;  %v11530_v15 = vrot.slane %v4955_v39, %v8090_v36  ;;  %v11533_v30 = vrot.slane %v5313_v41, %v8090_v36  ;;  %v6187_v35 = vrot.slane %v6173_v22, %v7701_v10  ;;  %v12608_v22 = vld [vmem:[#allocation79_spill] sm:$0xff] }
 0x524   : > { %v6148_v8 = vcombine.low %v11512_v58, %v11515_v45  ;;  %v6149_v33 = vcombine.high %v11512_v58, %v11515_v45  ;;  %v6203_v61 = vrot.slane %v6189_v55, %v7701_v10  ;;  %v6099_v53 = vrot.slane %v6085_v27, %v8090_v36  ;;  %v11549_v39 = vpop.permute.xlu0 %6374 }
 0x525   : > { %v6100_v17 = vcombine.low %v11520_v21, %v11501_v32  ;;  %7519 = vrot.lane.b32.xlu1 %v7518_v1, %s7640_s16  ;;  %v11546_v25 = vrot.slane %v4923_v20, %v8090_v36  ;;  %v6171_v14 = vrot.slane %v6157_v62, %v7701_v10  ;;  %v5366_v28 = vcombine.low %v11533_v30, %v11508_v42  ;;  %v11556_v34 = vpop.permute.xlu1 %6372  ;;  %v12607_v62 = vld [vmem:[#allocation22_spill] sm:$0xff] }
 0x526   : > { %v7503_v51 = vpack.i.bf16 %v6149_v33, %v5759_v5  ;;  %v6268_v13 = vcombine.low %v6203_v61, %v6219_v40  ;;  %v11554_v44 = vrot.slane %v6132_v52, %v8090_v36  ;;  %v12604_v1 = vcombine.high %v11432_v4, %v11410_v38 }
 0x527   : > { %v6151_v20 = vcombine.high %v6099_v53, %v6131_v43  ;;  %v5743_v31 = vcombine.high %v11381_v7, %v11384_v2  ;;  %v4976_v5 = vcombine.low %v11546_v25, %v11530_v15  ;;  %v12605_v41 = vcombine.low %v12589_v29, %v11346_v23 }
 0x528   : > { %v7528_v0 = vpack.i.bf16 %v6287_v59, %v12604_v1  ;;  %7504 = vrot.lane.b32.xlu0 %v7503_v51, %s7637_s13  ;;  %v12606_v4 = vcombine.low %v12586_v49, %v12585_v19  ;;  %v6236_v57 = vcombine.low %v6171_v14, %v6187_v35  ;;  %v11579_v7 = vrot.slane %v6100_v17, %v8090_v36  ;;  %v11588_v27 = vpop.permute.xlu0 %6378 }
 0x529   : > { %v11570_v24 = vrot.slane %v12605_v41, %v8090_v36  ;;  %v5761_v2 = vcombine.high %v11446_v3, %v11455_v56  ;;  %v12609_v16 = vcombine.low %v12607_v62, %v12608_v22  ;;  %v6269_v55 = vcombine.high %v6203_v61, %v6219_v40  ;;  %v11593_v51 = vpop.permute.xlu1 %6376 }
 0x52a   : > { %v11576_v38 = vrot.slane %v12606_v4, %v8090_v36  ;;  %7529 = vrot.lane.b32.xlu1 %v7528_v0, %s7638_s14  ;;  %v7513_v52 = vpack.i.bf16 %v5366_v28, %v4976_v5  ;;  %v5760_v59 = vcombine.low %v11446_v3, %v11455_v56  ;;  %v6150_v33 = vcombine.low %v6099_v53, %v6131_v43 }
 0x52b   : > { %v5854_v46 = vrot.slane %v12609_v16, %v8090_v36  ;;  %v6276_v17 = vrot.slane %v6268_v13, %v8090_v36  ;;  %v7538_v1 = vpack.i.bf16 %v6151_v20, %v5761_v2  ;;  %v5762_v0 = vcombine.low %v11570_v24, %v11468_v26 }
 0x52c   : > { %v6152_v41 = vcombine.low %v11579_v7, %v11554_v44  ;;  %v6237_v4 = vcombine.high %v6171_v14, %v6187_v35  ;;  %v6133_v40 = vcombine.high %v11504_v18, %v11490_v37  ;;  %7514 = vrot.lane.b32.xlu0 %v7513_v52, %s7635_s12  ;;  %v12610_v56 = vcombine.high %v12586_v49, %v12585_v19  ;;  %v11620_v49 = vpop.permute.xlu0 %6382 }
 0x52d   : > { %v5898_v3 = vcombine.low %v5854_v46, %v11576_v38  ;;  %v6244_v61 = vrot.slane %v6236_v57, %v8090_v36  ;;  %v5899_v53 = vcombine.high %v5854_v46, %v11576_v38  ;;  %v12611_v35 = vcombine.high %v12607_v62, %v12608_v22  ;;  %v11624_v20 = vpop.permute.xlu1 %6380 }
 0x52e   : > { %v5893_v43 = vrot.slane %v12610_v56, %v8090_v36  ;;  %7539 = vrot.lane.b32.xlu1 %v7538_v1, %s7638_s14  ;;  %v11615_v18 = vrot.slane %v5743_v31, %v8090_v36  ;;  %v6283_v14 = vrot.slane %v6269_v55, %v8090_v36  ;;  %v6101_v19 = vcombine.high %v11520_v21, %v11501_v32 }
 0x52f   : > { %v5861_v37 = vrot.slane %v12611_v35, %v8090_v36  ;;  %v7523_v28 = vpack.i.bf16 %v6150_v33, %v5760_v59  ;;  %v5367_v13 = vcombine.high %v11533_v30, %v11508_v42  ;;  %v7548_v5 = vpack.i.bf16 %v6152_v41, %v5762_v0 }
 0x530   : > { %v6288_v38 = vcombine.low %v6244_v61, %v6276_v17  ;;  %v5763_v57 = vcombine.high %v11570_v24, %v11468_v26  ;;  %v12612_v31 = vcombine.high %v12589_v29, %v11346_v23  ;;  %v6251_v32 = vrot.slane %v6237_v4, %v8090_v36  ;;  %v11642_v22 = vpop.permute.xlu0 %6386 }
 0x531   : > { %v6147_v21 = vrot.slane %v6133_v40, %v8090_v36  ;;  %7524 = vrot.lane.b32.xlu0 %v7523_v28, %s7633_s10  ;;  %v4977_v42 = vcombine.high %v11546_v25, %v11530_v15  ;;  %v5901_v30 = vcombine.high %v5861_v37, %v5893_v43  ;;  %v6426_v62 = vcombine.low %v11483_v48, %v11549_v39  ;;  %v6385_v52 = vpop.permute.xlu1 %6384 }
 0x532   : > { %v5725_v2 = vrot.slane %v12612_v31, %v8090_v36  ;;  %7549 = vrot.lane.b32.xlu1 %v7548_v5, %s7634_s11  ;;  %v6289_v26 = vcombine.high %v6244_v61, %v6276_v17  ;;  %v5900_v24 = vcombine.low %v5861_v37, %v5893_v43  ;;  %v6115_v23 = vrot.slane %v6101_v19, %v8090_v36 }
 0x533   : > { %v7533_v16 = vpack.i.bf16 %v5367_v13, %v4977_v42  ;;  %v6291_v46 = vcombine.high %v6251_v32, %v6283_v14  ;;  %v6290_v55 = vcombine.low %v6251_v32, %v6283_v14  ;;  %v6410_v15 = vcombine.low %v11459_v63, %v11517_v6 }
 0x534   : > { %v5765_v29 = vcombine.high %v5725_v2, %v11615_v18  ;;  %v6427_v25 = vcombine.high %v11483_v48, %v11549_v39  ;;  %v7543_v59 = vpack.i.bf16 %v6288_v38, %v5898_v3  ;;  %v5764_v33 = vcombine.low %v5725_v2, %v11615_v18 }
 0x535   : > { %v6411_v17 = vcombine.high %v11459_v63, %v11517_v6  ;;  %v6546_v1 = vcombine.low %v11492_v12, %v11556_v34  ;;  %7534 = vrot.lane.b32.xlu0 %v7533_v16, %s7640_s16  ;;  %v6153_v0 = vcombine.high %v11579_v7, %v11554_v44  ;;  %v6155_v41 = vcombine.high %v6115_v23, %v6147_v21  ;;  %v6391_v6 = vpop.permute.xlu0 %6390 }
 0x536   : > { %v6547_v4 = vcombine.high %v11492_v12, %v11556_v34  ;;  %v6434_v48 = vrot.slane %v6426_v62, %v7701_v10  ;;  %v6442_v39 = vcombine.low %v11588_v27, %v11642_v22  ;;  %v7553_v40 = vpack.i.bf16 %v6289_v26, %v5899_v53  ;;  %v6389_v34 = vpop.permute.xlu1 %6388 }
 0x537   : > { %v6562_v63 = vcombine.low %v11525_v47, %v11593_v51  ;;  %v11663_v3 = vpack.i.bf16 %v6291_v46, %v5901_v30  ;;  %v11665_v56 = vpack.i.bf16 %v6290_v55, %v5900_v24  ;;  %v6154_v43 = vcombine.low %v6115_v23, %v6147_v21 }
 0x538   : > { %v6418_v44 = vrot.slane %v6410_v15, %v7701_v10  ;;  %v6441_v7 = vrot.slane %v6427_v25, %v7701_v10  ;;  %v6563_v12 = vcombine.high %v11525_v47, %v11593_v51  ;;  %v6458_v61 = vcombine.low %v11620_v49, %v6391_v6 }
 0x539   : > { %v6425_v53 = vrot.slane %v6411_v17, %v7701_v10  ;;  %v6554_v35 = vrot.slane %v6546_v1, %v7701_v10  ;;  %7544 = vrot.lane.b32.xlu0 %v7543_v59, %s7634_s11  ;;  %v7563_v37 = vpack.i.bf16 %v6153_v0, %v5763_v57  ;;  %v11675_v18 = vpack.i.bf16 %v6155_v41, %v5765_v29  ;;  %v11682_v38 = vpop.permute.xlu0 %7324 }
 0x53a   : > { %v6561_v14 = vrot.slane %v6547_v4, %v7701_v10  ;;  %v6474_v19 = vcombine.low %v6418_v44, %v6434_v48  ;;  %v6450_v28 = vrot.slane %v6442_v39, %v7701_v10  ;;  %v6466_v13 = vrot.slane %v6458_v61, %v7701_v10  ;;  %v6393_v42 = vpop.permute.xlu1 %6392 }
 0x53b   : > { %v6475_v47 = vcombine.high %v6418_v44, %v6434_v48  ;;  %v6570_v51 = vrot.slane %v6562_v63, %v7701_v10  ;;  %v6578_v5 = vcombine.low %v11624_v20, %v6389_v34  ;;  %v11684_v31 = vpack.i.bf16 %v6154_v43, %v5764_v33 }
 0x53c   : > { %v6490_v2 = vcombine.low %v6425_v53, %v6441_v7  ;;  %v6577_v57 = vrot.slane %v6563_v12, %v7701_v10  ;;  %v6459_v32 = vcombine.high %v11620_v49, %v6391_v6  ;;  %v6506_v21 = vcombine.low %v6450_v28, %v6466_v13 }
 0x53d   : > { %v6491_v30 = vcombine.high %v6425_v53, %v6441_v7  ;;  %v6507_v62 = vcombine.high %v6450_v28, %v6466_v13  ;;  %v6594_v26 = vcombine.low %v6385_v52, %v6393_v42  ;;  %v6595_v24 = vcombine.high %v6385_v52, %v6393_v42  ;;  %7554 = vrot.lane.b32.xlu0 %v7553_v40, %s7639_s15  ;;  %v11700_v52 = vpop.permute.xlu0 %7329 }
 0x53e   : > { %v11690_v29 = vrot.slane %v6474_v19, %v8090_v36  ;;  %v6443_v23 = vcombine.high %v11588_v27, %v11642_v22  ;;  %v6579_v16 = vcombine.high %v11624_v20, %v6389_v34  ;;  %v11696_v46 = vrot.slane %v6506_v21, %v8090_v36  ;;  %v7305_v20 = vpop.permute.xlu1 %7304 }
 0x53f   : > { %v6610_v49 = vcombine.low %v6554_v35, %v6570_v51  ;;  %v6611_v55 = vcombine.high %v6554_v35, %v6570_v51  ;;  %v6586_v15 = vrot.slane %v6578_v5, %v7701_v10  ;;  %v6602_v25 = vrot.slane %v6594_v26, %v7701_v10 }
 0x540   : > { %v6626_v59 = vcombine.low %v6561_v14, %v6577_v57  ;;  %v6473_v33 = vrot.slane %v6459_v32, %v7701_v10  ;;  %v6538_v17 = vcombine.low %v11690_v29, %v11696_v46  ;;  %v6609_v27 = vrot.slane %v6595_v24, %v7701_v10 }
 0x541   : > { %v11707_v22 = vrot.slane %v6475_v47, %v8090_v36  ;;  %v11710_v1 = vrot.slane %v6507_v62, %v8090_v36  ;;  %v6642_v0 = vcombine.low %v6586_v15, %v6602_v25  ;;  %v6643_v41 = vcombine.high %v6586_v15, %v6602_v25  ;;  %7564 = vrot.lane.b32.xlu0 %v7563_v37, %s7639_s15  ;;  %v11730_v7 = vpop.permute.xlu0 %7334  ;;  %v12613_v15 = vld [vmem:[#allocation10_spill] sm:$0xff]  ;;  %v12614_v25 = vld [vmem:[#allocation44_spill] sm:$0xff] }
 0x542   : > { %v11714_v4 = vrot.slane %v6490_v2, %v8090_v36  ;;  %v6627_v48 = vcombine.high %v6561_v14, %v6577_v57  ;;  %v6457_v39 = vrot.slane %v6443_v23, %v7701_v10  ;;  %v6593_v40 = vrot.slane %v6579_v16, %v7701_v10  ;;  %v7310_v53 = vpop.permute.xlu1 %7309 }
 0x543   : > { %v11719_v63 = vrot.slane %v6610_v49, %v8090_v36  ;;  %v11722_v6 = vrot.slane %v6611_v55, %v8090_v36  ;;  %v11725_v43 = vrot.slane %v6642_v0, %v8090_v36  ;;  %v11728_v44 = vrot.slane %v6643_v41, %v8090_v36 }
 0x544   : > { %v11733_v12 = vrot.slane %v6491_v30, %v8090_v36  ;;  %v11736_v34 = vrot.slane %v6626_v59, %v8090_v36  ;;  %v6522_v10 = vcombine.low %v6457_v39, %v6473_v33  ;;  %v6658_v61 = vcombine.low %v6593_v40, %v6609_v27 }
 0x545   : > { %v6523_v35 = vcombine.high %v6457_v39, %v6473_v33  ;;  %v6674_v37 = vcombine.low %v11719_v63, %v11725_v43  ;;  %v6540_v14 = vcombine.low %v11707_v22, %v11710_v1  ;;  %v6676_v19 = vcombine.low %v11722_v6, %v11728_v44  ;;  %v11752_v32 = vpop.permute.xlu0 %7339  ;;  %v12617_v39 = vld [vmem:[#allocation20_spill] sm:$0xff] }
 0x546   : > { %v11745_v28 = vrot.slane %v6627_v48, %v8090_v36  ;;  %v7332_v13 = vunpack.i.h.bf16 %v11700_v52  ;;  %v6539_v47 = vcombine.high %v11690_v29, %v11696_v46  ;;  %v6675_v51 = vcombine.high %v11719_v63, %v11725_v43  ;;  %v7315_v26 = vpop.permute.xlu1 %7314  ;;  %v12616_v48 = vld [vmem:[#allocation21_spill] sm:$0xff] }
 0x547   : > { %v6659_v5 = vcombine.high %v6593_v40, %v6609_v27  ;;  %v7307_v2 = vunpack.i.h.bf16 %v7305_v20  ;;  %v7306_v57 = vunpack.i.l.bf16 %v7305_v20  ;;  %v7573_v21 = vpack.i.bf16 %v6676_v19, %v6540_v14 }
 0x548   : > { %v11755_v42 = vrot.slane %v6522_v10, %v8090_v36  ;;  %v11758_v30 = vrot.slane %v6658_v61, %v8090_v36  ;;  %v7311_v62 = vunpack.i.l.bf16 %v7310_v53  ;;  %v7558_v24 = vpack.i.bf16 %v6675_v51, %v6539_v47  ;;  %v12619_v10 = vld [vmem:[#allocation58_spill] sm:$0xff]  ;;  %v12620_v61 = vld [vmem:[#allocation56_spill] sm:$0xff] }
 0x549   : > { %v11761_v23 = vrot.slane %v6523_v35, %v8090_v36  ;;  %v7327_v16 = vunpack.i.h.bf16 %v11682_v38  ;;  %v7326_v49 = vunpack.i.l.bf16 %v11682_v38  ;;  %v7312_v55 = vunpack.i.h.bf16 %v7310_v53  ;;  %7574 = vrot.lane.b32.xlu0 %v7573_v21, %s7633_s10  ;;  %s6964_s10 = sshll.u32 %s12656_s25, 5 }
 0x54a   : > { %v12615_v59 = vcombine.low %v12613_v15, %v12614_v25  ;;  %v7331_v27 = vunpack.i.l.bf16 %v11700_v52  ;;  %v7317_v20 = vunpack.i.h.bf16 %v7315_v26  ;;  %v7316_v0 = vunpack.i.l.bf16 %v7315_v26  ;;  %7559 = vrot.lane.b32.xlu1 %v7558_v24, %s7637_s13  ;;  %v7345_v52 = vpop.permute.xlu0 %7344  ;;  %v7320_v47 = vpop.permute.xlu1 %7319  ;;  %s278_s13 = scalar_lea.vmem %s12056_s7, %s6964_s10 }
 0x54b   : > { %v11773_v41 = vrot.slane %v6659_v5, %v8090_v36  ;;  %v12618_v38 = vcombine.low %v12616_v48, %v12617_v39  ;;  %v12621_v53 = vcombine.low %v12619_v10, %v12620_v61  ;;  %v7337_v14 = vunpack.i.h.bf16 %v11730_v7 }
 0x54c   : > { %v4780_v33 = vsel %vm480_vm5, %v12615_v59, %v7332_v13  ;;  %v7336_v13 = vunpack.i.l.bf16 %v11730_v7  ;;  %v6543_v36 = vcombine.high %v11714_v4, %v11755_v42  ;;  %v6679_v51 = vcombine.high %v11736_v34, %v11758_v30 }
 0x54d   : > { %v3586_v40 = vsel %vm480_vm5, %v12618_v38, %v7306_v57  ;;  %v3984_v35 = vsel %vm480_vm5, %v12621_v53, %v7307_v2  ;;  %v7322_v57 = vunpack.i.h.bf16 %v7320_v47  ;;  %v7321_v21 = vunpack.i.l.bf16 %v7320_v47  ;;  %7584 = vrot.lane.b32.xlu0 %v11663_v3, %s7640_s16 }
 0x54e   : > { %v3587_v19 = vsel %vm482_vm6, %v3586_v40, %v7311_v62  ;;  %v3985_v5 = vsel %vm482_vm6, %v3984_v35, %v7312_v55  ;;  %v6541_v2 = vcombine.high %v11707_v22, %v11710_v1  ;;  %v7342_v26 = vunpack.i.h.bf16 %v11752_v32  ;;  %7569 = vrot.lane.b32.xlu1 %v11665_v56, %s7635_s12  ;;  %v7360_v25 = vpop.permute.xlu0 %7359  ;;  %v12623_v40 = vld [vmem:[#allocation67_spill] sm:$0xff] }
 0x54f   : > { %v3588_v62 = vsel %vm484_vm7, %v3587_v19, %v7316_v0  ;;  %v3986_v7 = vsel %vm484_vm7, %v3985_v5, %v7317_v20  ;;  %v7341_v24 = vunpack.i.l.bf16 %v11752_v32  ;;  %v6677_v3 = vcombine.high %v11722_v6, %v11728_v44  ;;  %v7350_v20 = vpop.permute.xlu1 %7349 }
 0x550   : > { %v3589_v55 = vsel %vm486_vm8, %v3588_v62, %v7321_v21  ;;  %v3987_v15 = vsel %vm486_vm8, %v3986_v7, %v7322_v57  ;;  %v6681_v22 = vcombine.high %v11745_v28, %v11773_v41  ;;  %v7347_v1 = vunpack.i.h.bf16 %v7345_v52 }
 0x551   : > { %v7346_v59 = vunpack.i.l.bf16 %v7345_v52  ;;  %v3590_v0 = vsel %vm488_vm9, %v3589_v55, %v7326_v49  ;;  %v3988_v32 = vsel %vm488_vm9, %v3987_v15, %v7327_v16  ;;  %7594 = vrot.lane.b32.xlu0 %v11675_v18, %s7640_s16  ;;  %v6545_v56 = vcombine.high %v11733_v12, %v11761_v23  ;;  %v12622_v49 = vld [vmem:[#allocation69_spill] sm:$0xff] }
 0x552   : > { %v6678_v48 = vcombine.low %v11736_v34, %v11758_v30  ;;  %v3591_v6 = vsel %vm490_vm10, %v3590_v0, %v7336_v13  ;;  %v3989_v44 = vsel %vm490_vm10, %v3988_v32, %v7337_v14  ;;  %v7352_v39 = vunpack.i.h.bf16 %v7350_v20  ;;  %7579 = vrot.lane.b32.xlu1 %v11684_v31, %s7635_s12  ;;  %v7365_v30 = vpop.permute.xlu0 %7364 }
 0x553   : > { %v7351_v38 = vunpack.i.l.bf16 %v7350_v20  ;;  %v11820_v16 = vsel %vm492_vm11, %v3591_v6, %v7346_v59  ;;  %v11823_v18 = vsel %vm492_vm11, %v3989_v44, %v7347_v1  ;;  %v12624_v10 = vcombine.low %v12622_v49, %v12623_v40  ;;  %v7355_v52 = vpop.permute.xlu1 %7354  ;;  %v6825_v6 = vld [vmem:[%s12055_s6 + $0x8] sm:$0xff] }
 0x554   : > { %v7603_v61 = vpack.i.bf16 %v6679_v51, %v6543_v36  ;;  %v6542_v53 = vcombine.low %v11714_v4, %v11755_v42  ;;  %v6752_v35 = vpack.c.bf16 %v11823_v18, %v11820_v16  ;;  %v4781_v14 = vsel %vm482_vm6, %v4780_v33, %v7342_v26 }
 0x555   : > { %v4374_v34 = vsel %vm480_vm5, %v12624_v10, %v7331_v27  ;;  %v7588_v19 = vpack.i.bf16 %v6677_v3, %v6541_v2  ;;  %v7613_v13 = vpack.i.bf16 %v6681_v22, %v6545_v56  ;;  %v7357_v47 = vunpack.i.h.bf16 %v7355_v52 }
 0x556   : > { %v4375_v31 = vsel %vm482_vm6, %v4374_v34, %v7341_v24  ;;  %v7356_v5 = vunpack.i.l.bf16 %v7355_v52  ;;  %7604 = vrot.lane.b32.xlu0 %v7603_v61, %s7639_s15  ;;  %v7598_v27 = vpack.i.bf16 %v6678_v48, %v6542_v53  ;;  %v6680_v36 = vcombine.low %v11745_v28, %v11773_v41  ;;  %v7370_v7 = vpop.permute.xlu0 %7369  ;;  %v3257_v48 = vld [vmem:[%s12053_s4] sm:$0xff]  ;;  %v12626_v52 = vld [vmem:[#allocation77_spill] sm:$0xff] }
 0x557   : > { %v4376_v4 = vsel %vm484_vm7, %v4375_v31, %v7351_v38  ;;  %v4782_v42 = vsel %vm484_vm7, %v4781_v14, %v7352_v39  ;;  %v7362_v51 = vunpack.i.h.bf16 %v7360_v25  ;;  %v7361_v57 = vunpack.i.l.bf16 %v7360_v25  ;;  %7589 = vrot.lane.b32.xlu1 %v7588_v19, %s7638_s14  ;;  %v11845_v28 = vpop.permute.xlu1 %7399  ;;  %v12625_v14 = vld [vmem:[#allocation78_spill] sm:$0xff] }
 0x558   : > { %v4377_v33 = vsel %vm486_vm8, %v4376_v4, %v7356_v5  ;;  %v4783_v21 = vsel %vm486_vm8, %v4782_v42, %v7357_v47  ;;  %v7367_v2 = vunpack.i.h.bf16 %v7365_v30  ;;  %v7366_v62 = vunpack.i.l.bf16 %v7365_v30  ;;  %v12628_v47 = vld [vmem:[#allocation31_spill] sm:$0xff]  ;;  %v12629_v5 = vld [vmem:[#allocation32_spill] sm:$0xff] }
 0x559   : > { %v4378_v26 = vsel %vm488_vm9, %v4377_v33, %v7361_v57  ;;  %v4784_v24 = vsel %vm488_vm9, %v4783_v21, %v7362_v51  ;;  %v7372_v41 = vunpack.i.h.bf16 %v7370_v7  ;;  %v7371_v55 = vunpack.i.l.bf16 %v7370_v7 }
 0x55a   : > { %v4379_v15 = vsel %vm490_vm10, %v4378_v26, %v7366_v62  ;;  %v4785_v25 = vsel %vm490_vm10, %v4784_v24, %v7367_v2  ;;  %7614 = vrot.lane.b32.xlu0 %v7613_v13, %s7640_s16  ;;  %v6544_v3 = vcombine.low %v11733_v12, %v11761_v23  ;;  %v7375_v59 = vpop.permute.xlu0 %7374  ;;  %v12627_v19 = vcombine.low %v12625_v14, %v12626_v52  ;;  %v12634_v14 = vld [vmem:[#allocation2_spill] sm:$0xff]  ;;  %v12635_v52 = vld [vmem:[#allocation60_spill] sm:$0xff] }
 0x55b   : > { %7599 = vrot.lane.b32.xlu1 %v7598_v27, %s7634_s11  ;;  %v11854_v22 = vsel %vm492_vm11, %v4379_v15, %v7371_v55  ;;  %v11857_v1 = vsel %vm492_vm11, %v4785_v25, %v7372_v41  ;;  %v7405_v0 = vpop.permute.xlu1 %7404  ;;  %v7377_v39 = vunpack.i.h.bf16 %v7375_v59  ;;  %v7376_v38 = vunpack.i.l.bf16 %v7375_v59 }
 0x55c   : > { %v6754_v20 = vpack.c.bf16 %v11857_v1, %v11854_v22  ;;  %v7608_v32 = vpack.i.bf16 %v6680_v36, %v6544_v3  ;;  %v12630_v27 = vcombine.low %v12628_v47, %v12629_v5  ;;  %v7402_v4 = vunpack.i.h.bf16 %v11845_v28 }
 0x55d   : > { %v3991_v13 = vsel %vm480_vm5, %v12627_v19, %v7377_v39  ;;  %v7401_v42 = vunpack.i.l.bf16 %v11845_v28  ;;  %v7407_v24 = vunpack.i.h.bf16 %v7405_v0  ;;  %v7406_v41 = vunpack.i.l.bf16 %v7405_v0 }
 0x55e   : > { %v7380_v56 = vpop.permute.xlu0 %7379  ;;  %v3593_v36 = vsel %vm480_vm5, %v12630_v27, %v7376_v38  ;;  %v12636_v19 = vcombine.low %v12634_v14, %v12635_v52  ;;  %v12637_v22 = vcombine.low %v10818_v50, %v10796_v60 }
 0x55f   : > { %7609 = vrot.lane.b32.xlu1 %v7608_v32, %s7635_s12  ;;  %v7410_v12 = vpop.permute.xlu1 %7409  ;;  %v7382_v49 = vunpack.i.h.bf16 %v7380_v56  ;;  %v7381_v40 = vunpack.i.l.bf16 %v7380_v56 }
 0x560   : > { %v7412_v32 = vunpack.i.h.bf16 %v7410_v12  ;;  %v7411_v56 = vunpack.i.l.bf16 %v7410_v12 }
 0x561   : > { %v3594_v51 = vsel %vm482_vm6, %v3593_v36, %v7381_v40  ;;  %v3992_v57 = vsel %vm482_vm6, %v3991_v13, %v7382_v49  ;;  %v4381_v13 = vsel %vm480_vm5, %v12636_v19, %v7401_v42 }
 0x562   : > { %v7385_v23 = vpop.permute.xlu0 %7384 }
 0x563   : > { %6764 = vperm.xlu1 %7302, %v3257_v48   ;;  %v7415_v44 = vpop.permute.xlu1 %7414  ;;  %v7387_v34 = vunpack.i.h.bf16 %v7385_v23  ;;  %v7386_v30 = vunpack.i.l.bf16 %v7385_v23 }
 0x564   : > { %v7417_v25 = vunpack.i.h.bf16 %v7415_v44  ;;  %v7416_v28 = vunpack.i.l.bf16 %v7415_v44 }
 0x565   : > { %v3595_v21 = vsel %vm484_vm7, %v3594_v51, %v7386_v30  ;;  %v3993_v2 = vsel %vm484_vm7, %v3992_v57, %v7387_v34  ;;  %v12631_v30 = vld [vmem:[#allocation48_spill] sm:$0xff] }
 0x566   : > { %v7390_v10 = vpop.permute.xlu0 %7389 }
 0x567   : > { %6833 = vperm.xlu1 %7302, %v6825_v6   ;;  %v7420_v61 = vpop.permute.xlu1 %7419  ;;  %v7392_v53 = vunpack.i.h.bf16 %v7390_v10  ;;  %v7391_v31 = vunpack.i.l.bf16 %v7390_v10 }
 0x568   : > { %v7422_v39 = vunpack.i.h.bf16 %v7420_v61  ;;  %v7421_v38 = vunpack.i.l.bf16 %v7420_v61  ;;  %v4382_v61 = vsel %vm482_vm6, %v4381_v13, %v7411_v56 }
 0x569   : > { %v3596_v55 = vsel %vm486_vm8, %v3595_v21, %v7391_v31  ;;  %v3994_v15 = vsel %vm486_vm8, %v3993_v2, %v7392_v53  ;;  %v12632_v53 = vld [vmem:[#allocation45_spill] sm:$0xff] }
 0x56a   : > { %v7395_v33 = vpop.permute.xlu0 %7394  ;;  %v12633_v31 = vcombine.low %v12631_v30, %v12632_v53  ;;  %v4383_v27 = vsel %vm484_vm7, %v4382_v61, %v7421_v38 }
 0x56b   : > { %v7435_v62 = vpop.permute.xlu1 %7434  ;;  %v7397_v7 = vunpack.i.h.bf16 %v7395_v33  ;;  %v7396_v26 = vunpack.i.l.bf16 %v7395_v33 }
 0x56c   : > { %v4787_v12 = vsel %vm480_vm5, %v12633_v31, %v7402_v4  ;;  %v7437_v4 = vunpack.i.h.bf16 %v7435_v62  ;;  %v7436_v21 = vunpack.i.l.bf16 %v7435_v62 }
 0x56d   : > { %v3597_v3 = vsel %vm488_vm9, %v3596_v55, %v7396_v26  ;;  %v3995_v59 = vsel %vm488_vm9, %v3994_v15, %v7397_v7  ;;  %v4788_v47 = vsel %vm482_vm6, %v4787_v12, %v7412_v32 }
 0x56e   : > { %v7425_v48 = vpop.permute.xlu0 %7424  ;;  %v3598_v23 = vsel %vm490_vm10, %v3597_v3, %v7406_v41  ;;  %v3996_v6 = vsel %vm490_vm10, %v3995_v59, %v7407_v24  ;;  %v4789_v36 = vsel %vm484_vm7, %v4788_v47, %v7422_v39 }
 0x56f   : > { %v7440_v0 = vpop.permute.xlu1 %7439  ;;  %v3599_v49 = vsel %vm492_vm11, %v3598_v23, %v7416_v28  ;;  %v3997_v40 = vsel %vm492_vm11, %v3996_v6, %v7417_v25  ;;  %v7427_v10 = vunpack.i.h.bf16 %v7425_v48  ;;  %v7426_v44 = vunpack.i.l.bf16 %v7425_v48 }
 0x570   : > { %v6753_v34 = vpack.c.bf16 %v3997_v40, %v3599_v49  ;;  %v7442_v7 = vunpack.i.h.bf16 %v7440_v0  ;;  %v7441_v26 = vunpack.i.l.bf16 %v7440_v0 }
 0x571   : > { %v4790_v42 = vsel %vm486_vm8, %v4789_v36, %v7427_v10  ;;  %v4384_v2 = vsel %vm486_vm8, %v4383_v27, %v7426_v44 }
 0x572   : > { %v7430_v5 = vpop.permute.xlu0 %7429  ;;  %6777 = vmatprep.subr.bf16.mxu1 %v6753_v34 }
 0x573   : > { %v7445_v51 = vpop.permute.xlu1 %7444  ;;  %v7432_v57 = vunpack.i.h.bf16 %v7430_v5  ;;  %v7431_v33 = vunpack.i.l.bf16 %v7430_v5  ;;  %6778 = vmatpush1.bf16.msra.mxu1 %v6752_v35 }
 0x574   : > { %v7447_v6 = vunpack.i.h.bf16 %v7445_v51  ;;  %v7446_v39 = vunpack.i.l.bf16 %v7445_v51 }
 0x575   : > { %v4385_v24 = vsel %vm488_vm9, %v4384_v2, %v7431_v33  ;;  %v4791_v41 = vsel %vm488_vm9, %v4790_v42, %v7432_v57 }
 0x576   : > { %v4386_v55 = vsel %vm490_vm10, %v4385_v24, %v7436_v21  ;;  %v4792_v15 = vsel %vm490_vm10, %v4791_v41, %v7437_v4  ;;  %v5177_v1 = vsel %vm480_vm5, %v12637_v22, %v7446_v39 }
 0x577   : > { %v7455_v25 = vpop.permute.xlu1 %7454  ;;  %v4387_v16 = vsel %vm492_vm11, %v4386_v55, %v7441_v26  ;;  %v4793_v18 = vsel %vm492_vm11, %v4792_v15, %v7442_v7 }
 0x578   : > { %v6755_v35 = vpack.c.bf16 %v4793_v18, %v4387_v16  ;;  %v7457_v0 = vunpack.i.h.bf16 %v7455_v25  ;;  %v7456_v49 = vunpack.i.l.bf16 %v7455_v25  ;;  %v12640_v16 = vld [vmem:[#allocation18_spill] sm:$0xff]  ;;  %v12641_v18 = vld [vmem:[#allocation17_spill] sm:$0xff] }
 0x57a   : > { %6779 = vmatprep.subr.bf16.mxu1 %v6755_v35  ;;  %v7450_v28 = vpop.permute.xlu0 %7449  ;;  %v5178_v52 = vsel %vm482_vm6, %v5177_v1, %v7456_v49  ;;  %v12642_v35 = vcombine.low %v12640_v16, %v12641_v18  ;;  %v12649_v18 = vld [vmem:[#allocation25_spill] sm:$0xff] }
 0x57b   : > { %v7465_v62 = vpop.permute.xlu1 %7464  ;;  %6780 = vmatpush1.bf16.msra.mxu1 %v6754_v20  ;;  %v12638_v20 = vld [vmem:[#allocation54_spill] sm:$0xff]  ;;  %v7452_v24 = vunpack.i.h.bf16 %v7450_v28  ;;  %v7451_v41 = vunpack.i.l.bf16 %v7450_v28 }
 0x57c   : > { %v7467_v40 = vunpack.i.h.bf16 %v7465_v62  ;;  %v7466_v10 = vunpack.i.l.bf16 %v7465_v62  ;;  %v12639_v53 = vcombine.low %v11023_v9, %v12638_v20 }
 0x57d   : > { %v5560_v62 = vsel %vm480_vm5, %v12642_v35, %v7452_v24  ;;  %v12650_v35 = vld [vmem:[#allocation26_spill] sm:$0xff] }
 0x57e   : > { %v7460_v59 = vpop.permute.xlu0 %7459  ;;  %v5567_v31 = vsel %vm480_vm5, %v12639_v53, %v7447_v6  ;;  %v5179_v47 = vsel %vm484_vm7, %v5178_v52, %v7466_v10 }
 0x57f   : > { %v7470_v3 = vpop.permute.xlu1 %7469  ;;  %v5568_v19 = vsel %vm482_vm6, %v5567_v31, %v7457_v0  ;;  %v7462_v55 = vunpack.i.h.bf16 %v7460_v59  ;;  %v7461_v15 = vunpack.i.l.bf16 %v7460_v59 }
 0x580   : > { %v5569_v5 = vsel %vm484_vm7, %v5568_v19, %v7467_v40  ;;  %v7471_v0 = vunpack.i.l.bf16 %v7470_v3 }
 0x581   : > { %v5561_v28 = vsel %vm482_vm6, %v5560_v62, %v7462_v55  ;;  %v12646_v55 = vld [vmem:[#allocation49_spill] sm:$0xff]  ;;  %v12651_v62 = vcombine.low %v12649_v18, %v12650_v35 }
 0x582   : > { %v7475_v56 = vpop.permute.xlu0 %7474 }
 0x583   : > { %v7480_v32 = vpop.permute.xlu1 %7479  ;;  %v7477_v44 = vunpack.i.h.bf16 %v7475_v56  ;;  %v7476_v34 = vunpack.i.l.bf16 %v7475_v56  ;;  %v12643_v56 = vld [vmem:[#allocation65_spill] sm:$0xff] }
 0x584   : > { %v7482_v40 = vunpack.i.h.bf16 %v7480_v32  ;;  %v7481_v10 = vunpack.i.l.bf16 %v7480_v32 }
 0x585   : > { %v5570_v50 = vsel %vm486_vm8, %v5569_v5, %v7477_v44  ;;  %v5180_v27 = vsel %vm486_vm8, %v5179_v47, %v7476_v34 }
 0x586   : > { %v7485_v38 = vpop.permute.xlu0 %7484 }
 0x587   : > { %v7487_v12 = vunpack.i.h.bf16 %v7485_v38  ;;  %v7486_v14 = vunpack.i.l.bf16 %v7485_v38  ;;  %v7472_v38 = vunpack.i.h.bf16 %v7470_v3 }
 0x589   : > { %v5181_v36 = vsel %vm488_vm9, %v5180_v27, %v7486_v14  ;;  %v5571_v51 = vsel %vm488_vm9, %v5570_v50, %v7487_v12  ;;  %v5562_v53 = vsel %vm484_vm7, %v5561_v28, %v7472_v38  ;;  %v12652_v38 = vcombine.low %v12603_v11, %v12602_v54 }
 0x58a   : > { %v11916_v48 = vpop.permute.xlu1 %7489  ;;  %v7495_v60 = vpop.permute.xlu0 %7494  ;;  %v5563_v12 = vsel %vm486_vm8, %v5562_v53, %v7482_v40 }
 0x58b   : > { %v7497_v44 = vunpack.i.h.bf16 %v7495_v60  ;;  %v7496_v34 = vunpack.i.l.bf16 %v7495_v60 }
 0x58d   : > { %v5564_v52 = vsel %vm488_vm9, %v5563_v12, %v7497_v44 }
 0x58e   : > { %v7500_v23 = vpop.permute.xlu1 %7499 }
 0x58f   : > { %v7502_v13 = vunpack.i.h.bf16 %v7500_v23  ;;  %v7501_v61 = vunpack.i.l.bf16 %v7500_v23  ;;  %v12644_v23 = vld [vmem:[#allocation62_spill] sm:$0xff] }
 0x590   : > { %v12645_v6 = vcombine.low %v12643_v56, %v12644_v23 }
 0x591   : > { %v5182_v4 = vsel %vm490_vm10, %v5181_v36, %v7501_v61  ;;  %v5572_v21 = vsel %vm490_vm10, %v5571_v51, %v7502_v13  ;;  %v7492_v51 = vunpack.i.h.bf16 %v11916_v48 }
 0x592   : > { %v5170_v39 = vsel %vm480_vm5, %v12645_v6, %v7451_v41 }
 0x593   : > { %v11918_v30 = vpop.permute.xlu1 %7509  ;;  %v5171_v49 = vsel %vm482_vm6, %v5170_v39, %v7461_v15  ;;  %v12647_v15 = vld [vmem:[#allocation46_spill] sm:$0xff] }
 0x594   : > { %v5172_v20 = vsel %vm484_vm7, %v5171_v49, %v7471_v0 }
 0x595   : > { %v5173_v31 = vsel %vm486_vm8, %v5172_v20, %v7481_v10 }
 0x596   : > { %v5174_v14 = vsel %vm488_vm9, %v5173_v31, %v7496_v34 }
 0x597   : > { %v7520_v9 = vpop.permute.xlu1 %7519 }
 0x598   : > { %v7522_v57 = vunpack.i.h.bf16 %v7520_v9  ;;  %v7521_v33 = vunpack.i.l.bf16 %v7520_v9 }
 0x59a   : > { %v7505_v42 = vpop.permute.xlu0 %7504  ;;  %v5183_v2 = vsel %vm492_vm11, %v5182_v4, %v7521_v33  ;;  %v5573_v7 = vsel %vm492_vm11, %v5572_v21, %v7522_v57  ;;  %v7491_v57 = vunpack.i.l.bf16 %v11916_v48  ;;  %v7512_v4 = vunpack.i.h.bf16 %v11918_v30 }
 0x59b   : > { %v6757_v26 = vpack.c.bf16 %v5573_v7, %v5183_v2  ;;  %v7511_v21 = vunpack.i.l.bf16 %v11918_v30  ;;  %v7507_v2 = vunpack.i.h.bf16 %v7505_v42  ;;  %v7506_v7 = vunpack.i.l.bf16 %v7505_v42 }
 0x59c   : > { %v7530_v27 = vpop.permute.xlu1 %7529  ;;  %v6355_v48 = vsel %vm480_vm5, %v12651_v62, %v7492_v51 }
 0x59d   : > { %6781 = vmatprep.subr.bf16.mxu1 %v6757_v26  ;;  %v7532_v56 = vunpack.i.h.bf16 %v7530_v27  ;;  %v7531_v23 = vunpack.i.l.bf16 %v7530_v27  ;;  %v6356_v42 = vsel %vm482_vm6, %v6355_v48, %v7512_v4  ;;  %v6348_v39 = vsel %vm480_vm5, %v6148_v8, %v7507_v2 }
 0x59e   : > { %v7515_v25 = vpop.permute.xlu0 %7514  ;;  %v5958_v0 = vsel %vm480_vm5, %v12652_v38, %v7506_v7 }
 0x59f   : > { %v7517_v22 = vunpack.i.h.bf16 %v7515_v25  ;;  %v7516_v1 = vunpack.i.l.bf16 %v7515_v25  ;;  %v12648_v25 = vcombine.low %v12646_v55, %v12647_v15  ;;  %v6357_v45 = vsel %vm484_vm7, %v6356_v42, %v7532_v56 }
 0x5a0   : > { %v7540_v36 = vpop.permute.xlu1 %7539 }
 0x5a1   : > { %v5175_v13 = vsel %vm490_vm10, %v5174_v14, %v7516_v1  ;;  %v5565_v61 = vsel %vm490_vm10, %v5564_v52, %v7517_v22  ;;  %v5965_v16 = vsel %vm480_vm5, %v12648_v25, %v7491_v57  ;;  %v7542_v44 = vunpack.i.h.bf16 %v7540_v36 }
 0x5a2   : > { %v5966_v30 = vsel %vm482_vm6, %v5965_v16, %v7511_v21  ;;  %v7541_v34 = vunpack.i.l.bf16 %v7540_v36 }
 0x5a3   : > { %v7525_v59 = vpop.permute.xlu0 %7524  ;;  %v5967_v58 = vsel %vm484_vm7, %v5966_v30, %v7531_v23 }
 0x5a4   : > { %v7550_v26 = vpop.permute.xlu1 %7549  ;;  %v7527_v24 = vunpack.i.h.bf16 %v7525_v59  ;;  %v7526_v41 = vunpack.i.l.bf16 %v7525_v59 }
 0x5a5   : > { %v7551_v8 = vunpack.i.l.bf16 %v7550_v26 }
 0x5a6   : > { %v5959_v28 = vsel %vm482_vm6, %v5958_v0, %v7526_v41  ;;  %v6349_v40 = vsel %vm482_vm6, %v6348_v39, %v7527_v24 }
 0x5a7   : > { %v7535_v3 = vpop.permute.xlu0 %7534  ;;  %v5960_v54 = vsel %vm484_vm7, %v5959_v28, %v7541_v34  ;;  %v6350_v11 = vsel %vm484_vm7, %v6349_v40, %v7542_v44 }
 0x5a8   : > { %v7537_v19 = vunpack.i.h.bf16 %v7535_v3  ;;  %v7536_v32 = vunpack.i.l.bf16 %v7535_v3 }
 0x5aa   : > { %v5176_v47 = vsel %vm492_vm11, %v5175_v13, %v7536_v32  ;;  %v5566_v5 = vsel %vm492_vm11, %v5565_v61, %v7537_v19 }
 0x5ab   : > { %v7545_v60 = vpop.permute.xlu0 %7544  ;;  %v6756_v50 = vpack.c.bf16 %v5566_v5, %v5176_v47  ;;  %v7552_v5 = vunpack.i.h.bf16 %v7550_v26 }
 0x5ac   : > { %v7547_v10 = vunpack.i.h.bf16 %v7545_v60  ;;  %v7546_v59 = vunpack.i.l.bf16 %v7545_v60  ;;  %v5961_v60 = vsel %vm486_vm8, %v5960_v54, %v7551_v8 }
 0x5ad   : > { %6782 = vmatpush1.bf16.msra.mxu1 %v6756_v50  ;;  %v6351_v2 = vsel %vm486_vm8, %v6350_v11, %v7552_v5 }
 0x5ae   : > { %v6358_v3 = vsel %vm486_vm8, %v6357_v45, %v7547_v10  ;;  %v5968_v14 = vsel %vm486_vm8, %v5967_v58, %v7546_v59 }
 0x5af   : > { %v7555_v9 = vpop.permute.xlu0 %7554 }
 0x5b0   : > { %v7557_v22 = vunpack.i.h.bf16 %v7555_v9  ;;  %v7556_v1 = vunpack.i.l.bf16 %v7555_v9 }
 0x5b2   : > { %v5969_v32 = vsel %vm488_vm9, %v5968_v14, %v7556_v1  ;;  %v6359_v13 = vsel %vm488_vm9, %v6358_v3, %v7557_v22  ;;  %v3256_v14 = vld [vmem:[%s12052_s3] sm:$0xf] }
 0x5b3   : > { %v7565_v33 = vpop.permute.xlu0 %7564 }
 0x5b4   : > { %v7567_v61 = vunpack.i.h.bf16 %v7565_v33  ;;  %v7566_v47 = vunpack.i.l.bf16 %v7565_v33 }
 0x5b6   : > { %v5962_v26 = vsel %vm488_vm9, %v5961_v60, %v7566_v47  ;;  %v6352_v41 = vsel %vm488_vm9, %v6351_v2, %v7567_v61 }
 0x5bb   : > { %v11972_v6 = vpop.permute.xlu0 %7574 }
 0x5bc   : > { %v7560_v49 = vpop.permute.xlu1 %7559  ;;  %v7577_v48 = vunpack.i.h.bf16 %v11972_v6  ;;  %v7576_v56 = vunpack.i.l.bf16 %v11972_v6 }
 0x5bd   : > { %v7562_v55 = vunpack.i.h.bf16 %v7560_v49  ;;  %v7561_v15 = vunpack.i.l.bf16 %v7560_v49 }
 0x5bf   : > { %v7585_v20 = vpop.permute.xlu0 %7584  ;;  %v6745_v42 = vsel %vm480_vm5, %v6674_v37, %v7562_v55  ;;  %v6738_v39 = vsel %vm480_vm5, %v6538_v17, %v7561_v15 }
 0x5c0   : > { %v7570_v53 = vpop.permute.xlu1 %7569  ;;  %v7587_v31 = vunpack.i.h.bf16 %v7585_v20  ;;  %v7586_v12 = vunpack.i.l.bf16 %v7585_v20  ;;  %v6746_v28 = vsel %vm482_vm6, %v6745_v42, %v7577_v48  ;;  %v6739_v6 = vsel %vm482_vm6, %v6738_v39, %v7576_v56 }
 0x5c1   : > { %v7572_v52 = vunpack.i.h.bf16 %v7570_v53  ;;  %v7571_v19 = vunpack.i.l.bf16 %v7570_v53 }
 0x5c3   : > { %v5970_v50 = vsel %vm490_vm10, %v5969_v32, %v7571_v19  ;;  %v6360_v27 = vsel %vm490_vm10, %v6359_v13, %v7572_v52  ;;  %v7595_v9 = vpop.permute.xlu0 %7594  ;;  %v6824_v52 = vld [vmem:[%s12055_s6] sm:$0xff] }
 0x5c4   : > { %v7580_v36 = vpop.permute.xlu1 %7579  ;;  %v7597_v51 = vunpack.i.h.bf16 %v7595_v9  ;;  %v7596_v57 = vunpack.i.l.bf16 %v7595_v9  ;;  %v5971_v4 = vsel %vm492_vm11, %v5970_v50, %v7586_v12  ;;  %v6361_v21 = vsel %vm492_vm11, %v6360_v27, %v7587_v31  ;;  %6828 = vperm.xlu0 %7618, %v6824_v52   ;;  %v12653_v9 = vld [vmem:[#allocation14_spill] sm:$0xff] }
 0x5c5   : > { %v7582_v7 = vunpack.i.h.bf16 %v7580_v36  ;;  %v7581_v24 = vunpack.i.l.bf16 %v7580_v36  ;;  %v6759_v33 = vpack.c.bf16 %v6361_v21, %v5971_v4  ;;  %v7619_v4 = vld [vmem:[%s12054_s5] sm:$0xff]  }
 0x5c7   : > { %v5963_v25 = vsel %vm490_vm10, %v5962_v26, %v7581_v24  ;;  %v6353_v16 = vsel %vm490_vm10, %v6352_v41, %v7582_v7  ;;  %6783 = vmatprep.subr.bf16.mxu1 %v6759_v33 }
 0x5c8   : > { %v5964_v35 = vsel %vm492_vm11, %v5963_v25, %v7596_v57  ;;  %v6354_v62 = vsel %vm492_vm11, %v6353_v16, %v7597_v51  ;;  %v7605_v23 = vpop.permute.xlu0 %7604  ;;  %v12654_v51 = vld [vmem:[#allocation13_spill] sm:$0xff] }
 0x5c9   : > { %v7590_v18 = vpop.permute.xlu1 %7589  ;;  %v6758_v30 = vpack.c.bf16 %v6354_v62, %v5964_v35  ;;  %v7607_v17 = vunpack.i.h.bf16 %v7605_v23  ;;  %v7606_v37 = vunpack.i.l.bf16 %v7605_v23 }
 0x5ca   : > { %v7592_v38 = vunpack.i.h.bf16 %v7590_v18  ;;  %v7591_v0 = vunpack.i.l.bf16 %v7590_v18 }
 0x5cb   : > { %6784 = vmatpush1.bf16.msra.mxu1 %v6758_v30 }
 0x5cc   : > { %v6740_v59 = vsel %vm484_vm7, %v6739_v6, %v7591_v0  ;;  %v6747_v63 = vsel %vm484_vm7, %v6746_v28, %v7592_v38  ;;  %v7615_v46 = vpop.permute.xlu0 %7614 }
 0x5cd   : > { %v7600_v49 = vpop.permute.xlu1 %7599  ;;  %v7617_v1 = vunpack.i.h.bf16 %v7615_v46  ;;  %v7616_v58 = vunpack.i.l.bf16 %v7615_v46 }
 0x5ce   : > { %v7602_v40 = vunpack.i.h.bf16 %v7600_v49  ;;  %v7601_v10 = vunpack.i.l.bf16 %v7600_v49 }
 0x5d0   : > { %v6741_v43 = vsel %vm486_vm8, %v6740_v59, %v7601_v10  ;;  %v6748_v29 = vsel %vm486_vm8, %v6747_v63, %v7602_v40 }
 0x5d1   : > { %v7610_v44 = vpop.permute.xlu1 %7609  ;;  %v6749_v45 = vsel %vm488_vm9, %v6748_v29, %v7607_v17  ;;  %v6742_v8 = vsel %vm488_vm9, %v6741_v43, %v7606_v37 }
 0x5d2   : > { %v7612_v34 = vunpack.i.h.bf16 %v7610_v44  ;;  %v7611_v22 = vunpack.i.l.bf16 %v7610_v44 }
 0x5d4   : > { %v6750_v20 = vsel %vm490_vm10, %v6749_v45, %v7612_v34  ;;  %v6743_v54 = vsel %vm490_vm10, %v6742_v8, %v7611_v22 }
 0x5d5   : > { %v6751_v11 = vsel %vm492_vm11, %v6750_v20, %v7617_v1  ;;  %v6744_v53 = vsel %vm492_vm11, %v6743_v54, %v7616_v58 }
 0x5d6   : > { %v6761_v31 = vpack.c.bf16 %v6751_v11, %v6751_v11  ;;  %v6760_v12 = vpack.c.bf16 %v6744_v53, %v6744_v53 }
 0x5d8   : > { %6957 = vmatprep.subr.msk.bf16.mxu1 %vm2682_vm12, %v6761_v31  ;;  %v6772_v3 = vsel %vm2682_vm12, %v6760_v12, 0 }
 0x5d9   : > { %6786 = vmatpush1.bf16.msra.mxu1 %v6772_v3 }
 0x5dc   : > { %6958 = vmatmul.mubr.msk.bf16.vlgmr.msra.gmra.mrb[0].mxu1 %vm6767_vm15, %v3256_v14 }
 0x5e2   : > { %v6765_v19 = vpop.permute.xlu1 %6764 }
 0x5e6   : > { %v6834_v33 = vpop.permute.xlu1 %6833 }
 0x643   : > { %v6829_v21 = vpop.permute.xlu0 %6828 }
 0x6af   : > { %v6811_v32 = vpop.f32.mrb[0].mxu1 }
 0x6b0   : > { %v6812_v13 = vadd.f32 %v6811_v32, %v6765_v19  ;;  %v6813_v61 = vpop.f32.mrb[1].mxu1 }
 0x6b1   : > { %v6814_v47 = vadd.f32 %v6813_v61, %v6765_v19  ;;  %v6815_v5 = vpop.f32.mrb[2].mxu1 }
 0x6b2   : > { %v6818_v60 = vmax.f32 %v6812_v13, 0.0  ;;  %v6816_v50 = vpop.f32.mrb[3].mxu1 }
 0x6b3   : > { %v6819_v27 = vmax.f32 %v6814_v47, 0.0 }
 0x6b4   : > { %v6822_v57 = vpack.c.bf16 %v6818_v60, %v12654_v51 }
 0x6b5   : > { %v6823_v36 = vpack.c.bf16 %v6819_v27, %v12653_v9 }
 0x6b7   : > { %6844 = vmatprep.subr.bf16.mxu0 %v6823_v36 }
 0x6b8   : > { %6845 = vmatpush1.bf16.msra.mxu0 %v6822_v57 }
 0x6bb   : > { %6960 = vmatmul.mubr.msk.bf16.vlgmr.msra.gmra.mrb[4].mxu0 %vm480_vm5, %v7619_v4 }
 0x78e   : > { %v6878_v2 = vpop.f32.mrb[4].mxu0 }
 0x78f   : > { %v6880_v7 = vpop.f32.mrb[5].mxu0  ;;  %v6879_v24 = vadd.f32 %v6878_v2, %v6829_v21 }
 0x790   : > { %v6882_v26 = vpop.f32.mrb[6].mxu0  ;;  %v6881_v41 = vadd.f32 %v6880_v7, %v6829_v21 }
 0x791   : > { %v6883_v55 = vadd.f32 %v6882_v26, %v6834_v33  ;;  %v6884_v15 = vpop.f32.mrb[7].mxu0  ;;  %6887 = vst [vmem:[%s278_s13] sm:$0xff] %v6879_v24 }
 0x792   : > { %v6885_v25 = vadd.f32 %v6884_v15, %v6834_v33  ;;  %6888 = vst [vmem:[%s278_s13 + $0x8] sm:$0xff] %v6881_v41 }
 0x793   : > { %6889 = vst [vmem:[%s278_s13 + $0x10] sm:$0xff] %v6883_v55 }
 0x794   : > { %6890 = vst [vmem:[%s278_s13 + $0x18] sm:$0xff] %v6885_v25 }
 0x795 PF: > { %s17_s24 = sadd.s32 1, %s7626_s24  }
 0x796   : > { %p14_p4 = scmp.ge.s32.totalorder %s17_s24, 4  }
 0x798   :  { %16 = sbr.rel (!%p14_p4) target bundleno = 1 (0x1), region = 78 }

</bundles_post_ra>
